<compile_context>
chip_gen: v7x
topology: tpu7x:2x2x1
jax: 0.10.0
libtpu: 0.0.40
codegen_flags: <defaults>
</compile_context>

<pallas_src>
import functools
import math

import jax
import jax.numpy as jnp
from jax import lax
from jax.experimental import pallas as pl
from jax.experimental.pallas import tpu as pltpu

# ----------------------- small, deterministic hyper-params --------------------
B = 2            # batch
T = 8            # acoustic frames
C_MEL = 16       # mel feature dim
S_TR = 6         # transcription length
S_PAD = 8        # transcription length padded to a sublane-aligned 8
S_CTX = 5        # context length
VOCAB = 32
OUT_PAD = 128    # output lanes padded to 128 for an unmasked lane-dense store
PAD_ID = 0
SOS_ID = 1
MAX_SEQ_LEN = 16

EMBED_DIM = 16           # ContextEncoder.EMBED_DIM
CTX_HEADS = 2            # ContextEncoder.NUM_HEADS
CTX_FF = 64              # ContextEncoder.FEEDFORWARD_DIM
PRED_DIM = 16            # TransformerPredictionNetwork.output_dim (assumed)
PRED_HEADS = 2
PRED_FF = 64
LSTM_HIDDEN = 32         # LSTMEncoder.hidden_dim (assumed)
JOINT_DIM = 32           # JointNetwork.joint_dim (assumed)
CTX_ATTN_HEADS = 2       # Transducer.CONTEXT_ATTENTION_NUM_HEADS
NEG_INF = -1e9           # f32-safe additive mask


# ===================== in-kernel building blocks (2-D math) ===================
def _layer_norm(x, g, b, eps=1e-5):
    m = jnp.mean(x, axis=-1, keepdims=True)
    v = jnp.mean(jnp.square(x - m), axis=-1, keepdims=True)
    return (x - m) * lax.rsqrt(v + eps) * g + b


def _attend(q, k, v, out_w, out_b, num_heads, attn_bias):
    """Multi-head attention core on flattened (N, E) slabs.

    attn_bias is a full additive (Nq, Nk) bias (block-diag over batch +
    causal / key-padding where applicable).  Per-head results are accumulated
    straight into the output projection (no lane concat of 8-wide heads).
    """
    E = out_w.shape[0]
    dh = E // num_heads
    scale = 1.0 / math.sqrt(dh)
    acc = None
    for h in range(num_heads):                        # static unroll (2 heads)
        qh = q[:, h * dh:(h + 1) * dh]
        kh = k[:, h * dh:(h + 1) * dh]
        vh = v[:, h * dh:(h + 1) * dh]
        s = lax.dot_general(qh, kh, (((1,), (1,)), ((), ())),
                            preferred_element_type=jnp.float32) * scale + attn_bias
        s = s - jnp.max(s, axis=-1, keepdims=True)
        e = jnp.exp(s)
        a = e * pl.reciprocal(jnp.sum(e, axis=-1, keepdims=True), approx=True)
        hv = jnp.dot(a, vh, preferred_element_type=jnp.float32)          # (Nq, dh)
        contrib = jnp.dot(hv, out_w[h * dh:(h + 1) * dh, :],
                          preferred_element_type=jnp.float32)            # (Nq, E)
        acc = contrib if acc is None else acc + contrib
    return acc + out_b


def _encoder_layer(x, lyr, l, num_heads, attn_bias):
    """Post-norm PyTorch TransformerEncoderLayer (relu FFN, dropout=identity).

    `lyr` holds stacked per-layer parameter Refs; `lyr[name][l]` loads layer l.
    Operates on the whole flattened (B*S, E) slab at once.
    """
    E = x.shape[-1]
    qkv = jnp.dot(x, lyr["in_w"][l], preferred_element_type=jnp.float32) + lyr["in_b"][l]
    attn = _attend(qkv[:, 0:E], qkv[:, E:2 * E], qkv[:, 2 * E:3 * E],
                   lyr["out_w"][l], lyr["out_b"][l], num_heads, attn_bias)
    x = _layer_norm(x + attn, lyr["ln1_g"][l], lyr["ln1_b"][l])
    h = jnp.maximum(
        jnp.dot(x, lyr["w1"][l], preferred_element_type=jnp.float32) + lyr["b1"][l], 0.0)
    h = jnp.dot(h, lyr["w2"][l], preferred_element_type=jnp.float32) + lyr["b2"][l]
    return _layer_norm(x + h, lyr["ln2_g"][l], lyr["ln2_b"][l])


# ============================ the fused kernel ================================
def _transducer_kernel(*refs, treedef, n_data, n_param):
    (mel_ref, oh_tr_ref, oh_ctx_ref,
     pred_bias_ref, ctx_bias_ref, xattn_bias_ref) = refs[:n_data]
    out_ref = refs[n_data + n_param]
    acoustic_ref = refs[n_data + n_param + 1]          # VMEM scratch (T*B, H)
    p = jax.tree_util.tree_unflatten(treedef, refs[n_data:n_data + n_param])

    H = LSTM_HIDDEN
    E = PRED_DIM

    # ------------------------- LSTM acoustic encoder --------------------------
    # TODO(synk): LSTMEncoder source not provided; assumed single-layer
    # unidirectional LSTM (C_MEL -> LSTM_HIDDEN).  Gate columns ordered
    # (i, f, o, g) so the sigmoids are one contiguous 96-lane slice; valid for
    # our own random init (PyTorch checkpoints would need a gate permutation).
    w_ih = p["lstm"]["w_ih"][...]
    w_hh = p["lstm"]["w_hh"][...]
    lb = p["lstm"]["b"][...]                             # combined b_ih + b_hh
    xp = jnp.dot(mel_ref[...], w_ih, preferred_element_type=jnp.float32) + lb   # (T*B, 4H)
    h_t = jnp.zeros((B, H), jnp.float32)
    c_t = jnp.zeros((B, H), jnp.float32)
    for t in range(T):                                   # serial recurrence, batched over B
        g = xp[t * B:(t + 1) * B, :] + jnp.dot(h_t, w_hh,
                                               preferred_element_type=jnp.float32)
        sg = jax.nn.sigmoid(g[:, 0:3 * H])               # i, f, o grouped
        gg = jnp.tanh(g[:, 3 * H:4 * H])                 # g gate
        c_t = sg[:, H:2 * H] * c_t + sg[:, 0:H] * gg
        h_t = sg[:, 2 * H:3 * H] * jnp.tanh(c_t)
        acoustic_ref[t * B:(t + 1) * B, :] = h_t         # time-major rows t*B + b
    acoustic_tb = acoustic_ref[...]                      # (T*B, H)

    # ------------------------- prediction network -----------------------------
    # TODO(synk): TransformerPredictionNetwork source not provided; assumed
    # token + positional embedding followed by a causal 2-layer TransformerEncoder.
    lyr = p["layers"]                                    # layers 0,1 = prediction, 2,3 = context
    x = jnp.dot(oh_tr_ref[...], p["pred_emb"][...],
                preferred_element_type=jnp.float32) + p["pred_pos_tiled"][...]   # (B*S_PAD, E)
    pred_bias = pred_bias_ref[...]                       # block-diag + causal
    for l in (0, 1):
        x = _encoder_layer(x, lyr, l, PRED_HEADS, pred_bias)
    pred_hidden = x

    # ------------------------- context encoder --------------------------------
    y = jnp.dot(oh_ctx_ref[...], p["ctx_emb"][...],
                preferred_element_type=jnp.float32)                              # (B*S_CTX, E)
    ctx_bias = ctx_bias_ref[...]                         # block-diag + key padding
    for l in (2, 3):
        y = _encoder_layer(y, lyr, l, CTX_HEADS, ctx_bias)
    # ContextEncoder.output_layer is folded (host-side) into the cross-attn K/V weights.

    # --------- predictor/context cross-attention (no key-pad mask, as in reference) ----
    xa = p["xattn"]
    q = jnp.dot(pred_hidden, xa["q_w"][...],
                preferred_element_type=jnp.float32) + xa["q_b"][...]
    kv = jnp.dot(y, xa["kv_w"][...],
                 preferred_element_type=jnp.float32) + xa["kv_b"][...]           # folded proj
    pred_biased = _attend(q, kv[:, 0:E], kv[:, E:2 * E],
                          xa["out_w"][...], xa["out_b"][...],
                          CTX_ATTN_HEADS, xattn_bias_ref[...])                   # (B*S_PAD, E)

    # ------------------------- joint network + fused output -------------------
    # TODO(synk): JointNetwork source not provided; structure (broadcast concat
    # -> linear -> tanh -> linear) inferred from Transducer.inference.  The
    # second joint linear and the model output layer are folded into one matrix
    # (zero-padded to 128 lanes) host-side.
    wa = p["joint"]["wa"][...]
    wp = p["joint"]["wp"][...]
    jb1 = p["joint"]["b1"][...]
    a_proj = jnp.dot(acoustic_tb, wa, preferred_element_type=jnp.float32)        # (T*B, J)
    p_proj = jnp.dot(pred_biased, wp, preferred_element_type=jnp.float32) + jb1  # (B*S_PAD, J)

    blocks = []
    for b in range(B):                                   # B=2, static
        pb = p_proj[b * S_PAD:(b + 1) * S_PAD, :]        # (S_PAD, J), 8-row aligned
        for t in range(T):                               # T=8, static
            blocks.append(a_proj[t * B + b:t * B + b + 1, :] + pb)
    hj = jnp.tanh(jnp.concatenate(blocks, axis=0))       # (B*T*S_PAD, J) = (128, 32)

    # one GEMM + one lane-dense unmasked (128, 128) store
    out_ref[...] = jnp.dot(hj, p["out"]["w"][...],
                           preferred_element_type=jnp.float32) + p["out"]["b"][...]


# ============================ host-side wrapper ===============================
def transducer_forward(params, mel_features_BTC, input_ids_transcription_BS,
                       input_ids_context_BS):
    Bm, Tm, _ = mel_features_BTC.shape
    S_tr = input_ids_transcription_BS.shape[1]
    S_ctx = input_ids_context_BS.shape[1]
    E = PRED_DIM

    # --- tiny input prep (one small XLA fusion ahead of the fused kernel) ------
    # time-major mel so each LSTM step reads a contiguous (B, C) row block
    mel_tb = jnp.transpose(mel_features_BTC, (1, 0, 2)).reshape(Tm * Bm, C_MEL)

    # pad transcription to S_PAD (pad rows are causally masked & sliced off later)
    ids_tr = jnp.pad(input_ids_transcription_BS, ((0, 0), (0, S_PAD - S_tr)),
                     constant_values=PAD_ID)
    oh_tr = jax.nn.one_hot(ids_tr, VOCAB, dtype=jnp.float32).reshape(Bm * S_PAD, VOCAB)
    oh_ctx = jax.nn.one_hot(input_ids_context_BS, VOCAB,
                            dtype=jnp.float32).reshape(Bm * S_ctx, VOCAB)

    # block-diagonal attention biases for the batched (B*S, E) slabs
    pi = jnp.arange(Bm * S_PAD)
    pb_id, pp = pi // S_PAD, pi % S_PAD
    pred_bias = jnp.where((pb_id[:, None] == pb_id[None, :]) &
                          (pp[None, :] <= pp[:, None]), 0.0, NEG_INF).astype(jnp.float32)
    ci = jnp.arange(Bm * S_ctx)
    cb_id = ci // S_ctx
    ctx_pad = input_ids_context_BS.reshape(-1) == PAD_ID
    ctx_bias = jnp.where((cb_id[:, None] == cb_id[None, :]) &
                         (~ctx_pad)[None, :], 0.0, NEG_INF).astype(jnp.float32)
    xattn_bias = jnp.where(pb_id[:, None] == cb_id[None, :],
                           0.0, NEG_INF).astype(jnp.float32)

    # --- host-side parameter folding (back-to-back linears, lane padding) ------
    in_w, in_b = params["xattn"]["in_w"], params["xattn"]["in_b"]
    kv_w = jnp.dot(params["ctx_out_w"], in_w[:, E:3 * E])                  # (E, 2E)
    kv_b = jnp.dot(params["ctx_out_b"], in_w[:, E:3 * E]) + in_b[:, E:3 * E]
    w_fused = jnp.dot(params["joint"]["w2"], params["out"]["w"])           # (J, V)
    b_fused = jnp.dot(params["joint"]["b2"], params["out"]["w"]) + params["out"]["b"]
    w_pad = jnp.zeros((JOINT_DIM, OUT_PAD), jnp.float32).at[:, :VOCAB].set(w_fused)
    b_pad = jnp.zeros((1, OUT_PAD), jnp.float32).at[:, :VOCAB].set(b_fused)

    kparams = dict(
        lstm=params["lstm"],
        pred_emb=params["pred_emb"],
        pred_pos_tiled=jnp.tile(params["pred_pos"][:S_PAD, :], (Bm, 1)),
        ctx_emb=params["ctx_emb"],
        layers=params["layers"],
        xattn=dict(q_w=in_w[:, 0:E], q_b=in_b[:, 0:E],
                   kv_w=kv_w, kv_b=kv_b,
                   out_w=params["xattn"]["out_w"], out_b=params["xattn"]["out_b"]),
        joint=dict(wa=params["joint"]["wa"], wp=params["joint"]["wp"],
                   b1=params["joint"]["b1"]),
        out=dict(w=w_pad, b=b_pad))

    leaves, treedef = jax.tree_util.tree_flatten(kparams)
    data = [mel_tb, oh_tr, oh_ctx, pred_bias, ctx_bias, xattn_bias]
    vmem = pl.BlockSpec(memory_space=pltpu.MemorySpace.VMEM)
    kernel = functools.partial(_transducer_kernel, treedef=treedef,
                               n_data=len(data), n_param=len(leaves))

    # Single grid-less pallas_call: whole model resident in VMEM, no pipelining.
    # (On v7x one could add grid=(B,) with parallel semantics; on v5e/v6e the
    #  grid-less fully-batched form minimizes per-step overhead.)
    out_flat = pl.pallas_call(
        kernel,
        out_shape=jax.ShapeDtypeStruct((Bm * Tm * S_PAD, OUT_PAD), jnp.float32),
        in_specs=[vmem] * (len(data) + len(leaves)),
        out_specs=vmem,
        scratch_shapes=[pltpu.VMEM((Tm * Bm, LSTM_HIDDEN), jnp.float32)],
    )(*data, *leaves)

    return out_flat.reshape(Bm, Tm, S_PAD, OUT_PAD)[:, :, :S_tr, :VOCAB]


# ============================ parameter init ==================================
def _xavier(key, fan_in, fan_out, gain=1.0):
    limit = gain * math.sqrt(6.0 / (fan_in + fan_out))
    return jax.random.uniform(key, (fan_in, fan_out), jnp.float32, -limit, limit)


def _init_linear(key, fan_in, fan_out, gain=1.0):
    return _xavier(key, fan_in, fan_out, gain), jnp.zeros((1, fan_out), jnp.float32)


def _init_mha(key, E):
    k1, k2 = jax.random.split(key)
    in_w, in_b = _init_linear(k1, E, 3 * E)
    out_w, out_b = _init_linear(k2, E, E)
    return dict(in_w=in_w, in_b=in_b, out_w=out_w, out_b=out_b)


def _init_transformer_layer(key, E, FF):
    k1, k2, k3 = jax.random.split(key, 3)
    mha = _init_mha(k1, E)
    w1, b1 = _init_linear(k2, E, FF)
    w2, b2 = _init_linear(k3, FF, E)
    return dict(in_w=mha["in_w"], in_b=mha["in_b"], out_w=mha["out_w"], out_b=mha["out_b"],
                w1=w1, b1=b1, w2=w2, b2=b2,
                ln1_g=jnp.ones((1, E), jnp.float32), ln1_b=jnp.zeros((1, E), jnp.float32),
                ln2_g=jnp.ones((1, E), jnp.float32), ln2_b=jnp.zeros((1, E), jnp.float32))


def init_params(key):
    ks = jax.random.split(key, 16)
    # stacked transformer layers: 0,1 = prediction network, 2,3 = context encoder
    layer_list = [_init_transformer_layer(ks[0], PRED_DIM, PRED_FF),
                  _init_transformer_layer(ks[1], PRED_DIM, PRED_FF),
                  _init_transformer_layer(ks[2], EMBED_DIM, CTX_FF),
                  _init_transformer_layer(ks[3], EMBED_DIM, CTX_FF)]
    layers = {k: jnp.stack([ld[k] for ld in layer_list], axis=0) for k in layer_list[0]}

    ctx_emb = jax.random.normal(ks[4], (VOCAB, EMBED_DIM), jnp.float32) / math.sqrt(EMBED_DIM)
    ctx_emb = ctx_emb.at[PAD_ID].set(0.0)          # padding_idx row zeroed
    ctx_out_w, ctx_out_b = _init_linear(ks[5], EMBED_DIM, PRED_DIM)

    pred_emb = jax.random.normal(ks[6], (VOCAB, PRED_DIM), jnp.float32) / math.sqrt(PRED_DIM)
    pred_pos = 0.02 * jax.random.normal(ks[7], (MAX_SEQ_LEN, PRED_DIM), jnp.float32)

    lstm = dict(
        w_ih=0.1 * jax.random.normal(ks[8], (C_MEL, 4 * LSTM_HIDDEN), jnp.float32),
        w_hh=0.1 * jax.random.normal(ks[9], (LSTM_HIDDEN, 4 * LSTM_HIDDEN), jnp.float32),
        b=jnp.zeros((1, 4 * LSTM_HIDDEN), jnp.float32))

    joint = dict(
        wa=_xavier(ks[10], LSTM_HIDDEN, JOINT_DIM),
        wp=_xavier(ks[11], PRED_DIM, JOINT_DIM),
        b1=jnp.zeros((1, JOINT_DIM), jnp.float32),
        w2=_xavier(ks[12], JOINT_DIM, JOINT_DIM),
        b2=jnp.zeros((1, JOINT_DIM), jnp.float32))

    xattn = _init_mha(ks[13], PRED_DIM)
    out_w, out_b = _init_linear(ks[14], JOINT_DIM, VOCAB, gain=0.1)

    return dict(lstm=lstm, layers=layers,
                pred_emb=pred_emb, pred_pos=pred_pos,
                ctx_emb=ctx_emb, ctx_out_w=ctx_out_w, ctx_out_b=ctx_out_b,
                xattn=xattn, joint=joint, out=dict(w=out_w, b=out_b))


# =================================== main =====================================
if __name__ == "__main__":
    key = jax.random.PRNGKey(0)
    kp, k1, k2, k3 = jax.random.split(key, 4)
    params = init_params(kp)

    mel_features_BTC = jax.random.normal(k1, (B, T, C_MEL), jnp.float32)
    input_ids_transcription_BS = jax.random.randint(k2, (B, S_TR), 2, VOCAB)
    input_ids_context_BS = jax.random.randint(k3, (B, S_CTX), 2, VOCAB)
    input_ids_context_BS = input_ids_context_BS.at[:, -1].set(PAD_ID)   # exercise pad mask

    fwd = jax.jit(transducer_forward)
    logits_BTSV = fwd(params, mel_features_BTC, input_ids_transcription_BS,
                      input_ids_context_BS)
    logits_BTSV = jax.block_until_ready(logits_BTSV)

    assert logits_BTSV.shape == (B, T, S_TR, VOCAB), logits_BTSV.shape
    assert bool(jnp.all(jnp.isfinite(logits_BTSV)))
    print("KERNEL_OK")
</pallas_src>

<mosaic_0001>
module attributes {stable_mosaic.version = 11 : i64} {
  func.func @_transducer_kernel(%arg0: memref<16x16xf32, #tpu.memory_space<vmem>>, %arg1: memref<16x32xf32, #tpu.memory_space<vmem>>, %arg2: memref<10x32xf32, #tpu.memory_space<vmem>>, %arg3: memref<16x16xf32, #tpu.memory_space<vmem>>, %arg4: memref<10x10xf32, #tpu.memory_space<vmem>>, %arg5: memref<16x10xf32, #tpu.memory_space<vmem>>, %arg6: memref<32x16xf32, #tpu.memory_space<vmem>>, %arg7: memref<1x32xf32, #tpu.memory_space<vmem>>, %arg8: memref<32x32xf32, #tpu.memory_space<vmem>>, %arg9: memref<16x32xf32, #tpu.memory_space<vmem>>, %arg10: memref<4x1x64xf32, #tpu.memory_space<vmem>>, %arg11: memref<4x1x16xf32, #tpu.memory_space<vmem>>, %arg12: memref<4x1x48xf32, #tpu.memory_space<vmem>>, %arg13: memref<4x16x48xf32, #tpu.memory_space<vmem>>, %arg14: memref<4x1x16xf32, #tpu.memory_space<vmem>>, %arg15: memref<4x1x16xf32, #tpu.memory_space<vmem>>, %arg16: memref<4x1x16xf32, #tpu.memory_space<vmem>>, %arg17: memref<4x1x16xf32, #tpu.memory_space<vmem>>, %arg18: memref<4x1x16xf32, #tpu.memory_space<vmem>>, %arg19: memref<4x16x16xf32, #tpu.memory_space<vmem>>, %arg20: memref<4x16x64xf32, #tpu.memory_space<vmem>>, %arg21: memref<4x64x16xf32, #tpu.memory_space<vmem>>, %arg22: memref<1x128xf32, #tpu.memory_space<vmem>>, %arg23: memref<32x128xf32, #tpu.memory_space<vmem>>, %arg24: memref<16x128xf32, #tpu.memory_space<vmem>>, %arg25: memref<1x128xf32, #tpu.memory_space<vmem>>, %arg26: memref<32x128xf32, #tpu.memory_space<vmem>>, %arg27: memref<32x16xf32, #tpu.memory_space<vmem>>, %arg28: memref<16x16xf32, #tpu.memory_space<vmem>>, %arg29: memref<1x32xf32, #tpu.memory_space<vmem>>, %arg30: memref<16x32xf32, #tpu.memory_space<vmem>>, %arg31: memref<1x16xf32, #tpu.memory_space<vmem>>, %arg32: memref<16x16xf32, #tpu.memory_space<vmem>>, %arg33: memref<1x16xf32, #tpu.memory_space<vmem>>, %arg34: memref<16x16xf32, #tpu.memory_space<vmem>>, %arg35: memref<128x128xf32, #tpu.memory_space<vmem>>, %arg36: memref<16x32xf32, #tpu.memory_space<vmem>>) attributes {dimension_semantics = [], scalar_prefetch = 0 : i64, scratch_operands = 1 : i64, tpu.core_type = #tpu.core_type<tc>} {
    %c0 = arith.constant 0 : index
    %c0_0 = arith.constant 0 : index
    %0 = vector.load %arg24[%c0, %c0_0] : memref<16x128xf32, #tpu.memory_space<vmem>>, vector<16x128xf32>
    %c0_1 = arith.constant 0 : index
    %c0_2 = arith.constant 0 : index
    %1 = vector.load %arg23[%c0_1, %c0_2] : memref<32x128xf32, #tpu.memory_space<vmem>>, vector<32x128xf32>
    %c0_3 = arith.constant 0 : index
    %c0_4 = arith.constant 0 : index
    %2 = vector.load %arg22[%c0_3, %c0_4] : memref<1x128xf32, #tpu.memory_space<vmem>>, vector<1x128xf32>
    %c0_5 = arith.constant 0 : index
    %c0_6 = arith.constant 0 : index
    %3 = vector.load %arg0[%c0_5, %c0_6] : memref<16x16xf32, #tpu.memory_space<vmem>>, vector<16x16xf32>
    %cst = arith.constant dense<0.000000e+00> : vector<16x128xf32>
    %4 = tpu.matmul %3, %0, %cst {dimension_numbers = #tpu.dot_dimension_numbers<[1], [0], [0], [1], [0, 0, 1, 1], [], []>} : vector<16x16xf32>, vector<16x128xf32>, vector<16x128xf32> -> vector<16x128xf32>
    %5 = vector.broadcast %2 : vector<1x128xf32> to vector<16x128xf32>
    %6 = arith.addf %4, %5 : vector<16x128xf32>
    %cst_7 = arith.constant 0.000000e+00 : f32
    %7 = vector.broadcast %cst_7 : f32 to vector<2x32xf32>
    %cst_8 = arith.constant 0.000000e+00 : f32
    %8 = vector.broadcast %cst_8 : f32 to vector<2x32xf32>
    %9 = vector.extract_strided_slice %6 {offsets = [0, 0], sizes = [2, 128], strides = [1, 1]} : vector<16x128xf32> to vector<2x128xf32>
    %cst_9 = arith.constant dense<0.000000e+00> : vector<2x128xf32>
    %10 = tpu.matmul %7, %1, %cst_9 {dimension_numbers = #tpu.dot_dimension_numbers<[1], [0], [0], [1], [0, 0, 1, 1], [], []>} : vector<2x32xf32>, vector<32x128xf32>, vector<2x128xf32> -> vector<2x128xf32>
    %11 = arith.addf %9, %10 : vector<2x128xf32>
    %12 = vector.extract_strided_slice %11 {offsets = [0, 0], sizes = [2, 96], strides = [1, 1]} : vector<2x128xf32> to vector<2x96xf32>
    %13 = arith.negf %12 : vector<2x96xf32>
    %14 = math.exp %13 : vector<2x96xf32>
    %cst_10 = arith.constant 1.000000e+00 : f32
    %15 = vector.broadcast %cst_10 : f32 to vector<2x96xf32>
    %16 = arith.addf %15, %14 : vector<2x96xf32>
    %17 = arith.divf %15, %16 : vector<2x96xf32>
    %18 = vector.extract_strided_slice %11 {offsets = [0, 96], sizes = [2, 32], strides = [1, 1]} : vector<2x128xf32> to vector<2x32xf32>
    %19 = math.tanh %18 : vector<2x32xf32>
    %20 = vector.extract_strided_slice %17 {offsets = [0, 32], sizes = [2, 32], strides = [1, 1]} : vector<2x96xf32> to vector<2x32xf32>
    %21 = arith.mulf %20, %8 : vector<2x32xf32>
    %22 = vector.extract_strided_slice %17 {offsets = [0, 0], sizes = [2, 32], strides = [1, 1]} : vector<2x96xf32> to vector<2x32xf32>
    %23 = arith.mulf %22, %19 : vector<2x32xf32>
    %24 = arith.addf %21, %23 : vector<2x32xf32>
    %25 = vector.extract_strided_slice %17 {offsets = [0, 64], sizes = [2, 32], strides = [1, 1]} : vector<2x96xf32> to vector<2x32xf32>
    %26 = math.tanh %24 : vector<2x32xf32>
    %27 = arith.mulf %25, %26 : vector<2x32xf32>
    %c0_11 = arith.constant 0 : index
    %c0_12 = arith.constant 0 : index
    %28 = vector.load %arg36[%c0_11, %c0_12] : memref<16x32xf32, #tpu.memory_space<vmem>>, vector<2x32xf32>
    tpu.vector_store %arg36[%c0_11, %c0_12], %27 {strides = array<i32>} : memref<16x32xf32, #tpu.memory_space<vmem>>, vector<2x32xf32>,
    %29 = vector.extract_strided_slice %6 {offsets = [2, 0], sizes = [2, 128], strides = [1, 1]} : vector<16x128xf32> to vector<2x128xf32>
    %cst_13 = arith.constant dense<0.000000e+00> : vector<2x128xf32>
    %30 = tpu.matmul %27, %1, %cst_13 {dimension_numbers = #tpu.dot_dimension_numbers<[1], [0], [0], [1], [0, 0, 1, 1], [], []>} : vector<2x32xf32>, vector<32x128xf32>, vector<2x128xf32> -> vector<2x128xf32>
    %31 = arith.addf %29, %30 : vector<2x128xf32>
    %32 = vector.extract_strided_slice %31 {offsets = [0, 0], sizes = [2, 96], strides = [1, 1]} : vector<2x128xf32> to vector<2x96xf32>
    %33 = arith.negf %32 : vector<2x96xf32>
    %34 = math.exp %33 : vector<2x96xf32>
    %cst_14 = arith.constant 1.000000e+00 : f32
    %35 = vector.broadcast %cst_14 : f32 to vector<2x96xf32>
    %36 = arith.addf %35, %34 : vector<2x96xf32>
    %37 = arith.divf %35, %36 : vector<2x96xf32>
    %38 = vector.extract_strided_slice %31 {offsets = [0, 96], sizes = [2, 32], strides = [1, 1]} : vector<2x128xf32> to vector<2x32xf32>
    %39 = math.tanh %38 : vector<2x32xf32>
    %40 = vector.extract_strided_slice %37 {offsets = [0, 32], sizes = [2, 32], strides = [1, 1]} : vector<2x96xf32> to vector<2x32xf32>
    %41 = arith.mulf %40, %24 : vector<2x32xf32>
    %42 = vector.extract_strided_slice %37 {offsets = [0, 0], sizes = [2, 32], strides = [1, 1]} : vector<2x96xf32> to vector<2x32xf32>
    %43 = arith.mulf %42, %39 : vector<2x32xf32>
    %44 = arith.addf %41, %43 : vector<2x32xf32>
    %45 = vector.extract_strided_slice %37 {offsets = [0, 64], sizes = [2, 32], strides = [1, 1]} : vector<2x96xf32> to vector<2x32xf32>
    %46 = math.tanh %44 : vector<2x32xf32>
    %47 = arith.mulf %45, %46 : vector<2x32xf32>
    %c2 = arith.constant 2 : index
    %c0_15 = arith.constant 0 : index
    %48 = vector.load %arg36[%c2, %c0_15] : memref<16x32xf32, #tpu.memory_space<vmem>>, vector<2x32xf32>
    tpu.vector_store %arg36[%c2, %c0_15], %47 {strides = array<i32>} : memref<16x32xf32, #tpu.memory_space<vmem>>, vector<2x32xf32>,
    %49 = vector.extract_strided_slice %6 {offsets = [4, 0], sizes = [2, 128], strides = [1, 1]} : vector<16x128xf32> to vector<2x128xf32>
    %cst_16 = arith.constant dense<0.000000e+00> : vector<2x128xf32>
    %50 = tpu.matmul %47, %1, %cst_16 {dimension_numbers = #tpu.dot_dimension_numbers<[1], [0], [0], [1], [0, 0, 1, 1], [], []>} : vector<2x32xf32>, vector<32x128xf32>, vector<2x128xf32> -> vector<2x128xf32>
    %51 = arith.addf %49, %50 : vector<2x128xf32>
    %52 = vector.extract_strided_slice %51 {offsets = [0, 0], sizes = [2, 96], strides = [1, 1]} : vector<2x128xf32> to vector<2x96xf32>
    %53 = arith.negf %52 : vector<2x96xf32>
    %54 = math.exp %53 : vector<2x96xf32>
    %cst_17 = arith.constant 1.000000e+00 : f32
    %55 = vector.broadcast %cst_17 : f32 to vector<2x96xf32>
    %56 = arith.addf %55, %54 : vector<2x96xf32>
    %57 = arith.divf %55, %56 : vector<2x96xf32>
    %58 = vector.extract_strided_slice %51 {offsets = [0, 96], sizes = [2, 32], strides = [1, 1]} : vector<2x128xf32> to vector<2x32xf32>
    %59 = math.tanh %58 : vector<2x32xf32>
    %60 = vector.extract_strided_slice %57 {offsets = [0, 32], sizes = [2, 32], strides = [1, 1]} : vector<2x96xf32> to vector<2x32xf32>
    %61 = arith.mulf %60, %44 : vector<2x32xf32>
    %62 = vector.extract_strided_slice %57 {offsets = [0, 0], sizes = [2, 32], strides = [1, 1]} : vector<2x96xf32> to vector<2x32xf32>
    %63 = arith.mulf %62, %59 : vector<2x32xf32>
    %64 = arith.addf %61, %63 : vector<2x32xf32>
    %65 = vector.extract_strided_slice %57 {offsets = [0, 64], sizes = [2, 32], strides = [1, 1]} : vector<2x96xf32> to vector<2x32xf32>
    %66 = math.tanh %64 : vector<2x32xf32>
    %67 = arith.mulf %65, %66 : vector<2x32xf32>
    %c4 = arith.constant 4 : index
    %c0_18 = arith.constant 0 : index
    %68 = vector.load %arg36[%c4, %c0_18] : memref<16x32xf32, #tpu.memory_space<vmem>>, vector<2x32xf32>
    tpu.vector_store %arg36[%c4, %c0_18], %67 {strides = array<i32>} : memref<16x32xf32, #tpu.memory_space<vmem>>, vector<2x32xf32>,
    %69 = vector.extract_strided_slice %6 {offsets = [6, 0], sizes = [2, 128], strides = [1, 1]} : vector<16x128xf32> to vector<2x128xf32>
    %cst_19 = arith.constant dense<0.000000e+00> : vector<2x128xf32>
    %70 = tpu.matmul %67, %1, %cst_19 {dimension_numbers = #tpu.dot_dimension_numbers<[1], [0], [0], [1], [0, 0, 1, 1], [], []>} : vector<2x32xf32>, vector<32x128xf32>, vector<2x128xf32> -> vector<2x128xf32>
    %71 = arith.addf %69, %70 : vector<2x128xf32>
    %72 = vector.extract_strided_slice %71 {offsets = [0, 0], sizes = [2, 96], strides = [1, 1]} : vector<2x128xf32> to vector<2x96xf32>
    %73 = arith.negf %72 : vector<2x96xf32>
    %74 = math.exp %73 : vector<2x96xf32>
    %cst_20 = arith.constant 1.000000e+00 : f32
    %75 = vector.broadcast %cst_20 : f32 to vector<2x96xf32>
    %76 = arith.addf %75, %74 : vector<2x96xf32>
    %77 = arith.divf %75, %76 : vector<2x96xf32>
    %78 = vector.extract_strided_slice %71 {offsets = [0, 96], sizes = [2, 32], strides = [1, 1]} : vector<2x128xf32> to vector<2x32xf32>
    %79 = math.tanh %78 : vector<2x32xf32>
    %80 = vector.extract_strided_slice %77 {offsets = [0, 32], sizes = [2, 32], strides = [1, 1]} : vector<2x96xf32> to vector<2x32xf32>
    %81 = arith.mulf %80, %64 : vector<2x32xf32>
    %82 = vector.extract_strided_slice %77 {offsets = [0, 0], sizes = [2, 32], strides = [1, 1]} : vector<2x96xf32> to vector<2x32xf32>
    %83 = arith.mulf %82, %79 : vector<2x32xf32>
    %84 = arith.addf %81, %83 : vector<2x32xf32>
    %85 = vector.extract_strided_slice %77 {offsets = [0, 64], sizes = [2, 32], strides = [1, 1]} : vector<2x96xf32> to vector<2x32xf32>
    %86 = math.tanh %84 : vector<2x32xf32>
    %87 = arith.mulf %85, %86 : vector<2x32xf32>
    %c6 = arith.constant 6 : index
    %c0_21 = arith.constant 0 : index
    %88 = vector.load %arg36[%c6, %c0_21] : memref<16x32xf32, #tpu.memory_space<vmem>>, vector<2x32xf32>
    tpu.vector_store %arg36[%c6, %c0_21], %87 {strides = array<i32>} : memref<16x32xf32, #tpu.memory_space<vmem>>, vector<2x32xf32>,
    %89 = vector.extract_strided_slice %6 {offsets = [8, 0], sizes = [2, 128], strides = [1, 1]} : vector<16x128xf32> to vector<2x128xf32>
    %cst_22 = arith.constant dense<0.000000e+00> : vector<2x128xf32>
    %90 = tpu.matmul %87, %1, %cst_22 {dimension_numbers = #tpu.dot_dimension_numbers<[1], [0], [0], [1], [0, 0, 1, 1], [], []>} : vector<2x32xf32>, vector<32x128xf32>, vector<2x128xf32> -> vector<2x128xf32>
    %91 = arith.addf %89, %90 : vector<2x128xf32>
    %92 = vector.extract_strided_slice %91 {offsets = [0, 0], sizes = [2, 96], strides = [1, 1]} : vector<2x128xf32> to vector<2x96xf32>
    %93 = arith.negf %92 : vector<2x96xf32>
    %94 = math.exp %93 : vector<2x96xf32>
    %cst_23 = arith.constant 1.000000e+00 : f32
    %95 = vector.broadcast %cst_23 : f32 to vector<2x96xf32>
    %96 = arith.addf %95, %94 : vector<2x96xf32>
    %97 = arith.divf %95, %96 : vector<2x96xf32>
    %98 = vector.extract_strided_slice %91 {offsets = [0, 96], sizes = [2, 32], strides = [1, 1]} : vector<2x128xf32> to vector<2x32xf32>
    %99 = math.tanh %98 : vector<2x32xf32>
    %100 = vector.extract_strided_slice %97 {offsets = [0, 32], sizes = [2, 32], strides = [1, 1]} : vector<2x96xf32> to vector<2x32xf32>
    %101 = arith.mulf %100, %84 : vector<2x32xf32>
    %102 = vector.extract_strided_slice %97 {offsets = [0, 0], sizes = [2, 32], strides = [1, 1]} : vector<2x96xf32> to vector<2x32xf32>
    %103 = arith.mulf %102, %99 : vector<2x32xf32>
    %104 = arith.addf %101, %103 : vector<2x32xf32>
    %105 = vector.extract_strided_slice %97 {offsets = [0, 64], sizes = [2, 32], strides = [1, 1]} : vector<2x96xf32> to vector<2x32xf32>
    %106 = math.tanh %104 : vector<2x32xf32>
    %107 = arith.mulf %105, %106 : vector<2x32xf32>
    %c8 = arith.constant 8 : index
    %c0_24 = arith.constant 0 : index
    %108 = vector.load %arg36[%c8, %c0_24] : memref<16x32xf32, #tpu.memory_space<vmem>>, vector<2x32xf32>
    tpu.vector_store %arg36[%c8, %c0_24], %107 {strides = array<i32>} : memref<16x32xf32, #tpu.memory_space<vmem>>, vector<2x32xf32>,
    %109 = vector.extract_strided_slice %6 {offsets = [10, 0], sizes = [2, 128], strides = [1, 1]} : vector<16x128xf32> to vector<2x128xf32>
    %cst_25 = arith.constant dense<0.000000e+00> : vector<2x128xf32>
    %110 = tpu.matmul %107, %1, %cst_25 {dimension_numbers = #tpu.dot_dimension_numbers<[1], [0], [0], [1], [0, 0, 1, 1], [], []>} : vector<2x32xf32>, vector<32x128xf32>, vector<2x128xf32> -> vector<2x128xf32>
    %111 = arith.addf %109, %110 : vector<2x128xf32>
    %112 = vector.extract_strided_slice %111 {offsets = [0, 0], sizes = [2, 96], strides = [1, 1]} : vector<2x128xf32> to vector<2x96xf32>
    %113 = arith.negf %112 : vector<2x96xf32>
    %114 = math.exp %113 : vector<2x96xf32>
    %cst_26 = arith.constant 1.000000e+00 : f32
    %115 = vector.broadcast %cst_26 : f32 to vector<2x96xf32>
    %116 = arith.addf %115, %114 : vector<2x96xf32>
    %117 = arith.divf %115, %116 : vector<2x96xf32>
    %118 = vector.extract_strided_slice %111 {offsets = [0, 96], sizes = [2, 32], strides = [1, 1]} : vector<2x128xf32> to vector<2x32xf32>
    %119 = math.tanh %118 : vector<2x32xf32>
    %120 = vector.extract_strided_slice %117 {offsets = [0, 32], sizes = [2, 32], strides = [1, 1]} : vector<2x96xf32> to vector<2x32xf32>
    %121 = arith.mulf %120, %104 : vector<2x32xf32>
    %122 = vector.extract_strided_slice %117 {offsets = [0, 0], sizes = [2, 32], strides = [1, 1]} : vector<2x96xf32> to vector<2x32xf32>
    %123 = arith.mulf %122, %119 : vector<2x32xf32>
    %124 = arith.addf %121, %123 : vector<2x32xf32>
    %125 = vector.extract_strided_slice %117 {offsets = [0, 64], sizes = [2, 32], strides = [1, 1]} : vector<2x96xf32> to vector<2x32xf32>
    %126 = math.tanh %124 : vector<2x32xf32>
    %127 = arith.mulf %125, %126 : vector<2x32xf32>
    %c10 = arith.constant 10 : index
    %c0_27 = arith.constant 0 : index
    %128 = vector.load %arg36[%c10, %c0_27] : memref<16x32xf32, #tpu.memory_space<vmem>>, vector<2x32xf32>
    tpu.vector_store %arg36[%c10, %c0_27], %127 {strides = array<i32>} : memref<16x32xf32, #tpu.memory_space<vmem>>, vector<2x32xf32>,
    %129 = vector.extract_strided_slice %6 {offsets = [12, 0], sizes = [2, 128], strides = [1, 1]} : vector<16x128xf32> to vector<2x128xf32>
    %cst_28 = arith.constant dense<0.000000e+00> : vector<2x128xf32>
    %130 = tpu.matmul %127, %1, %cst_28 {dimension_numbers = #tpu.dot_dimension_numbers<[1], [0], [0], [1], [0, 0, 1, 1], [], []>} : vector<2x32xf32>, vector<32x128xf32>, vector<2x128xf32> -> vector<2x128xf32>
    %131 = arith.addf %129, %130 : vector<2x128xf32>
    %132 = vector.extract_strided_slice %131 {offsets = [0, 0], sizes = [2, 96], strides = [1, 1]} : vector<2x128xf32> to vector<2x96xf32>
    %133 = arith.negf %132 : vector<2x96xf32>
    %134 = math.exp %133 : vector<2x96xf32>
    %cst_29 = arith.constant 1.000000e+00 : f32
    %135 = vector.broadcast %cst_29 : f32 to vector<2x96xf32>
    %136 = arith.addf %135, %134 : vector<2x96xf32>
    %137 = arith.divf %135, %136 : vector<2x96xf32>
    %138 = vector.extract_strided_slice %131 {offsets = [0, 96], sizes = [2, 32], strides = [1, 1]} : vector<2x128xf32> to vector<2x32xf32>
    %139 = math.tanh %138 : vector<2x32xf32>
    %140 = vector.extract_strided_slice %137 {offsets = [0, 32], sizes = [2, 32], strides = [1, 1]} : vector<2x96xf32> to vector<2x32xf32>
    %141 = arith.mulf %140, %124 : vector<2x32xf32>
    %142 = vector.extract_strided_slice %137 {offsets = [0, 0], sizes = [2, 32], strides = [1, 1]} : vector<2x96xf32> to vector<2x32xf32>
    %143 = arith.mulf %142, %139 : vector<2x32xf32>
    %144 = arith.addf %141, %143 : vector<2x32xf32>
    %145 = vector.extract_strided_slice %137 {offsets = [0, 64], sizes = [2, 32], strides = [1, 1]} : vector<2x96xf32> to vector<2x32xf32>
    %146 = math.tanh %144 : vector<2x32xf32>
    %147 = arith.mulf %145, %146 : vector<2x32xf32>
    %c12 = arith.constant 12 : index
    %c0_30 = arith.constant 0 : index
    %148 = vector.load %arg36[%c12, %c0_30] : memref<16x32xf32, #tpu.memory_space<vmem>>, vector<2x32xf32>
    tpu.vector_store %arg36[%c12, %c0_30], %147 {strides = array<i32>} : memref<16x32xf32, #tpu.memory_space<vmem>>, vector<2x32xf32>,
    %149 = vector.extract_strided_slice %6 {offsets = [14, 0], sizes = [2, 128], strides = [1, 1]} : vector<16x128xf32> to vector<2x128xf32>
    %cst_31 = arith.constant dense<0.000000e+00> : vector<2x128xf32>
    %150 = tpu.matmul %147, %1, %cst_31 {dimension_numbers = #tpu.dot_dimension_numbers<[1], [0], [0], [1], [0, 0, 1, 1], [], []>} : vector<2x32xf32>, vector<32x128xf32>, vector<2x128xf32> -> vector<2x128xf32>
    %151 = arith.addf %149, %150 : vector<2x128xf32>
    %152 = vector.extract_strided_slice %151 {offsets = [0, 0], sizes = [2, 96], strides = [1, 1]} : vector<2x128xf32> to vector<2x96xf32>
    %153 = arith.negf %152 : vector<2x96xf32>
    %154 = math.exp %153 : vector<2x96xf32>
    %cst_32 = arith.constant 1.000000e+00 : f32
    %155 = vector.broadcast %cst_32 : f32 to vector<2x96xf32>
    %156 = arith.addf %155, %154 : vector<2x96xf32>
    %157 = arith.divf %155, %156 : vector<2x96xf32>
    %158 = vector.extract_strided_slice %151 {offsets = [0, 96], sizes = [2, 32], strides = [1, 1]} : vector<2x128xf32> to vector<2x32xf32>
    %159 = math.tanh %158 : vector<2x32xf32>
    %160 = vector.extract_strided_slice %157 {offsets = [0, 32], sizes = [2, 32], strides = [1, 1]} : vector<2x96xf32> to vector<2x32xf32>
    %161 = arith.mulf %160, %144 : vector<2x32xf32>
    %162 = vector.extract_strided_slice %157 {offsets = [0, 0], sizes = [2, 32], strides = [1, 1]} : vector<2x96xf32> to vector<2x32xf32>
    %163 = arith.mulf %162, %159 : vector<2x32xf32>
    %164 = arith.addf %161, %163 : vector<2x32xf32>
    %165 = vector.extract_strided_slice %157 {offsets = [0, 64], sizes = [2, 32], strides = [1, 1]} : vector<2x96xf32> to vector<2x32xf32>
    %166 = math.tanh %164 : vector<2x32xf32>
    %167 = arith.mulf %165, %166 : vector<2x32xf32>
    %c14 = arith.constant 14 : index
    %c0_33 = arith.constant 0 : index
    %168 = vector.load %arg36[%c14, %c0_33] : memref<16x32xf32, #tpu.memory_space<vmem>>, vector<2x32xf32>
    tpu.vector_store %arg36[%c14, %c0_33], %167 {strides = array<i32>} : memref<16x32xf32, #tpu.memory_space<vmem>>, vector<2x32xf32>,
    %c0_34 = arith.constant 0 : index
    %c0_35 = arith.constant 0 : index
    %169 = vector.load %arg36[%c0_34, %c0_35] : memref<16x32xf32, #tpu.memory_space<vmem>>, vector<16x32xf32>
    %c0_36 = arith.constant 0 : index
    %c0_37 = arith.constant 0 : index
    %170 = vector.load %arg1[%c0_36, %c0_37] : memref<16x32xf32, #tpu.memory_space<vmem>>, vector<16x32xf32>
    %c0_38 = arith.constant 0 : index
    %c0_39 = arith.constant 0 : index
    %171 = vector.load %arg27[%c0_38, %c0_39] : memref<32x16xf32, #tpu.memory_space<vmem>>, vector<32x16xf32>
    %cst_40 = arith.constant dense<0.000000e+00> : vector<16x16xf32>
    %172 = tpu.matmul %170, %171, %cst_40 {dimension_numbers = #tpu.dot_dimension_numbers<[1], [0], [0], [1], [0, 0, 1, 1], [], []>} : vector<16x32xf32>, vector<32x16xf32>, vector<16x16xf32> -> vector<16x16xf32>
    %c0_41 = arith.constant 0 : index
    %c0_42 = arith.constant 0 : index
    %173 = vector.load %arg28[%c0_41, %c0_42] : memref<16x16xf32, #tpu.memory_space<vmem>>, vector<16x16xf32>
    %174 = arith.addf %172, %173 : vector<16x16xf32>
    %c0_43 = arith.constant 0 : index
    %c0_44 = arith.constant 0 : index
    %175 = vector.load %arg3[%c0_43, %c0_44] : memref<16x16xf32, #tpu.memory_space<vmem>>, vector<16x16xf32>
    %c0_45 = arith.constant 0 : index
    %c0_46 = arith.constant 0 : index
    %c0_47 = arith.constant 0 : index
    %176 = vector.load %arg13[%c0_45, %c0_46, %c0_47] : memref<4x16x48xf32, #tpu.memory_space<vmem>>, vector<1x16x48xf32>
    %177 = vector.shape_cast %176 : vector<1x16x48xf32> to vector<16x48xf32>
    %cst_48 = arith.constant dense<0.000000e+00> : vector<16x48xf32>
    %178 = tpu.matmul %174, %177, %cst_48 {dimension_numbers = #tpu.dot_dimension_numbers<[1], [0], [0], [1], [0, 0, 1, 1], [], []>} : vector<16x16xf32>, vector<16x48xf32>, vector<16x48xf32> -> vector<16x48xf32>
    %c0_49 = arith.constant 0 : index
    %c0_50 = arith.constant 0 : index
    %c0_51 = arith.constant 0 : index
    %179 = vector.load %arg12[%c0_49, %c0_50, %c0_51] : memref<4x1x48xf32, #tpu.memory_space<vmem>>, vector<1x1x48xf32>
    %180 = vector.shape_cast %179 : vector<1x1x48xf32> to vector<1x48xf32>
    %181 = vector.broadcast %180 : vector<1x48xf32> to vector<16x48xf32>
    %182 = arith.addf %178, %181 : vector<16x48xf32>
    %183 = vector.extract_strided_slice %182 {offsets = [0, 0], sizes = [16, 16], strides = [1, 1]} : vector<16x48xf32> to vector<16x16xf32>
    %184 = vector.extract_strided_slice %182 {offsets = [0, 16], sizes = [16, 16], strides = [1, 1]} : vector<16x48xf32> to vector<16x16xf32>
    %185 = vector.extract_strided_slice %182 {offsets = [0, 32], sizes = [16, 16], strides = [1, 1]} : vector<16x48xf32> to vector<16x16xf32>
    %c0_52 = arith.constant 0 : index
    %c0_53 = arith.constant 0 : index
    %c0_54 = arith.constant 0 : index
    %186 = vector.load %arg19[%c0_52, %c0_53, %c0_54] : memref<4x16x16xf32, #tpu.memory_space<vmem>>, vector<1x16x16xf32>
    %187 = vector.shape_cast %186 : vector<1x16x16xf32> to vector<16x16xf32>
    %c0_55 = arith.constant 0 : index
    %c0_56 = arith.constant 0 : index
    %c0_57 = arith.constant 0 : index
    %188 = vector.load %arg18[%c0_55, %c0_56, %c0_57] : memref<4x1x16xf32, #tpu.memory_space<vmem>>, vector<1x1x16xf32>
    %189 = vector.shape_cast %188 : vector<1x1x16xf32> to vector<1x16xf32>
    %190 = vector.extract_strided_slice %183 {offsets = [0, 0], sizes = [16, 8], strides = [1, 1]} : vector<16x16xf32> to vector<16x8xf32>
    %191 = vector.extract_strided_slice %184 {offsets = [0, 0], sizes = [16, 8], strides = [1, 1]} : vector<16x16xf32> to vector<16x8xf32>
    %192 = vector.extract_strided_slice %185 {offsets = [0, 0], sizes = [16, 8], strides = [1, 1]} : vector<16x16xf32> to vector<16x8xf32>
    %cst_58 = arith.constant dense<0.000000e+00> : vector<16x16xf32>
    %193 = tpu.matmul %190, %191, %cst_58 {dimension_numbers = #tpu.dot_dimension_numbers<[1], [1], [0], [0], [0, 0, 1, 0], [], []>} : vector<16x8xf32>, vector<16x8xf32>, vector<16x16xf32> -> vector<16x16xf32>
    %cst_59 = arith.constant 0.353553385 : f32
    %194 = vector.broadcast %cst_59 : f32 to vector<16x16xf32>
    %195 = arith.mulf %193, %194 : vector<16x16xf32>
    %196 = arith.addf %195, %175 : vector<16x16xf32>
    %cst_60 = arith.constant dense<0xFF800000> : vector<16xf32>
    %197 = vector.multi_reduction <maximumf>, %196, %cst_60 [1] : vector<16x16xf32> to vector<16xf32>
    %198 = vector.shape_cast %197 : vector<16xf32> to vector<16x1xf32>
    %199 = vector.broadcast %198 : vector<16x1xf32> to vector<16x16xf32>
    %200 = arith.subf %196, %199 : vector<16x16xf32>
    %201 = math.exp %200 : vector<16x16xf32>
    %cst_61 = arith.constant dense<0.000000e+00> : vector<16xf32>
    %202 = vector.multi_reduction <add>, %201, %cst_61 [1] : vector<16x16xf32> to vector<16xf32>
    %203 = vector.shape_cast %202 : vector<16xf32> to vector<16x1xf32>
    %204 = tpu.reciprocal %203 {approx = true} : vector<16x1xf32> -> vector<16x1xf32>
    %205 = vector.broadcast %204 : vector<16x1xf32> to vector<16x16xf32>
    %206 = arith.mulf %201, %205 : vector<16x16xf32>
    %cst_62 = arith.constant dense<0.000000e+00> : vector<16x8xf32>
    %207 = tpu.matmul %206, %192, %cst_62 {dimension_numbers = #tpu.dot_dimension_numbers<[1], [0], [0], [1], [0, 0, 1, 1], [], []>} : vector<16x16xf32>, vector<16x8xf32>, vector<16x8xf32> -> vector<16x8xf32>
    %208 = vector.extract_strided_slice %187 {offsets = [0, 0], sizes = [8, 16], strides = [1, 1]} : vector<16x16xf32> to vector<8x16xf32>
    %cst_63 = arith.constant dense<0.000000e+00> : vector<16x16xf32>
    %209 = tpu.matmul %207, %208, %cst_63 {dimension_numbers = #tpu.dot_dimension_numbers<[1], [0], [0], [1], [0, 0, 1, 1], [], []>} : vector<16x8xf32>, vector<8x16xf32>, vector<16x16xf32> -> vector<16x16xf32>
    %210 = vector.extract_strided_slice %183 {offsets = [0, 8], sizes = [16, 8], strides = [1, 1]} : vector<16x16xf32> to vector<16x8xf32>
    %211 = vector.extract_strided_slice %184 {offsets = [0, 8], sizes = [16, 8], strides = [1, 1]} : vector<16x16xf32> to vector<16x8xf32>
    %212 = vector.extract_strided_slice %185 {offsets = [0, 8], sizes = [16, 8], strides = [1, 1]} : vector<16x16xf32> to vector<16x8xf32>
    %cst_64 = arith.constant dense<0.000000e+00> : vector<16x16xf32>
    %213 = tpu.matmul %210, %211, %cst_64 {dimension_numbers = #tpu.dot_dimension_numbers<[1], [1], [0], [0], [0, 0, 1, 0], [], []>} : vector<16x8xf32>, vector<16x8xf32>, vector<16x16xf32> -> vector<16x16xf32>
    %cst_65 = arith.constant 0.353553385 : f32
    %214 = vector.broadcast %cst_65 : f32 to vector<16x16xf32>
    %215 = arith.mulf %213, %214 : vector<16x16xf32>
    %216 = arith.addf %215, %175 : vector<16x16xf32>
    %cst_66 = arith.constant dense<0xFF800000> : vector<16xf32>
    %217 = vector.multi_reduction <maximumf>, %216, %cst_66 [1] : vector<16x16xf32> to vector<16xf32>
    %218 = vector.shape_cast %217 : vector<16xf32> to vector<16x1xf32>
    %219 = vector.broadcast %218 : vector<16x1xf32> to vector<16x16xf32>
    %220 = arith.subf %216, %219 : vector<16x16xf32>
    %221 = math.exp %220 : vector<16x16xf32>
    %cst_67 = arith.constant dense<0.000000e+00> : vector<16xf32>
    %222 = vector.multi_reduction <add>, %221, %cst_67 [1] : vector<16x16xf32> to vector<16xf32>
    %223 = vector.shape_cast %222 : vector<16xf32> to vector<16x1xf32>
    %224 = tpu.reciprocal %223 {approx = true} : vector<16x1xf32> -> vector<16x1xf32>
    %225 = vector.broadcast %224 : vector<16x1xf32> to vector<16x16xf32>
    %226 = arith.mulf %221, %225 : vector<16x16xf32>
    %cst_68 = arith.constant dense<0.000000e+00> : vector<16x8xf32>
    %227 = tpu.matmul %226, %212, %cst_68 {dimension_numbers = #tpu.dot_dimension_numbers<[1], [0], [0], [1], [0, 0, 1, 1], [], []>} : vector<16x16xf32>, vector<16x8xf32>, vector<16x8xf32> -> vector<16x8xf32>
    %228 = vector.extract_strided_slice %187 {offsets = [8, 0], sizes = [8, 16], strides = [1, 1]} : vector<16x16xf32> to vector<8x16xf32>
    %cst_69 = arith.constant dense<0.000000e+00> : vector<16x16xf32>
    %229 = tpu.matmul %227, %228, %cst_69 {dimension_numbers = #tpu.dot_dimension_numbers<[1], [0], [0], [1], [0, 0, 1, 1], [], []>} : vector<16x8xf32>, vector<8x16xf32>, vector<16x16xf32> -> vector<16x16xf32>
    %230 = arith.addf %209, %229 : vector<16x16xf32>
    %231 = vector.broadcast %189 : vector<1x16xf32> to vector<16x16xf32>
    %232 = arith.addf %230, %231 : vector<16x16xf32>
    %233 = arith.addf %174, %232 : vector<16x16xf32>
    %c0_70 = arith.constant 0 : index
    %c0_71 = arith.constant 0 : index
    %c0_72 = arith.constant 0 : index
    %234 = vector.load %arg15[%c0_70, %c0_71, %c0_72] : memref<4x1x16xf32, #tpu.memory_space<vmem>>, vector<1x1x16xf32>
    %235 = vector.shape_cast %234 : vector<1x1x16xf32> to vector<1x16xf32>
    %c0_73 = arith.constant 0 : index
    %c0_74 = arith.constant 0 : index
    %c0_75 = arith.constant 0 : index
    %236 = vector.load %arg14[%c0_73, %c0_74, %c0_75] : memref<4x1x16xf32, #tpu.memory_space<vmem>>, vector<1x1x16xf32>
    %237 = vector.shape_cast %236 : vector<1x1x16xf32> to vector<1x16xf32>
    %cst_76 = arith.constant dense<0.000000e+00> : vector<16xf32>
    %238 = vector.multi_reduction <add>, %233, %cst_76 [1] : vector<16x16xf32> to vector<16xf32>
    %239 = vector.shape_cast %238 : vector<16xf32> to vector<16x1xf32>
    %cst_77 = arith.constant 1.600000e+01 : f32
    %240 = vector.broadcast %cst_77 : f32 to vector<16x1xf32>
    %241 = arith.divf %239, %240 : vector<16x1xf32>
    %242 = vector.broadcast %241 : vector<16x1xf32> to vector<16x16xf32>
    %243 = arith.subf %233, %242 : vector<16x16xf32>
    %244 = arith.mulf %243, %243 : vector<16x16xf32>
    %cst_78 = arith.constant dense<0.000000e+00> : vector<16xf32>
    %245 = vector.multi_reduction <add>, %244, %cst_78 [1] : vector<16x16xf32> to vector<16xf32>
    %246 = vector.shape_cast %245 : vector<16xf32> to vector<16x1xf32>
    %cst_79 = arith.constant 1.600000e+01 : f32
    %247 = vector.broadcast %cst_79 : f32 to vector<16x1xf32>
    %248 = arith.divf %246, %247 : vector<16x1xf32>
    %249 = vector.broadcast %241 : vector<16x1xf32> to vector<16x16xf32>
    %250 = arith.subf %233, %249 : vector<16x16xf32>
    %cst_80 = arith.constant 9.99999974E-6 : f32
    %251 = vector.broadcast %cst_80 : f32 to vector<16x1xf32>
    %252 = arith.addf %248, %251 : vector<16x1xf32>
    %253 = math.rsqrt %252 : vector<16x1xf32>
    %254 = vector.broadcast %253 : vector<16x1xf32> to vector<16x16xf32>
    %255 = arith.mulf %250, %254 : vector<16x16xf32>
    %256 = vector.broadcast %235 : vector<1x16xf32> to vector<16x16xf32>
    %257 = arith.mulf %255, %256 : vector<16x16xf32>
    %258 = vector.broadcast %237 : vector<1x16xf32> to vector<16x16xf32>
    %259 = arith.addf %257, %258 : vector<16x16xf32>
    %c0_81 = arith.constant 0 : index
    %c0_82 = arith.constant 0 : index
    %c0_83 = arith.constant 0 : index
    %260 = vector.load %arg20[%c0_81, %c0_82, %c0_83] : memref<4x16x64xf32, #tpu.memory_space<vmem>>, vector<1x16x64xf32>
    %261 = vector.shape_cast %260 : vector<1x16x64xf32> to vector<16x64xf32>
    %cst_84 = arith.constant dense<0.000000e+00> : vector<16x64xf32>
    %262 = tpu.matmul %259, %261, %cst_84 {dimension_numbers = #tpu.dot_dimension_numbers<[1], [0], [0], [1], [0, 0, 1, 1], [], []>} : vector<16x16xf32>, vector<16x64xf32>, vector<16x64xf32> -> vector<16x64xf32>
    %c0_85 = arith.constant 0 : index
    %c0_86 = arith.constant 0 : index
    %c0_87 = arith.constant 0 : index
    %263 = vector.load %arg10[%c0_85, %c0_86, %c0_87] : memref<4x1x64xf32, #tpu.memory_space<vmem>>, vector<1x1x64xf32>
    %264 = vector.shape_cast %263 : vector<1x1x64xf32> to vector<1x64xf32>
    %265 = vector.broadcast %264 : vector<1x64xf32> to vector<16x64xf32>
    %266 = arith.addf %262, %265 : vector<16x64xf32>
    %cst_88 = arith.constant 0.000000e+00 : f32
    %267 = vector.broadcast %cst_88 : f32 to vector<16x64xf32>
    %268 = arith.maximumf %266, %267 : vector<16x64xf32>
    %c0_89 = arith.constant 0 : index
    %c0_90 = arith.constant 0 : index
    %c0_91 = arith.constant 0 : index
    %269 = vector.load %arg21[%c0_89, %c0_90, %c0_91] : memref<4x64x16xf32, #tpu.memory_space<vmem>>, vector<1x64x16xf32>
    %270 = vector.shape_cast %269 : vector<1x64x16xf32> to vector<64x16xf32>
    %cst_92 = arith.constant dense<0.000000e+00> : vector<16x16xf32>
    %271 = tpu.matmul %268, %270, %cst_92 {dimension_numbers = #tpu.dot_dimension_numbers<[1], [0], [0], [1], [0, 0, 1, 1], [], []>} : vector<16x64xf32>, vector<64x16xf32>, vector<16x16xf32> -> vector<16x16xf32>
    %c0_93 = arith.constant 0 : index
    %c0_94 = arith.constant 0 : index
    %c0_95 = arith.constant 0 : index
    %272 = vector.load %arg11[%c0_93, %c0_94, %c0_95] : memref<4x1x16xf32, #tpu.memory_space<vmem>>, vector<1x1x16xf32>
    %273 = vector.shape_cast %272 : vector<1x1x16xf32> to vector<1x16xf32>
    %274 = vector.broadcast %273 : vector<1x16xf32> to vector<16x16xf32>
    %275 = arith.addf %271, %274 : vector<16x16xf32>
    %276 = arith.addf %259, %275 : vector<16x16xf32>
    %c0_96 = arith.constant 0 : index
    %c0_97 = arith.constant 0 : index
    %c0_98 = arith.constant 0 : index
    %277 = vector.load %arg17[%c0_96, %c0_97, %c0_98] : memref<4x1x16xf32, #tpu.memory_space<vmem>>, vector<1x1x16xf32>
    %278 = vector.shape_cast %277 : vector<1x1x16xf32> to vector<1x16xf32>
    %c0_99 = arith.constant 0 : index
    %c0_100 = arith.constant 0 : index
    %c0_101 = arith.constant 0 : index
    %279 = vector.load %arg16[%c0_99, %c0_100, %c0_101] : memref<4x1x16xf32, #tpu.memory_space<vmem>>, vector<1x1x16xf32>
    %280 = vector.shape_cast %279 : vector<1x1x16xf32> to vector<1x16xf32>
    %cst_102 = arith.constant dense<0.000000e+00> : vector<16xf32>
    %281 = vector.multi_reduction <add>, %276, %cst_102 [1] : vector<16x16xf32> to vector<16xf32>
    %282 = vector.shape_cast %281 : vector<16xf32> to vector<16x1xf32>
    %cst_103 = arith.constant 1.600000e+01 : f32
    %283 = vector.broadcast %cst_103 : f32 to vector<16x1xf32>
    %284 = arith.divf %282, %283 : vector<16x1xf32>
    %285 = vector.broadcast %284 : vector<16x1xf32> to vector<16x16xf32>
    %286 = arith.subf %276, %285 : vector<16x16xf32>
    %287 = arith.mulf %286, %286 : vector<16x16xf32>
    %cst_104 = arith.constant dense<0.000000e+00> : vector<16xf32>
    %288 = vector.multi_reduction <add>, %287, %cst_104 [1] : vector<16x16xf32> to vector<16xf32>
    %289 = vector.shape_cast %288 : vector<16xf32> to vector<16x1xf32>
    %cst_105 = arith.constant 1.600000e+01 : f32
    %290 = vector.broadcast %cst_105 : f32 to vector<16x1xf32>
    %291 = arith.divf %289, %290 : vector<16x1xf32>
    %292 = vector.broadcast %284 : vector<16x1xf32> to vector<16x16xf32>
    %293 = arith.subf %276, %292 : vector<16x16xf32>
    %cst_106 = arith.constant 9.99999974E-6 : f32
    %294 = vector.broadcast %cst_106 : f32 to vector<16x1xf32>
    %295 = arith.addf %291, %294 : vector<16x1xf32>
    %296 = math.rsqrt %295 : vector<16x1xf32>
    %297 = vector.broadcast %296 : vector<16x1xf32> to vector<16x16xf32>
    %298 = arith.mulf %293, %297 : vector<16x16xf32>
    %299 = vector.broadcast %278 : vector<1x16xf32> to vector<16x16xf32>
    %300 = arith.mulf %298, %299 : vector<16x16xf32>
    %301 = vector.broadcast %280 : vector<1x16xf32> to vector<16x16xf32>
    %302 = arith.addf %300, %301 : vector<16x16xf32>
    %c1 = arith.constant 1 : index
    %c0_107 = arith.constant 0 : index
    %c0_108 = arith.constant 0 : index
    %303 = vector.load %arg13[%c1, %c0_107, %c0_108] : memref<4x16x48xf32, #tpu.memory_space<vmem>>, vector<1x16x48xf32>
    %304 = vector.shape_cast %303 : vector<1x16x48xf32> to vector<16x48xf32>
    %cst_109 = arith.constant dense<0.000000e+00> : vector<16x48xf32>
    %305 = tpu.matmul %302, %304, %cst_109 {dimension_numbers = #tpu.dot_dimension_numbers<[1], [0], [0], [1], [0, 0, 1, 1], [], []>} : vector<16x16xf32>, vector<16x48xf32>, vector<16x48xf32> -> vector<16x48xf32>
    %c1_110 = arith.constant 1 : index
    %c0_111 = arith.constant 0 : index
    %c0_112 = arith.constant 0 : index
    %306 = vector.load %arg12[%c1_110, %c0_111, %c0_112] : memref<4x1x48xf32, #tpu.memory_space<vmem>>, vector<1x1x48xf32>
    %307 = vector.shape_cast %306 : vector<1x1x48xf32> to vector<1x48xf32>
    %308 = vector.broadcast %307 : vector<1x48xf32> to vector<16x48xf32>
    %309 = arith.addf %305, %308 : vector<16x48xf32>
    %310 = vector.extract_strided_slice %309 {offsets = [0, 0], sizes = [16, 16], strides = [1, 1]} : vector<16x48xf32> to vector<16x16xf32>
    %311 = vector.extract_strided_slice %309 {offsets = [0, 16], sizes = [16, 16], strides = [1, 1]} : vector<16x48xf32> to vector<16x16xf32>
    %312 = vector.extract_strided_slice %309 {offsets = [0, 32], sizes = [16, 16], strides = [1, 1]} : vector<16x48xf32> to vector<16x16xf32>
    %c1_113 = arith.constant 1 : index
    %c0_114 = arith.constant 0 : index
    %c0_115 = arith.constant 0 : index
    %313 = vector.load %arg19[%c1_113, %c0_114, %c0_115] : memref<4x16x16xf32, #tpu.memory_space<vmem>>, vector<1x16x16xf32>
    %314 = vector.shape_cast %313 : vector<1x16x16xf32> to vector<16x16xf32>
    %c1_116 = arith.constant 1 : index
    %c0_117 = arith.constant 0 : index
    %c0_118 = arith.constant 0 : index
    %315 = vector.load %arg18[%c1_116, %c0_117, %c0_118] : memref<4x1x16xf32, #tpu.memory_space<vmem>>, vector<1x1x16xf32>
    %316 = vector.shape_cast %315 : vector<1x1x16xf32> to vector<1x16xf32>
    %317 = vector.extract_strided_slice %310 {offsets = [0, 0], sizes = [16, 8], strides = [1, 1]} : vector<16x16xf32> to vector<16x8xf32>
    %318 = vector.extract_strided_slice %311 {offsets = [0, 0], sizes = [16, 8], strides = [1, 1]} : vector<16x16xf32> to vector<16x8xf32>
    %319 = vector.extract_strided_slice %312 {offsets = [0, 0], sizes = [16, 8], strides = [1, 1]} : vector<16x16xf32> to vector<16x8xf32>
    %cst_119 = arith.constant dense<0.000000e+00> : vector<16x16xf32>
    %320 = tpu.matmul %317, %318, %cst_119 {dimension_numbers = #tpu.dot_dimension_numbers<[1], [1], [0], [0], [0, 0, 1, 0], [], []>} : vector<16x8xf32>, vector<16x8xf32>, vector<16x16xf32> -> vector<16x16xf32>
    %cst_120 = arith.constant 0.353553385 : f32
    %321 = vector.broadcast %cst_120 : f32 to vector<16x16xf32>
    %322 = arith.mulf %320, %321 : vector<16x16xf32>
    %323 = arith.addf %322, %175 : vector<16x16xf32>
    %cst_121 = arith.constant dense<0xFF800000> : vector<16xf32>
    %324 = vector.multi_reduction <maximumf>, %323, %cst_121 [1] : vector<16x16xf32> to vector<16xf32>
    %325 = vector.shape_cast %324 : vector<16xf32> to vector<16x1xf32>
    %326 = vector.broadcast %325 : vector<16x1xf32> to vector<16x16xf32>
    %327 = arith.subf %323, %326 : vector<16x16xf32>
    %328 = math.exp %327 : vector<16x16xf32>
    %cst_122 = arith.constant dense<0.000000e+00> : vector<16xf32>
    %329 = vector.multi_reduction <add>, %328, %cst_122 [1] : vector<16x16xf32> to vector<16xf32>
    %330 = vector.shape_cast %329 : vector<16xf32> to vector<16x1xf32>
    %331 = tpu.reciprocal %330 {approx = true} : vector<16x1xf32> -> vector<16x1xf32>
    %332 = vector.broadcast %331 : vector<16x1xf32> to vector<16x16xf32>
    %333 = arith.mulf %328, %332 : vector<16x16xf32>
    %cst_123 = arith.constant dense<0.000000e+00> : vector<16x8xf32>
    %334 = tpu.matmul %333, %319, %cst_123 {dimension_numbers = #tpu.dot_dimension_numbers<[1], [0], [0], [1], [0, 0, 1, 1], [], []>} : vector<16x16xf32>, vector<16x8xf32>, vector<16x8xf32> -> vector<16x8xf32>
    %335 = vector.extract_strided_slice %314 {offsets = [0, 0], sizes = [8, 16], strides = [1, 1]} : vector<16x16xf32> to vector<8x16xf32>
    %cst_124 = arith.constant dense<0.000000e+00> : vector<16x16xf32>
    %336 = tpu.matmul %334, %335, %cst_124 {dimension_numbers = #tpu.dot_dimension_numbers<[1], [0], [0], [1], [0, 0, 1, 1], [], []>} : vector<16x8xf32>, vector<8x16xf32>, vector<16x16xf32> -> vector<16x16xf32>
    %337 = vector.extract_strided_slice %310 {offsets = [0, 8], sizes = [16, 8], strides = [1, 1]} : vector<16x16xf32> to vector<16x8xf32>
    %338 = vector.extract_strided_slice %311 {offsets = [0, 8], sizes = [16, 8], strides = [1, 1]} : vector<16x16xf32> to vector<16x8xf32>
    %339 = vector.extract_strided_slice %312 {offsets = [0, 8], sizes = [16, 8], strides = [1, 1]} : vector<16x16xf32> to vector<16x8xf32>
    %cst_125 = arith.constant dense<0.000000e+00> : vector<16x16xf32>
    %340 = tpu.matmul %337, %338, %cst_125 {dimension_numbers = #tpu.dot_dimension_numbers<[1], [1], [0], [0], [0, 0, 1, 0], [], []>} : vector<16x8xf32>, vector<16x8xf32>, vector<16x16xf32> -> vector<16x16xf32>
    %cst_126 = arith.constant 0.353553385 : f32
    %341 = vector.broadcast %cst_126 : f32 to vector<16x16xf32>
    %342 = arith.mulf %340, %341 : vector<16x16xf32>
    %343 = arith.addf %342, %175 : vector<16x16xf32>
    %cst_127 = arith.constant dense<0xFF800000> : vector<16xf32>
    %344 = vector.multi_reduction <maximumf>, %343, %cst_127 [1] : vector<16x16xf32> to vector<16xf32>
    %345 = vector.shape_cast %344 : vector<16xf32> to vector<16x1xf32>
    %346 = vector.broadcast %345 : vector<16x1xf32> to vector<16x16xf32>
    %347 = arith.subf %343, %346 : vector<16x16xf32>
    %348 = math.exp %347 : vector<16x16xf32>
    %cst_128 = arith.constant dense<0.000000e+00> : vector<16xf32>
    %349 = vector.multi_reduction <add>, %348, %cst_128 [1] : vector<16x16xf32> to vector<16xf32>
    %350 = vector.shape_cast %349 : vector<16xf32> to vector<16x1xf32>
    %351 = tpu.reciprocal %350 {approx = true} : vector<16x1xf32> -> vector<16x1xf32>
    %352 = vector.broadcast %351 : vector<16x1xf32> to vector<16x16xf32>
    %353 = arith.mulf %348, %352 : vector<16x16xf32>
    %cst_129 = arith.constant dense<0.000000e+00> : vector<16x8xf32>
    %354 = tpu.matmul %353, %339, %cst_129 {dimension_numbers = #tpu.dot_dimension_numbers<[1], [0], [0], [1], [0, 0, 1, 1], [], []>} : vector<16x16xf32>, vector<16x8xf32>, vector<16x8xf32> -> vector<16x8xf32>
    %355 = vector.extract_strided_slice %314 {offsets = [8, 0], sizes = [8, 16], strides = [1, 1]} : vector<16x16xf32> to vector<8x16xf32>
    %cst_130 = arith.constant dense<0.000000e+00> : vector<16x16xf32>
    %356 = tpu.matmul %354, %355, %cst_130 {dimension_numbers = #tpu.dot_dimension_numbers<[1], [0], [0], [1], [0, 0, 1, 1], [], []>} : vector<16x8xf32>, vector<8x16xf32>, vector<16x16xf32> -> vector<16x16xf32>
    %357 = arith.addf %336, %356 : vector<16x16xf32>
    %358 = vector.broadcast %316 : vector<1x16xf32> to vector<16x16xf32>
    %359 = arith.addf %357, %358 : vector<16x16xf32>
    %360 = arith.addf %302, %359 : vector<16x16xf32>
    %c1_131 = arith.constant 1 : index
    %c0_132 = arith.constant 0 : index
    %c0_133 = arith.constant 0 : index
    %361 = vector.load %arg15[%c1_131, %c0_132, %c0_133] : memref<4x1x16xf32, #tpu.memory_space<vmem>>, vector<1x1x16xf32>
    %362 = vector.shape_cast %361 : vector<1x1x16xf32> to vector<1x16xf32>
    %c1_134 = arith.constant 1 : index
    %c0_135 = arith.constant 0 : index
    %c0_136 = arith.constant 0 : index
    %363 = vector.load %arg14[%c1_134, %c0_135, %c0_136] : memref<4x1x16xf32, #tpu.memory_space<vmem>>, vector<1x1x16xf32>
    %364 = vector.shape_cast %363 : vector<1x1x16xf32> to vector<1x16xf32>
    %cst_137 = arith.constant dense<0.000000e+00> : vector<16xf32>
    %365 = vector.multi_reduction <add>, %360, %cst_137 [1] : vector<16x16xf32> to vector<16xf32>
    %366 = vector.shape_cast %365 : vector<16xf32> to vector<16x1xf32>
    %cst_138 = arith.constant 1.600000e+01 : f32
    %367 = vector.broadcast %cst_138 : f32 to vector<16x1xf32>
    %368 = arith.divf %366, %367 : vector<16x1xf32>
    %369 = vector.broadcast %368 : vector<16x1xf32> to vector<16x16xf32>
    %370 = arith.subf %360, %369 : vector<16x16xf32>
    %371 = arith.mulf %370, %370 : vector<16x16xf32>
    %cst_139 = arith.constant dense<0.000000e+00> : vector<16xf32>
    %372 = vector.multi_reduction <add>, %371, %cst_139 [1] : vector<16x16xf32> to vector<16xf32>
    %373 = vector.shape_cast %372 : vector<16xf32> to vector<16x1xf32>
    %cst_140 = arith.constant 1.600000e+01 : f32
    %374 = vector.broadcast %cst_140 : f32 to vector<16x1xf32>
    %375 = arith.divf %373, %374 : vector<16x1xf32>
    %376 = vector.broadcast %368 : vector<16x1xf32> to vector<16x16xf32>
    %377 = arith.subf %360, %376 : vector<16x16xf32>
    %cst_141 = arith.constant 9.99999974E-6 : f32
    %378 = vector.broadcast %cst_141 : f32 to vector<16x1xf32>
    %379 = arith.addf %375, %378 : vector<16x1xf32>
    %380 = math.rsqrt %379 : vector<16x1xf32>
    %381 = vector.broadcast %380 : vector<16x1xf32> to vector<16x16xf32>
    %382 = arith.mulf %377, %381 : vector<16x16xf32>
    %383 = vector.broadcast %362 : vector<1x16xf32> to vector<16x16xf32>
    %384 = arith.mulf %382, %383 : vector<16x16xf32>
    %385 = vector.broadcast %364 : vector<1x16xf32> to vector<16x16xf32>
    %386 = arith.addf %384, %385 : vector<16x16xf32>
    %c1_142 = arith.constant 1 : index
    %c0_143 = arith.constant 0 : index
    %c0_144 = arith.constant 0 : index
    %387 = vector.load %arg20[%c1_142, %c0_143, %c0_144] : memref<4x16x64xf32, #tpu.memory_space<vmem>>, vector<1x16x64xf32>
    %388 = vector.shape_cast %387 : vector<1x16x64xf32> to vector<16x64xf32>
    %cst_145 = arith.constant dense<0.000000e+00> : vector<16x64xf32>
    %389 = tpu.matmul %386, %388, %cst_145 {dimension_numbers = #tpu.dot_dimension_numbers<[1], [0], [0], [1], [0, 0, 1, 1], [], []>} : vector<16x16xf32>, vector<16x64xf32>, vector<16x64xf32> -> vector<16x64xf32>
    %c1_146 = arith.constant 1 : index
    %c0_147 = arith.constant 0 : index
    %c0_148 = arith.constant 0 : index
    %390 = vector.load %arg10[%c1_146, %c0_147, %c0_148] : memref<4x1x64xf32, #tpu.memory_space<vmem>>, vector<1x1x64xf32>
    %391 = vector.shape_cast %390 : vector<1x1x64xf32> to vector<1x64xf32>
    %392 = vector.broadcast %391 : vector<1x64xf32> to vector<16x64xf32>
    %393 = arith.addf %389, %392 : vector<16x64xf32>
    %cst_149 = arith.constant 0.000000e+00 : f32
    %394 = vector.broadcast %cst_149 : f32 to vector<16x64xf32>
    %395 = arith.maximumf %393, %394 : vector<16x64xf32>
    %c1_150 = arith.constant 1 : index
    %c0_151 = arith.constant 0 : index
    %c0_152 = arith.constant 0 : index
    %396 = vector.load %arg21[%c1_150, %c0_151, %c0_152] : memref<4x64x16xf32, #tpu.memory_space<vmem>>, vector<1x64x16xf32>
    %397 = vector.shape_cast %396 : vector<1x64x16xf32> to vector<64x16xf32>
    %cst_153 = arith.constant dense<0.000000e+00> : vector<16x16xf32>
    %398 = tpu.matmul %395, %397, %cst_153 {dimension_numbers = #tpu.dot_dimension_numbers<[1], [0], [0], [1], [0, 0, 1, 1], [], []>} : vector<16x64xf32>, vector<64x16xf32>, vector<16x16xf32> -> vector<16x16xf32>
    %c1_154 = arith.constant 1 : index
    %c0_155 = arith.constant 0 : index
    %c0_156 = arith.constant 0 : index
    %399 = vector.load %arg11[%c1_154, %c0_155, %c0_156] : memref<4x1x16xf32, #tpu.memory_space<vmem>>, vector<1x1x16xf32>
    %400 = vector.shape_cast %399 : vector<1x1x16xf32> to vector<1x16xf32>
    %401 = vector.broadcast %400 : vector<1x16xf32> to vector<16x16xf32>
    %402 = arith.addf %398, %401 : vector<16x16xf32>
    %403 = arith.addf %386, %402 : vector<16x16xf32>
    %c1_157 = arith.constant 1 : index
    %c0_158 = arith.constant 0 : index
    %c0_159 = arith.constant 0 : index
    %404 = vector.load %arg17[%c1_157, %c0_158, %c0_159] : memref<4x1x16xf32, #tpu.memory_space<vmem>>, vector<1x1x16xf32>
    %405 = vector.shape_cast %404 : vector<1x1x16xf32> to vector<1x16xf32>
    %c1_160 = arith.constant 1 : index
    %c0_161 = arith.constant 0 : index
    %c0_162 = arith.constant 0 : index
    %406 = vector.load %arg16[%c1_160, %c0_161, %c0_162] : memref<4x1x16xf32, #tpu.memory_space<vmem>>, vector<1x1x16xf32>
    %407 = vector.shape_cast %406 : vector<1x1x16xf32> to vector<1x16xf32>
    %cst_163 = arith.constant dense<0.000000e+00> : vector<16xf32>
    %408 = vector.multi_reduction <add>, %403, %cst_163 [1] : vector<16x16xf32> to vector<16xf32>
    %409 = vector.shape_cast %408 : vector<16xf32> to vector<16x1xf32>
    %cst_164 = arith.constant 1.600000e+01 : f32
    %410 = vector.broadcast %cst_164 : f32 to vector<16x1xf32>
    %411 = arith.divf %409, %410 : vector<16x1xf32>
    %412 = vector.broadcast %411 : vector<16x1xf32> to vector<16x16xf32>
    %413 = arith.subf %403, %412 : vector<16x16xf32>
    %414 = arith.mulf %413, %413 : vector<16x16xf32>
    %cst_165 = arith.constant dense<0.000000e+00> : vector<16xf32>
    %415 = vector.multi_reduction <add>, %414, %cst_165 [1] : vector<16x16xf32> to vector<16xf32>
    %416 = vector.shape_cast %415 : vector<16xf32> to vector<16x1xf32>
    %cst_166 = arith.constant 1.600000e+01 : f32
    %417 = vector.broadcast %cst_166 : f32 to vector<16x1xf32>
    %418 = arith.divf %416, %417 : vector<16x1xf32>
    %419 = vector.broadcast %411 : vector<16x1xf32> to vector<16x16xf32>
    %420 = arith.subf %403, %419 : vector<16x16xf32>
    %cst_167 = arith.constant 9.99999974E-6 : f32
    %421 = vector.broadcast %cst_167 : f32 to vector<16x1xf32>
    %422 = arith.addf %418, %421 : vector<16x1xf32>
    %423 = math.rsqrt %422 : vector<16x1xf32>
    %424 = vector.broadcast %423 : vector<16x1xf32> to vector<16x16xf32>
    %425 = arith.mulf %420, %424 : vector<16x16xf32>
    %426 = vector.broadcast %405 : vector<1x16xf32> to vector<16x16xf32>
    %427 = arith.mulf %425, %426 : vector<16x16xf32>
    %428 = vector.broadcast %407 : vector<1x16xf32> to vector<16x16xf32>
    %429 = arith.addf %427, %428 : vector<16x16xf32>
    %c0_168 = arith.constant 0 : index
    %c0_169 = arith.constant 0 : index
    %430 = vector.load %arg2[%c0_168, %c0_169] : memref<10x32xf32, #tpu.memory_space<vmem>>, vector<10x32xf32>
    %c0_170 = arith.constant 0 : index
    %c0_171 = arith.constant 0 : index
    %431 = vector.load %arg6[%c0_170, %c0_171] : memref<32x16xf32, #tpu.memory_space<vmem>>, vector<32x16xf32>
    %cst_172 = arith.constant dense<0.000000e+00> : vector<10x16xf32>
    %432 = tpu.matmul %430, %431, %cst_172 {dimension_numbers = #tpu.dot_dimension_numbers<[1], [0], [0], [1], [0, 0, 1, 1], [], []>} : vector<10x32xf32>, vector<32x16xf32>, vector<10x16xf32> -> vector<10x16xf32>
    %c0_173 = arith.constant 0 : index
    %c0_174 = arith.constant 0 : index
    %433 = vector.load %arg4[%c0_173, %c0_174] : memref<10x10xf32, #tpu.memory_space<vmem>>, vector<10x10xf32>
    %c2_175 = arith.constant 2 : index
    %c0_176 = arith.constant 0 : index
    %c0_177 = arith.constant 0 : index
    %434 = vector.load %arg13[%c2_175, %c0_176, %c0_177] : memref<4x16x48xf32, #tpu.memory_space<vmem>>, vector<1x16x48xf32>
    %435 = vector.shape_cast %434 : vector<1x16x48xf32> to vector<16x48xf32>
    %cst_178 = arith.constant dense<0.000000e+00> : vector<10x48xf32>
    %436 = tpu.matmul %432, %435, %cst_178 {dimension_numbers = #tpu.dot_dimension_numbers<[1], [0], [0], [1], [0, 0, 1, 1], [], []>} : vector<10x16xf32>, vector<16x48xf32>, vector<10x48xf32> -> vector<10x48xf32>
    %c2_179 = arith.constant 2 : index
    %c0_180 = arith.constant 0 : index
    %c0_181 = arith.constant 0 : index
    %437 = vector.load %arg12[%c2_179, %c0_180, %c0_181] : memref<4x1x48xf32, #tpu.memory_space<vmem>>, vector<1x1x48xf32>
    %438 = vector.shape_cast %437 : vector<1x1x48xf32> to vector<1x48xf32>
    %439 = vector.broadcast %438 : vector<1x48xf32> to vector<10x48xf32>
    %440 = arith.addf %436, %439 : vector<10x48xf32>
    %441 = vector.extract_strided_slice %440 {offsets = [0, 0], sizes = [10, 16], strides = [1, 1]} : vector<10x48xf32> to vector<10x16xf32>
    %442 = vector.extract_strided_slice %440 {offsets = [0, 16], sizes = [10, 16], strides = [1, 1]} : vector<10x48xf32> to vector<10x16xf32>
    %443 = vector.extract_strided_slice %440 {offsets = [0, 32], sizes = [10, 16], strides = [1, 1]} : vector<10x48xf32> to vector<10x16xf32>
    %c2_182 = arith.constant 2 : index
    %c0_183 = arith.constant 0 : index
    %c0_184 = arith.constant 0 : index
    %444 = vector.load %arg19[%c2_182, %c0_183, %c0_184] : memref<4x16x16xf32, #tpu.memory_space<vmem>>, vector<1x16x16xf32>
    %445 = vector.shape_cast %444 : vector<1x16x16xf32> to vector<16x16xf32>
    %c2_185 = arith.constant 2 : index
    %c0_186 = arith.constant 0 : index
    %c0_187 = arith.constant 0 : index
    %446 = vector.load %arg18[%c2_185, %c0_186, %c0_187] : memref<4x1x16xf32, #tpu.memory_space<vmem>>, vector<1x1x16xf32>
    %447 = vector.shape_cast %446 : vector<1x1x16xf32> to vector<1x16xf32>
    %448 = vector.extract_strided_slice %441 {offsets = [0, 0], sizes = [10, 8], strides = [1, 1]} : vector<10x16xf32> to vector<10x8xf32>
    %449 = vector.extract_strided_slice %442 {offsets = [0, 0], sizes = [10, 8], strides = [1, 1]} : vector<10x16xf32> to vector<10x8xf32>
    %450 = vector.extract_strided_slice %443 {offsets = [0, 0], sizes = [10, 8], strides = [1, 1]} : vector<10x16xf32> to vector<10x8xf32>
    %cst_188 = arith.constant dense<0.000000e+00> : vector<10x10xf32>
    %451 = tpu.matmul %448, %449, %cst_188 {dimension_numbers = #tpu.dot_dimension_numbers<[1], [1], [0], [0], [0, 0, 1, 0], [], []>} : vector<10x8xf32>, vector<10x8xf32>, vector<10x10xf32> -> vector<10x10xf32>
    %cst_189 = arith.constant 0.353553385 : f32
    %452 = vector.broadcast %cst_189 : f32 to vector<10x10xf32>
    %453 = arith.mulf %451, %452 : vector<10x10xf32>
    %454 = arith.addf %453, %433 : vector<10x10xf32>
    %cst_190 = arith.constant dense<0xFF800000> : vector<10xf32>
    %455 = vector.multi_reduction <maximumf>, %454, %cst_190 [1] : vector<10x10xf32> to vector<10xf32>
    %456 = vector.shape_cast %455 : vector<10xf32> to vector<10x1xf32>
    %457 = vector.broadcast %456 : vector<10x1xf32> to vector<10x10xf32>
    %458 = arith.subf %454, %457 : vector<10x10xf32>
    %459 = math.exp %458 : vector<10x10xf32>
    %cst_191 = arith.constant dense<0.000000e+00> : vector<10xf32>
    %460 = vector.multi_reduction <add>, %459, %cst_191 [1] : vector<10x10xf32> to vector<10xf32>
    %461 = vector.shape_cast %460 : vector<10xf32> to vector<10x1xf32>
    %462 = tpu.reciprocal %461 {approx = true} : vector<10x1xf32> -> vector<10x1xf32>
    %463 = vector.broadcast %462 : vector<10x1xf32> to vector<10x10xf32>
    %464 = arith.mulf %459, %463 : vector<10x10xf32>
    %cst_192 = arith.constant dense<0.000000e+00> : vector<10x8xf32>
    %465 = tpu.matmul %464, %450, %cst_192 {dimension_numbers = #tpu.dot_dimension_numbers<[1], [0], [0], [1], [0, 0, 1, 1], [], []>} : vector<10x10xf32>, vector<10x8xf32>, vector<10x8xf32> -> vector<10x8xf32>
    %466 = vector.extract_strided_slice %445 {offsets = [0, 0], sizes = [8, 16], strides = [1, 1]} : vector<16x16xf32> to vector<8x16xf32>
    %cst_193 = arith.constant dense<0.000000e+00> : vector<10x16xf32>
    %467 = tpu.matmul %465, %466, %cst_193 {dimension_numbers = #tpu.dot_dimension_numbers<[1], [0], [0], [1], [0, 0, 1, 1], [], []>} : vector<10x8xf32>, vector<8x16xf32>, vector<10x16xf32> -> vector<10x16xf32>
    %468 = vector.extract_strided_slice %441 {offsets = [0, 8], sizes = [10, 8], strides = [1, 1]} : vector<10x16xf32> to vector<10x8xf32>
    %469 = vector.extract_strided_slice %442 {offsets = [0, 8], sizes = [10, 8], strides = [1, 1]} : vector<10x16xf32> to vector<10x8xf32>
    %470 = vector.extract_strided_slice %443 {offsets = [0, 8], sizes = [10, 8], strides = [1, 1]} : vector<10x16xf32> to vector<10x8xf32>
    %cst_194 = arith.constant dense<0.000000e+00> : vector<10x10xf32>
    %471 = tpu.matmul %468, %469, %cst_194 {dimension_numbers = #tpu.dot_dimension_numbers<[1], [1], [0], [0], [0, 0, 1, 0], [], []>} : vector<10x8xf32>, vector<10x8xf32>, vector<10x10xf32> -> vector<10x10xf32>
    %cst_195 = arith.constant 0.353553385 : f32
    %472 = vector.broadcast %cst_195 : f32 to vector<10x10xf32>
    %473 = arith.mulf %471, %472 : vector<10x10xf32>
    %474 = arith.addf %473, %433 : vector<10x10xf32>
    %cst_196 = arith.constant dense<0xFF800000> : vector<10xf32>
    %475 = vector.multi_reduction <maximumf>, %474, %cst_196 [1] : vector<10x10xf32> to vector<10xf32>
    %476 = vector.shape_cast %475 : vector<10xf32> to vector<10x1xf32>
    %477 = vector.broadcast %476 : vector<10x1xf32> to vector<10x10xf32>
    %478 = arith.subf %474, %477 : vector<10x10xf32>
    %479 = math.exp %478 : vector<10x10xf32>
    %cst_197 = arith.constant dense<0.000000e+00> : vector<10xf32>
    %480 = vector.multi_reduction <add>, %479, %cst_197 [1] : vector<10x10xf32> to vector<10xf32>
    %481 = vector.shape_cast %480 : vector<10xf32> to vector<10x1xf32>
    %482 = tpu.reciprocal %481 {approx = true} : vector<10x1xf32> -> vector<10x1xf32>
    %483 = vector.broadcast %482 : vector<10x1xf32> to vector<10x10xf32>
    %484 = arith.mulf %479, %483 : vector<10x10xf32>
    %cst_198 = arith.constant dense<0.000000e+00> : vector<10x8xf32>
    %485 = tpu.matmul %484, %470, %cst_198 {dimension_numbers = #tpu.dot_dimension_numbers<[1], [0], [0], [1], [0, 0, 1, 1], [], []>} : vector<10x10xf32>, vector<10x8xf32>, vector<10x8xf32> -> vector<10x8xf32>
    %486 = vector.extract_strided_slice %445 {offsets = [8, 0], sizes = [8, 16], strides = [1, 1]} : vector<16x16xf32> to vector<8x16xf32>
    %cst_199 = arith.constant dense<0.000000e+00> : vector<10x16xf32>
    %487 = tpu.matmul %485, %486, %cst_199 {dimension_numbers = #tpu.dot_dimension_numbers<[1], [0], [0], [1], [0, 0, 1, 1], [], []>} : vector<10x8xf32>, vector<8x16xf32>, vector<10x16xf32> -> vector<10x16xf32>
    %488 = arith.addf %467, %487 : vector<10x16xf32>
    %489 = vector.broadcast %447 : vector<1x16xf32> to vector<10x16xf32>
    %490 = arith.addf %488, %489 : vector<10x16xf32>
    %491 = arith.addf %432, %490 : vector<10x16xf32>
    %c2_200 = arith.constant 2 : index
    %c0_201 = arith.constant 0 : index
    %c0_202 = arith.constant 0 : index
    %492 = vector.load %arg15[%c2_200, %c0_201, %c0_202] : memref<4x1x16xf32, #tpu.memory_space<vmem>>, vector<1x1x16xf32>
    %493 = vector.shape_cast %492 : vector<1x1x16xf32> to vector<1x16xf32>
    %c2_203 = arith.constant 2 : index
    %c0_204 = arith.constant 0 : index
    %c0_205 = arith.constant 0 : index
    %494 = vector.load %arg14[%c2_203, %c0_204, %c0_205] : memref<4x1x16xf32, #tpu.memory_space<vmem>>, vector<1x1x16xf32>
    %495 = vector.shape_cast %494 : vector<1x1x16xf32> to vector<1x16xf32>
    %cst_206 = arith.constant dense<0.000000e+00> : vector<10xf32>
    %496 = vector.multi_reduction <add>, %491, %cst_206 [1] : vector<10x16xf32> to vector<10xf32>
    %497 = vector.shape_cast %496 : vector<10xf32> to vector<10x1xf32>
    %cst_207 = arith.constant 1.600000e+01 : f32
    %498 = vector.broadcast %cst_207 : f32 to vector<10x1xf32>
    %499 = arith.divf %497, %498 : vector<10x1xf32>
    %500 = vector.broadcast %499 : vector<10x1xf32> to vector<10x16xf32>
    %501 = arith.subf %491, %500 : vector<10x16xf32>
    %502 = arith.mulf %501, %501 : vector<10x16xf32>
    %cst_208 = arith.constant dense<0.000000e+00> : vector<10xf32>
    %503 = vector.multi_reduction <add>, %502, %cst_208 [1] : vector<10x16xf32> to vector<10xf32>
    %504 = vector.shape_cast %503 : vector<10xf32> to vector<10x1xf32>
    %cst_209 = arith.constant 1.600000e+01 : f32
    %505 = vector.broadcast %cst_209 : f32 to vector<10x1xf32>
    %506 = arith.divf %504, %505 : vector<10x1xf32>
    %507 = vector.broadcast %499 : vector<10x1xf32> to vector<10x16xf32>
    %508 = arith.subf %491, %507 : vector<10x16xf32>
    %cst_210 = arith.constant 9.99999974E-6 : f32
    %509 = vector.broadcast %cst_210 : f32 to vector<10x1xf32>
    %510 = arith.addf %506, %509 : vector<10x1xf32>
    %511 = math.rsqrt %510 : vector<10x1xf32>
    %512 = vector.broadcast %511 : vector<10x1xf32> to vector<10x16xf32>
    %513 = arith.mulf %508, %512 : vector<10x16xf32>
    %514 = vector.broadcast %493 : vector<1x16xf32> to vector<10x16xf32>
    %515 = arith.mulf %513, %514 : vector<10x16xf32>
    %516 = vector.broadcast %495 : vector<1x16xf32> to vector<10x16xf32>
    %517 = arith.addf %515, %516 : vector<10x16xf32>
    %c2_211 = arith.constant 2 : index
    %c0_212 = arith.constant 0 : index
    %c0_213 = arith.constant 0 : index
    %518 = vector.load %arg20[%c2_211, %c0_212, %c0_213] : memref<4x16x64xf32, #tpu.memory_space<vmem>>, vector<1x16x64xf32>
    %519 = vector.shape_cast %518 : vector<1x16x64xf32> to vector<16x64xf32>
    %cst_214 = arith.constant dense<0.000000e+00> : vector<10x64xf32>
    %520 = tpu.matmul %517, %519, %cst_214 {dimension_numbers = #tpu.dot_dimension_numbers<[1], [0], [0], [1], [0, 0, 1, 1], [], []>} : vector<10x16xf32>, vector<16x64xf32>, vector<10x64xf32> -> vector<10x64xf32>
    %c2_215 = arith.constant 2 : index
    %c0_216 = arith.constant 0 : index
    %c0_217 = arith.constant 0 : index
    %521 = vector.load %arg10[%c2_215, %c0_216, %c0_217] : memref<4x1x64xf32, #tpu.memory_space<vmem>>, vector<1x1x64xf32>
    %522 = vector.shape_cast %521 : vector<1x1x64xf32> to vector<1x64xf32>
    %523 = vector.broadcast %522 : vector<1x64xf32> to vector<10x64xf32>
    %524 = arith.addf %520, %523 : vector<10x64xf32>
    %cst_218 = arith.constant 0.000000e+00 : f32
    %525 = vector.broadcast %cst_218 : f32 to vector<10x64xf32>
    %526 = arith.maximumf %524, %525 : vector<10x64xf32>
    %c2_219 = arith.constant 2 : index
    %c0_220 = arith.constant 0 : index
    %c0_221 = arith.constant 0 : index
    %527 = vector.load %arg21[%c2_219, %c0_220, %c0_221] : memref<4x64x16xf32, #tpu.memory_space<vmem>>, vector<1x64x16xf32>
    %528 = vector.shape_cast %527 : vector<1x64x16xf32> to vector<64x16xf32>
    %cst_222 = arith.constant dense<0.000000e+00> : vector<10x16xf32>
    %529 = tpu.matmul %526, %528, %cst_222 {dimension_numbers = #tpu.dot_dimension_numbers<[1], [0], [0], [1], [0, 0, 1, 1], [], []>} : vector<10x64xf32>, vector<64x16xf32>, vector<10x16xf32> -> vector<10x16xf32>
    %c2_223 = arith.constant 2 : index
    %c0_224 = arith.constant 0 : index
    %c0_225 = arith.constant 0 : index
    %530 = vector.load %arg11[%c2_223, %c0_224, %c0_225] : memref<4x1x16xf32, #tpu.memory_space<vmem>>, vector<1x1x16xf32>
    %531 = vector.shape_cast %530 : vector<1x1x16xf32> to vector<1x16xf32>
    %532 = vector.broadcast %531 : vector<1x16xf32> to vector<10x16xf32>
    %533 = arith.addf %529, %532 : vector<10x16xf32>
    %534 = arith.addf %517, %533 : vector<10x16xf32>
    %c2_226 = arith.constant 2 : index
    %c0_227 = arith.constant 0 : index
    %c0_228 = arith.constant 0 : index
    %535 = vector.load %arg17[%c2_226, %c0_227, %c0_228] : memref<4x1x16xf32, #tpu.memory_space<vmem>>, vector<1x1x16xf32>
    %536 = vector.shape_cast %535 : vector<1x1x16xf32> to vector<1x16xf32>
    %c2_229 = arith.constant 2 : index
    %c0_230 = arith.constant 0 : index
    %c0_231 = arith.constant 0 : index
    %537 = vector.load %arg16[%c2_229, %c0_230, %c0_231] : memref<4x1x16xf32, #tpu.memory_space<vmem>>, vector<1x1x16xf32>
    %538 = vector.shape_cast %537 : vector<1x1x16xf32> to vector<1x16xf32>
    %cst_232 = arith.constant dense<0.000000e+00> : vector<10xf32>
    %539 = vector.multi_reduction <add>, %534, %cst_232 [1] : vector<10x16xf32> to vector<10xf32>
    %540 = vector.shape_cast %539 : vector<10xf32> to vector<10x1xf32>
    %cst_233 = arith.constant 1.600000e+01 : f32
    %541 = vector.broadcast %cst_233 : f32 to vector<10x1xf32>
    %542 = arith.divf %540, %541 : vector<10x1xf32>
    %543 = vector.broadcast %542 : vector<10x1xf32> to vector<10x16xf32>
    %544 = arith.subf %534, %543 : vector<10x16xf32>
    %545 = arith.mulf %544, %544 : vector<10x16xf32>
    %cst_234 = arith.constant dense<0.000000e+00> : vector<10xf32>
    %546 = vector.multi_reduction <add>, %545, %cst_234 [1] : vector<10x16xf32> to vector<10xf32>
    %547 = vector.shape_cast %546 : vector<10xf32> to vector<10x1xf32>
    %cst_235 = arith.constant 1.600000e+01 : f32
    %548 = vector.broadcast %cst_235 : f32 to vector<10x1xf32>
    %549 = arith.divf %547, %548 : vector<10x1xf32>
    %550 = vector.broadcast %542 : vector<10x1xf32> to vector<10x16xf32>
    %551 = arith.subf %534, %550 : vector<10x16xf32>
    %cst_236 = arith.constant 9.99999974E-6 : f32
    %552 = vector.broadcast %cst_236 : f32 to vector<10x1xf32>
    %553 = arith.addf %549, %552 : vector<10x1xf32>
    %554 = math.rsqrt %553 : vector<10x1xf32>
    %555 = vector.broadcast %554 : vector<10x1xf32> to vector<10x16xf32>
    %556 = arith.mulf %551, %555 : vector<10x16xf32>
    %557 = vector.broadcast %536 : vector<1x16xf32> to vector<10x16xf32>
    %558 = arith.mulf %556, %557 : vector<10x16xf32>
    %559 = vector.broadcast %538 : vector<1x16xf32> to vector<10x16xf32>
    %560 = arith.addf %558, %559 : vector<10x16xf32>
    %c3 = arith.constant 3 : index
    %c0_237 = arith.constant 0 : index
    %c0_238 = arith.constant 0 : index
    %561 = vector.load %arg13[%c3, %c0_237, %c0_238] : memref<4x16x48xf32, #tpu.memory_space<vmem>>, vector<1x16x48xf32>
    %562 = vector.shape_cast %561 : vector<1x16x48xf32> to vector<16x48xf32>
    %cst_239 = arith.constant dense<0.000000e+00> : vector<10x48xf32>
    %563 = tpu.matmul %560, %562, %cst_239 {dimension_numbers = #tpu.dot_dimension_numbers<[1], [0], [0], [1], [0, 0, 1, 1], [], []>} : vector<10x16xf32>, vector<16x48xf32>, vector<10x48xf32> -> vector<10x48xf32>
    %c3_240 = arith.constant 3 : index
    %c0_241 = arith.constant 0 : index
    %c0_242 = arith.constant 0 : index
    %564 = vector.load %arg12[%c3_240, %c0_241, %c0_242] : memref<4x1x48xf32, #tpu.memory_space<vmem>>, vector<1x1x48xf32>
    %565 = vector.shape_cast %564 : vector<1x1x48xf32> to vector<1x48xf32>
    %566 = vector.broadcast %565 : vector<1x48xf32> to vector<10x48xf32>
    %567 = arith.addf %563, %566 : vector<10x48xf32>
    %568 = vector.extract_strided_slice %567 {offsets = [0, 0], sizes = [10, 16], strides = [1, 1]} : vector<10x48xf32> to vector<10x16xf32>
    %569 = vector.extract_strided_slice %567 {offsets = [0, 16], sizes = [10, 16], strides = [1, 1]} : vector<10x48xf32> to vector<10x16xf32>
    %570 = vector.extract_strided_slice %567 {offsets = [0, 32], sizes = [10, 16], strides = [1, 1]} : vector<10x48xf32> to vector<10x16xf32>
    %c3_243 = arith.constant 3 : index
    %c0_244 = arith.constant 0 : index
    %c0_245 = arith.constant 0 : index
    %571 = vector.load %arg19[%c3_243, %c0_244, %c0_245] : memref<4x16x16xf32, #tpu.memory_space<vmem>>, vector<1x16x16xf32>
    %572 = vector.shape_cast %571 : vector<1x16x16xf32> to vector<16x16xf32>
    %c3_246 = arith.constant 3 : index
    %c0_247 = arith.constant 0 : index
    %c0_248 = arith.constant 0 : index
    %573 = vector.load %arg18[%c3_246, %c0_247, %c0_248] : memref<4x1x16xf32, #tpu.memory_space<vmem>>, vector<1x1x16xf32>
    %574 = vector.shape_cast %573 : vector<1x1x16xf32> to vector<1x16xf32>
    %575 = vector.extract_strided_slice %568 {offsets = [0, 0], sizes = [10, 8], strides = [1, 1]} : vector<10x16xf32> to vector<10x8xf32>
    %576 = vector.extract_strided_slice %569 {offsets = [0, 0], sizes = [10, 8], strides = [1, 1]} : vector<10x16xf32> to vector<10x8xf32>
    %577 = vector.extract_strided_slice %570 {offsets = [0, 0], sizes = [10, 8], strides = [1, 1]} : vector<10x16xf32> to vector<10x8xf32>
    %cst_249 = arith.constant dense<0.000000e+00> : vector<10x10xf32>
    %578 = tpu.matmul %575, %576, %cst_249 {dimension_numbers = #tpu.dot_dimension_numbers<[1], [1], [0], [0], [0, 0, 1, 0], [], []>} : vector<10x8xf32>, vector<10x8xf32>, vector<10x10xf32> -> vector<10x10xf32>
    %cst_250 = arith.constant 0.353553385 : f32
    %579 = vector.broadcast %cst_250 : f32 to vector<10x10xf32>
    %580 = arith.mulf %578, %579 : vector<10x10xf32>
    %581 = arith.addf %580, %433 : vector<10x10xf32>
    %cst_251 = arith.constant dense<0xFF800000> : vector<10xf32>
    %582 = vector.multi_reduction <maximumf>, %581, %cst_251 [1] : vector<10x10xf32> to vector<10xf32>
    %583 = vector.shape_cast %582 : vector<10xf32> to vector<10x1xf32>
    %584 = vector.broadcast %583 : vector<10x1xf32> to vector<10x10xf32>
    %585 = arith.subf %581, %584 : vector<10x10xf32>
    %586 = math.exp %585 : vector<10x10xf32>
    %cst_252 = arith.constant dense<0.000000e+00> : vector<10xf32>
    %587 = vector.multi_reduction <add>, %586, %cst_252 [1] : vector<10x10xf32> to vector<10xf32>
    %588 = vector.shape_cast %587 : vector<10xf32> to vector<10x1xf32>
    %589 = tpu.reciprocal %588 {approx = true} : vector<10x1xf32> -> vector<10x1xf32>
    %590 = vector.broadcast %589 : vector<10x1xf32> to vector<10x10xf32>
    %591 = arith.mulf %586, %590 : vector<10x10xf32>
    %cst_253 = arith.constant dense<0.000000e+00> : vector<10x8xf32>
    %592 = tpu.matmul %591, %577, %cst_253 {dimension_numbers = #tpu.dot_dimension_numbers<[1], [0], [0], [1], [0, 0, 1, 1], [], []>} : vector<10x10xf32>, vector<10x8xf32>, vector<10x8xf32> -> vector<10x8xf32>
    %593 = vector.extract_strided_slice %572 {offsets = [0, 0], sizes = [8, 16], strides = [1, 1]} : vector<16x16xf32> to vector<8x16xf32>
    %cst_254 = arith.constant dense<0.000000e+00> : vector<10x16xf32>
    %594 = tpu.matmul %592, %593, %cst_254 {dimension_numbers = #tpu.dot_dimension_numbers<[1], [0], [0], [1], [0, 0, 1, 1], [], []>} : vector<10x8xf32>, vector<8x16xf32>, vector<10x16xf32> -> vector<10x16xf32>
    %595 = vector.extract_strided_slice %568 {offsets = [0, 8], sizes = [10, 8], strides = [1, 1]} : vector<10x16xf32> to vector<10x8xf32>
    %596 = vector.extract_strided_slice %569 {offsets = [0, 8], sizes = [10, 8], strides = [1, 1]} : vector<10x16xf32> to vector<10x8xf32>
    %597 = vector.extract_strided_slice %570 {offsets = [0, 8], sizes = [10, 8], strides = [1, 1]} : vector<10x16xf32> to vector<10x8xf32>
    %cst_255 = arith.constant dense<0.000000e+00> : vector<10x10xf32>
    %598 = tpu.matmul %595, %596, %cst_255 {dimension_numbers = #tpu.dot_dimension_numbers<[1], [1], [0], [0], [0, 0, 1, 0], [], []>} : vector<10x8xf32>, vector<10x8xf32>, vector<10x10xf32> -> vector<10x10xf32>
    %cst_256 = arith.constant 0.353553385 : f32
    %599 = vector.broadcast %cst_256 : f32 to vector<10x10xf32>
    %600 = arith.mulf %598, %599 : vector<10x10xf32>
    %601 = arith.addf %600, %433 : vector<10x10xf32>
    %cst_257 = arith.constant dense<0xFF800000> : vector<10xf32>
    %602 = vector.multi_reduction <maximumf>, %601, %cst_257 [1] : vector<10x10xf32> to vector<10xf32>
    %603 = vector.shape_cast %602 : vector<10xf32> to vector<10x1xf32>
    %604 = vector.broadcast %603 : vector<10x1xf32> to vector<10x10xf32>
    %605 = arith.subf %601, %604 : vector<10x10xf32>
    %606 = math.exp %605 : vector<10x10xf32>
    %cst_258 = arith.constant dense<0.000000e+00> : vector<10xf32>
    %607 = vector.multi_reduction <add>, %606, %cst_258 [1] : vector<10x10xf32> to vector<10xf32>
    %608 = vector.shape_cast %607 : vector<10xf32> to vector<10x1xf32>
    %609 = tpu.reciprocal %608 {approx = true} : vector<10x1xf32> -> vector<10x1xf32>
    %610 = vector.broadcast %609 : vector<10x1xf32> to vector<10x10xf32>
    %611 = arith.mulf %606, %610 : vector<10x10xf32>
    %cst_259 = arith.constant dense<0.000000e+00> : vector<10x8xf32>
    %612 = tpu.matmul %611, %597, %cst_259 {dimension_numbers = #tpu.dot_dimension_numbers<[1], [0], [0], [1], [0, 0, 1, 1], [], []>} : vector<10x10xf32>, vector<10x8xf32>, vector<10x8xf32> -> vector<10x8xf32>
    %613 = vector.extract_strided_slice %572 {offsets = [8, 0], sizes = [8, 16], strides = [1, 1]} : vector<16x16xf32> to vector<8x16xf32>
    %cst_260 = arith.constant dense<0.000000e+00> : vector<10x16xf32>
    %614 = tpu.matmul %612, %613, %cst_260 {dimension_numbers = #tpu.dot_dimension_numbers<[1], [0], [0], [1], [0, 0, 1, 1], [], []>} : vector<10x8xf32>, vector<8x16xf32>, vector<10x16xf32> -> vector<10x16xf32>
    %615 = arith.addf %594, %614 : vector<10x16xf32>
    %616 = vector.broadcast %574 : vector<1x16xf32> to vector<10x16xf32>
    %617 = arith.addf %615, %616 : vector<10x16xf32>
    %618 = arith.addf %560, %617 : vector<10x16xf32>
    %c3_261 = arith.constant 3 : index
    %c0_262 = arith.constant 0 : index
    %c0_263 = arith.constant 0 : index
    %619 = vector.load %arg15[%c3_261, %c0_262, %c0_263] : memref<4x1x16xf32, #tpu.memory_space<vmem>>, vector<1x1x16xf32>
    %620 = vector.shape_cast %619 : vector<1x1x16xf32> to vector<1x16xf32>
    %c3_264 = arith.constant 3 : index
    %c0_265 = arith.constant 0 : index
    %c0_266 = arith.constant 0 : index
    %621 = vector.load %arg14[%c3_264, %c0_265, %c0_266] : memref<4x1x16xf32, #tpu.memory_space<vmem>>, vector<1x1x16xf32>
    %622 = vector.shape_cast %621 : vector<1x1x16xf32> to vector<1x16xf32>
    %cst_267 = arith.constant dense<0.000000e+00> : vector<10xf32>
    %623 = vector.multi_reduction <add>, %618, %cst_267 [1] : vector<10x16xf32> to vector<10xf32>
    %624 = vector.shape_cast %623 : vector<10xf32> to vector<10x1xf32>
    %cst_268 = arith.constant 1.600000e+01 : f32
    %625 = vector.broadcast %cst_268 : f32 to vector<10x1xf32>
    %626 = arith.divf %624, %625 : vector<10x1xf32>
    %627 = vector.broadcast %626 : vector<10x1xf32> to vector<10x16xf32>
    %628 = arith.subf %618, %627 : vector<10x16xf32>
    %629 = arith.mulf %628, %628 : vector<10x16xf32>
    %cst_269 = arith.constant dense<0.000000e+00> : vector<10xf32>
    %630 = vector.multi_reduction <add>, %629, %cst_269 [1] : vector<10x16xf32> to vector<10xf32>
    %631 = vector.shape_cast %630 : vector<10xf32> to vector<10x1xf32>
    %cst_270 = arith.constant 1.600000e+01 : f32
    %632 = vector.broadcast %cst_270 : f32 to vector<10x1xf32>
    %633 = arith.divf %631, %632 : vector<10x1xf32>
    %634 = vector.broadcast %626 : vector<10x1xf32> to vector<10x16xf32>
    %635 = arith.subf %618, %634 : vector<10x16xf32>
    %cst_271 = arith.constant 9.99999974E-6 : f32
    %636 = vector.broadcast %cst_271 : f32 to vector<10x1xf32>
    %637 = arith.addf %633, %636 : vector<10x1xf32>
    %638 = math.rsqrt %637 : vector<10x1xf32>
    %639 = vector.broadcast %638 : vector<10x1xf32> to vector<10x16xf32>
    %640 = arith.mulf %635, %639 : vector<10x16xf32>
    %641 = vector.broadcast %620 : vector<1x16xf32> to vector<10x16xf32>
    %642 = arith.mulf %640, %641 : vector<10x16xf32>
    %643 = vector.broadcast %622 : vector<1x16xf32> to vector<10x16xf32>
    %644 = arith.addf %642, %643 : vector<10x16xf32>
    %c3_272 = arith.constant 3 : index
    %c0_273 = arith.constant 0 : index
    %c0_274 = arith.constant 0 : index
    %645 = vector.load %arg20[%c3_272, %c0_273, %c0_274] : memref<4x16x64xf32, #tpu.memory_space<vmem>>, vector<1x16x64xf32>
    %646 = vector.shape_cast %645 : vector<1x16x64xf32> to vector<16x64xf32>
    %cst_275 = arith.constant dense<0.000000e+00> : vector<10x64xf32>
    %647 = tpu.matmul %644, %646, %cst_275 {dimension_numbers = #tpu.dot_dimension_numbers<[1], [0], [0], [1], [0, 0, 1, 1], [], []>} : vector<10x16xf32>, vector<16x64xf32>, vector<10x64xf32> -> vector<10x64xf32>
    %c3_276 = arith.constant 3 : index
    %c0_277 = arith.constant 0 : index
    %c0_278 = arith.constant 0 : index
    %648 = vector.load %arg10[%c3_276, %c0_277, %c0_278] : memref<4x1x64xf32, #tpu.memory_space<vmem>>, vector<1x1x64xf32>
    %649 = vector.shape_cast %648 : vector<1x1x64xf32> to vector<1x64xf32>
    %650 = vector.broadcast %649 : vector<1x64xf32> to vector<10x64xf32>
    %651 = arith.addf %647, %650 : vector<10x64xf32>
    %cst_279 = arith.constant 0.000000e+00 : f32
    %652 = vector.broadcast %cst_279 : f32 to vector<10x64xf32>
    %653 = arith.maximumf %651, %652 : vector<10x64xf32>
    %c3_280 = arith.constant 3 : index
    %c0_281 = arith.constant 0 : index
    %c0_282 = arith.constant 0 : index
    %654 = vector.load %arg21[%c3_280, %c0_281, %c0_282] : memref<4x64x16xf32, #tpu.memory_space<vmem>>, vector<1x64x16xf32>
    %655 = vector.shape_cast %654 : vector<1x64x16xf32> to vector<64x16xf32>
    %cst_283 = arith.constant dense<0.000000e+00> : vector<10x16xf32>
    %656 = tpu.matmul %653, %655, %cst_283 {dimension_numbers = #tpu.dot_dimension_numbers<[1], [0], [0], [1], [0, 0, 1, 1], [], []>} : vector<10x64xf32>, vector<64x16xf32>, vector<10x16xf32> -> vector<10x16xf32>
    %c3_284 = arith.constant 3 : index
    %c0_285 = arith.constant 0 : index
    %c0_286 = arith.constant 0 : index
    %657 = vector.load %arg11[%c3_284, %c0_285, %c0_286] : memref<4x1x16xf32, #tpu.memory_space<vmem>>, vector<1x1x16xf32>
    %658 = vector.shape_cast %657 : vector<1x1x16xf32> to vector<1x16xf32>
    %659 = vector.broadcast %658 : vector<1x16xf32> to vector<10x16xf32>
    %660 = arith.addf %656, %659 : vector<10x16xf32>
    %661 = arith.addf %644, %660 : vector<10x16xf32>
    %c3_287 = arith.constant 3 : index
    %c0_288 = arith.constant 0 : index
    %c0_289 = arith.constant 0 : index
    %662 = vector.load %arg17[%c3_287, %c0_288, %c0_289] : memref<4x1x16xf32, #tpu.memory_space<vmem>>, vector<1x1x16xf32>
    %663 = vector.shape_cast %662 : vector<1x1x16xf32> to vector<1x16xf32>
    %c3_290 = arith.constant 3 : index
    %c0_291 = arith.constant 0 : index
    %c0_292 = arith.constant 0 : index
    %664 = vector.load %arg16[%c3_290, %c0_291, %c0_292] : memref<4x1x16xf32, #tpu.memory_space<vmem>>, vector<1x1x16xf32>
    %665 = vector.shape_cast %664 : vector<1x1x16xf32> to vector<1x16xf32>
    %cst_293 = arith.constant dense<0.000000e+00> : vector<10xf32>
    %666 = vector.multi_reduction <add>, %661, %cst_293 [1] : vector<10x16xf32> to vector<10xf32>
    %667 = vector.shape_cast %666 : vector<10xf32> to vector<10x1xf32>
    %cst_294 = arith.constant 1.600000e+01 : f32
    %668 = vector.broadcast %cst_294 : f32 to vector<10x1xf32>
    %669 = arith.divf %667, %668 : vector<10x1xf32>
    %670 = vector.broadcast %669 : vector<10x1xf32> to vector<10x16xf32>
    %671 = arith.subf %661, %670 : vector<10x16xf32>
    %672 = arith.mulf %671, %671 : vector<10x16xf32>
    %cst_295 = arith.constant dense<0.000000e+00> : vector<10xf32>
    %673 = vector.multi_reduction <add>, %672, %cst_295 [1] : vector<10x16xf32> to vector<10xf32>
    %674 = vector.shape_cast %673 : vector<10xf32> to vector<10x1xf32>
    %cst_296 = arith.constant 1.600000e+01 : f32
    %675 = vector.broadcast %cst_296 : f32 to vector<10x1xf32>
    %676 = arith.divf %674, %675 : vector<10x1xf32>
    %677 = vector.broadcast %669 : vector<10x1xf32> to vector<10x16xf32>
    %678 = arith.subf %661, %677 : vector<10x16xf32>
    %cst_297 = arith.constant 9.99999974E-6 : f32
    %679 = vector.broadcast %cst_297 : f32 to vector<10x1xf32>
    %680 = arith.addf %676, %679 : vector<10x1xf32>
    %681 = math.rsqrt %680 : vector<10x1xf32>
    %682 = vector.broadcast %681 : vector<10x1xf32> to vector<10x16xf32>
    %683 = arith.mulf %678, %682 : vector<10x16xf32>
    %684 = vector.broadcast %663 : vector<1x16xf32> to vector<10x16xf32>
    %685 = arith.mulf %683, %684 : vector<10x16xf32>
    %686 = vector.broadcast %665 : vector<1x16xf32> to vector<10x16xf32>
    %687 = arith.addf %685, %686 : vector<10x16xf32>
    %c0_298 = arith.constant 0 : index
    %c0_299 = arith.constant 0 : index
    %688 = vector.load %arg34[%c0_298, %c0_299] : memref<16x16xf32, #tpu.memory_space<vmem>>, vector<16x16xf32>
    %cst_300 = arith.constant dense<0.000000e+00> : vector<16x16xf32>
    %689 = tpu.matmul %429, %688, %cst_300 {dimension_numbers = #tpu.dot_dimension_numbers<[1], [0], [0], [1], [0, 0, 1, 1], [], []>} : vector<16x16xf32>, vector<16x16xf32>, vector<16x16xf32> -> vector<16x16xf32>
    %c0_301 = arith.constant 0 : index
    %c0_302 = arith.constant 0 : index
    %690 = vector.load %arg33[%c0_301, %c0_302] : memref<1x16xf32, #tpu.memory_space<vmem>>, vector<1x16xf32>
    %691 = vector.broadcast %690 : vector<1x16xf32> to vector<16x16xf32>
    %692 = arith.addf %689, %691 : vector<16x16xf32>
    %c0_303 = arith.constant 0 : index
    %c0_304 = arith.constant 0 : index
    %693 = vector.load %arg30[%c0_303, %c0_304] : memref<16x32xf32, #tpu.memory_space<vmem>>, vector<16x32xf32>
    %cst_305 = arith.constant dense<0.000000e+00> : vector<10x32xf32>
    %694 = tpu.matmul %687, %693, %cst_305 {dimension_numbers = #tpu.dot_dimension_numbers<[1], [0], [0], [1], [0, 0, 1, 1], [], []>} : vector<10x16xf32>, vector<16x32xf32>, vector<10x32xf32> -> vector<10x32xf32>
    %c0_306 = arith.constant 0 : index
    %c0_307 = arith.constant 0 : index
    %695 = vector.load %arg29[%c0_306, %c0_307] : memref<1x32xf32, #tpu.memory_space<vmem>>, vector<1x32xf32>
    %696 = vector.broadcast %695 : vector<1x32xf32> to vector<10x32xf32>
    %697 = arith.addf %694, %696 : vector<10x32xf32>
    %698 = vector.extract_strided_slice %697 {offsets = [0, 0], sizes = [10, 16], strides = [1, 1]} : vector<10x32xf32> to vector<10x16xf32>
    %699 = vector.extract_strided_slice %697 {offsets = [0, 16], sizes = [10, 16], strides = [1, 1]} : vector<10x32xf32> to vector<10x16xf32>
    %c0_308 = arith.constant 0 : index
    %c0_309 = arith.constant 0 : index
    %700 = vector.load %arg32[%c0_308, %c0_309] : memref<16x16xf32, #tpu.memory_space<vmem>>, vector<16x16xf32>
    %c0_310 = arith.constant 0 : index
    %c0_311 = arith.constant 0 : index
    %701 = vector.load %arg31[%c0_310, %c0_311] : memref<1x16xf32, #tpu.memory_space<vmem>>, vector<1x16xf32>
    %c0_312 = arith.constant 0 : index
    %c0_313 = arith.constant 0 : index
    %702 = vector.load %arg5[%c0_312, %c0_313] : memref<16x10xf32, #tpu.memory_space<vmem>>, vector<16x10xf32>
    %703 = vector.extract_strided_slice %692 {offsets = [0, 0], sizes = [16, 8], strides = [1, 1]} : vector<16x16xf32> to vector<16x8xf32>
    %704 = vector.extract_strided_slice %698 {offsets = [0, 0], sizes = [10, 8], strides = [1, 1]} : vector<10x16xf32> to vector<10x8xf32>
    %705 = vector.extract_strided_slice %699 {offsets = [0, 0], sizes = [10, 8], strides = [1, 1]} : vector<10x16xf32> to vector<10x8xf32>
    %cst_314 = arith.constant dense<0.000000e+00> : vector<16x10xf32>
    %706 = tpu.matmul %703, %704, %cst_314 {dimension_numbers = #tpu.dot_dimension_numbers<[1], [1], [0], [0], [0, 0, 1, 0], [], []>} : vector<16x8xf32>, vector<10x8xf32>, vector<16x10xf32> -> vector<16x10xf32>
    %cst_315 = arith.constant 0.353553385 : f32
    %707 = vector.broadcast %cst_315 : f32 to vector<16x10xf32>
    %708 = arith.mulf %706, %707 : vector<16x10xf32>
    %709 = arith.addf %708, %702 : vector<16x10xf32>
    %cst_316 = arith.constant dense<0xFF800000> : vector<16xf32>
    %710 = vector.multi_reduction <maximumf>, %709, %cst_316 [1] : vector<16x10xf32> to vector<16xf32>
    %711 = vector.shape_cast %710 : vector<16xf32> to vector<16x1xf32>
    %712 = vector.broadcast %711 : vector<16x1xf32> to vector<16x10xf32>
    %713 = arith.subf %709, %712 : vector<16x10xf32>
    %714 = math.exp %713 : vector<16x10xf32>
    %cst_317 = arith.constant dense<0.000000e+00> : vector<16xf32>
    %715 = vector.multi_reduction <add>, %714, %cst_317 [1] : vector<16x10xf32> to vector<16xf32>
    %716 = vector.shape_cast %715 : vector<16xf32> to vector<16x1xf32>
    %717 = tpu.reciprocal %716 {approx = true} : vector<16x1xf32> -> vector<16x1xf32>
    %718 = vector.broadcast %717 : vector<16x1xf32> to vector<16x10xf32>
    %719 = arith.mulf %714, %718 : vector<16x10xf32>
    %cst_318 = arith.constant dense<0.000000e+00> : vector<16x8xf32>
    %720 = tpu.matmul %719, %705, %cst_318 {dimension_numbers = #tpu.dot_dimension_numbers<[1], [0], [0], [1], [0, 0, 1, 1], [], []>} : vector<16x10xf32>, vector<10x8xf32>, vector<16x8xf32> -> vector<16x8xf32>
    %721 = vector.extract_strided_slice %700 {offsets = [0, 0], sizes = [8, 16], strides = [1, 1]} : vector<16x16xf32> to vector<8x16xf32>
    %cst_319 = arith.constant dense<0.000000e+00> : vector<16x16xf32>
    %722 = tpu.matmul %720, %721, %cst_319 {dimension_numbers = #tpu.dot_dimension_numbers<[1], [0], [0], [1], [0, 0, 1, 1], [], []>} : vector<16x8xf32>, vector<8x16xf32>, vector<16x16xf32> -> vector<16x16xf32>
    %723 = vector.extract_strided_slice %692 {offsets = [0, 8], sizes = [16, 8], strides = [1, 1]} : vector<16x16xf32> to vector<16x8xf32>
    %724 = vector.extract_strided_slice %698 {offsets = [0, 8], sizes = [10, 8], strides = [1, 1]} : vector<10x16xf32> to vector<10x8xf32>
    %725 = vector.extract_strided_slice %699 {offsets = [0, 8], sizes = [10, 8], strides = [1, 1]} : vector<10x16xf32> to vector<10x8xf32>
    %cst_320 = arith.constant dense<0.000000e+00> : vector<16x10xf32>
    %726 = tpu.matmul %723, %724, %cst_320 {dimension_numbers = #tpu.dot_dimension_numbers<[1], [1], [0], [0], [0, 0, 1, 0], [], []>} : vector<16x8xf32>, vector<10x8xf32>, vector<16x10xf32> -> vector<16x10xf32>
    %cst_321 = arith.constant 0.353553385 : f32
    %727 = vector.broadcast %cst_321 : f32 to vector<16x10xf32>
    %728 = arith.mulf %726, %727 : vector<16x10xf32>
    %729 = arith.addf %728, %702 : vector<16x10xf32>
    %cst_322 = arith.constant dense<0xFF800000> : vector<16xf32>
    %730 = vector.multi_reduction <maximumf>, %729, %cst_322 [1] : vector<16x10xf32> to vector<16xf32>
    %731 = vector.shape_cast %730 : vector<16xf32> to vector<16x1xf32>
    %732 = vector.broadcast %731 : vector<16x1xf32> to vector<16x10xf32>
    %733 = arith.subf %729, %732 : vector<16x10xf32>
    %734 = math.exp %733 : vector<16x10xf32>
    %cst_323 = arith.constant dense<0.000000e+00> : vector<16xf32>
    %735 = vector.multi_reduction <add>, %734, %cst_323 [1] : vector<16x10xf32> to vector<16xf32>
    %736 = vector.shape_cast %735 : vector<16xf32> to vector<16x1xf32>
    %737 = tpu.reciprocal %736 {approx = true} : vector<16x1xf32> -> vector<16x1xf32>
    %738 = vector.broadcast %737 : vector<16x1xf32> to vector<16x10xf32>
    %739 = arith.mulf %734, %738 : vector<16x10xf32>
    %cst_324 = arith.constant dense<0.000000e+00> : vector<16x8xf32>
    %740 = tpu.matmul %739, %725, %cst_324 {dimension_numbers = #tpu.dot_dimension_numbers<[1], [0], [0], [1], [0, 0, 1, 1], [], []>} : vector<16x10xf32>, vector<10x8xf32>, vector<16x8xf32> -> vector<16x8xf32>
    %741 = vector.extract_strided_slice %700 {offsets = [8, 0], sizes = [8, 16], strides = [1, 1]} : vector<16x16xf32> to vector<8x16xf32>
    %cst_325 = arith.constant dense<0.000000e+00> : vector<16x16xf32>
    %742 = tpu.matmul %740, %741, %cst_325 {dimension_numbers = #tpu.dot_dimension_numbers<[1], [0], [0], [1], [0, 0, 1, 1], [], []>} : vector<16x8xf32>, vector<8x16xf32>, vector<16x16xf32> -> vector<16x16xf32>
    %743 = arith.addf %722, %742 : vector<16x16xf32>
    %744 = vector.broadcast %701 : vector<1x16xf32> to vector<16x16xf32>
    %745 = arith.addf %743, %744 : vector<16x16xf32>
    %c0_326 = arith.constant 0 : index
    %c0_327 = arith.constant 0 : index
    %746 = vector.load %arg8[%c0_326, %c0_327] : memref<32x32xf32, #tpu.memory_space<vmem>>, vector<32x32xf32>
    %c0_328 = arith.constant 0 : index
    %c0_329 = arith.constant 0 : index
    %747 = vector.load %arg9[%c0_328, %c0_329] : memref<16x32xf32, #tpu.memory_space<vmem>>, vector<16x32xf32>
    %c0_330 = arith.constant 0 : index
    %c0_331 = arith.constant 0 : index
    %748 = vector.load %arg7[%c0_330, %c0_331] : memref<1x32xf32, #tpu.memory_space<vmem>>, vector<1x32xf32>
    %cst_332 = arith.constant dense<0.000000e+00> : vector<16x32xf32>
    %749 = tpu.matmul %169, %746, %cst_332 {dimension_numbers = #tpu.dot_dimension_numbers<[1], [0], [0], [1], [0, 0, 1, 1], [], []>} : vector<16x32xf32>, vector<32x32xf32>, vector<16x32xf32> -> vector<16x32xf32>
    %cst_333 = arith.constant dense<0.000000e+00> : vector<16x32xf32>
    %750 = tpu.matmul %745, %747, %cst_333 {dimension_numbers = #tpu.dot_dimension_numbers<[1], [0], [0], [1], [0, 0, 1, 1], [], []>} : vector<16x16xf32>, vector<16x32xf32>, vector<16x32xf32> -> vector<16x32xf32>
    %751 = vector.broadcast %748 : vector<1x32xf32> to vector<16x32xf32>
    %752 = arith.addf %750, %751 : vector<16x32xf32>
    %753 = vector.extract_strided_slice %752 {offsets = [0, 0], sizes = [8, 32], strides = [1, 1]} : vector<16x32xf32> to vector<8x32xf32>
    %754 = vector.extract_strided_slice %749 {offsets = [0, 0], sizes = [1, 32], strides = [1, 1]} : vector<16x32xf32> to vector<1x32xf32>
    %755 = vector.broadcast %754 : vector<1x32xf32> to vector<8x32xf32>
    %756 = arith.addf %755, %753 : vector<8x32xf32>
    %757 = vector.extract_strided_slice %749 {offsets = [2, 0], sizes = [1, 32], strides = [1, 1]} : vector<16x32xf32> to vector<1x32xf32>
    %758 = vector.broadcast %757 : vector<1x32xf32> to vector<8x32xf32>
    %759 = arith.addf %758, %753 : vector<8x32xf32>
    %760 = vector.extract_strided_slice %749 {offsets = [4, 0], sizes = [1, 32], strides = [1, 1]} : vector<16x32xf32> to vector<1x32xf32>
    %761 = vector.broadcast %760 : vector<1x32xf32> to vector<8x32xf32>
    %762 = arith.addf %761, %753 : vector<8x32xf32>
    %763 = vector.extract_strided_slice %749 {offsets = [6, 0], sizes = [1, 32], strides = [1, 1]} : vector<16x32xf32> to vector<1x32xf32>
    %764 = vector.broadcast %763 : vector<1x32xf32> to vector<8x32xf32>
    %765 = arith.addf %764, %753 : vector<8x32xf32>
    %766 = vector.extract_strided_slice %749 {offsets = [8, 0], sizes = [1, 32], strides = [1, 1]} : vector<16x32xf32> to vector<1x32xf32>
    %767 = vector.broadcast %766 : vector<1x32xf32> to vector<8x32xf32>
    %768 = arith.addf %767, %753 : vector<8x32xf32>
    %769 = vector.extract_strided_slice %749 {offsets = [10, 0], sizes = [1, 32], strides = [1, 1]} : vector<16x32xf32> to vector<1x32xf32>
    %770 = vector.broadcast %769 : vector<1x32xf32> to vector<8x32xf32>
    %771 = arith.addf %770, %753 : vector<8x32xf32>
    %772 = vector.extract_strided_slice %749 {offsets = [12, 0], sizes = [1, 32], strides = [1, 1]} : vector<16x32xf32> to vector<1x32xf32>
    %773 = vector.broadcast %772 : vector<1x32xf32> to vector<8x32xf32>
    %774 = arith.addf %773, %753 : vector<8x32xf32>
    %775 = vector.extract_strided_slice %749 {offsets = [14, 0], sizes = [1, 32], strides = [1, 1]} : vector<16x32xf32> to vector<1x32xf32>
    %776 = vector.broadcast %775 : vector<1x32xf32> to vector<8x32xf32>
    %777 = arith.addf %776, %753 : vector<8x32xf32>
    %778 = vector.extract_strided_slice %752 {offsets = [8, 0], sizes = [8, 32], strides = [1, 1]} : vector<16x32xf32> to vector<8x32xf32>
    %779 = vector.extract_strided_slice %749 {offsets = [1, 0], sizes = [1, 32], strides = [1, 1]} : vector<16x32xf32> to vector<1x32xf32>
    %780 = vector.broadcast %779 : vector<1x32xf32> to vector<8x32xf32>
    %781 = arith.addf %780, %778 : vector<8x32xf32>
    %782 = vector.extract_strided_slice %749 {offsets = [3, 0], sizes = [1, 32], strides = [1, 1]} : vector<16x32xf32> to vector<1x32xf32>
    %783 = vector.broadcast %782 : vector<1x32xf32> to vector<8x32xf32>
    %784 = arith.addf %783, %778 : vector<8x32xf32>
    %785 = vector.extract_strided_slice %749 {offsets = [5, 0], sizes = [1, 32], strides = [1, 1]} : vector<16x32xf32> to vector<1x32xf32>
    %786 = vector.broadcast %785 : vector<1x32xf32> to vector<8x32xf32>
    %787 = arith.addf %786, %778 : vector<8x32xf32>
    %788 = vector.extract_strided_slice %749 {offsets = [7, 0], sizes = [1, 32], strides = [1, 1]} : vector<16x32xf32> to vector<1x32xf32>
    %789 = vector.broadcast %788 : vector<1x32xf32> to vector<8x32xf32>
    %790 = arith.addf %789, %778 : vector<8x32xf32>
    %791 = vector.extract_strided_slice %749 {offsets = [9, 0], sizes = [1, 32], strides = [1, 1]} : vector<16x32xf32> to vector<1x32xf32>
    %792 = vector.broadcast %791 : vector<1x32xf32> to vector<8x32xf32>
    %793 = arith.addf %792, %778 : vector<8x32xf32>
    %794 = vector.extract_strided_slice %749 {offsets = [11, 0], sizes = [1, 32], strides = [1, 1]} : vector<16x32xf32> to vector<1x32xf32>
    %795 = vector.broadcast %794 : vector<1x32xf32> to vector<8x32xf32>
    %796 = arith.addf %795, %778 : vector<8x32xf32>
    %797 = vector.extract_strided_slice %749 {offsets = [13, 0], sizes = [1, 32], strides = [1, 1]} : vector<16x32xf32> to vector<1x32xf32>
    %798 = vector.broadcast %797 : vector<1x32xf32> to vector<8x32xf32>
    %799 = arith.addf %798, %778 : vector<8x32xf32>
    %800 = vector.extract_strided_slice %749 {offsets = [15, 0], sizes = [1, 32], strides = [1, 1]} : vector<16x32xf32> to vector<1x32xf32>
    %801 = vector.broadcast %800 : vector<1x32xf32> to vector<8x32xf32>
    %802 = arith.addf %801, %778 : vector<8x32xf32>
    %803 = tpu.concatenate %756, %759, %762, %765, %768, %771, %774, %777, %781, %784, %787, %790, %793, %796, %799, %802 in 0 : vector<8x32xf32>, vector<8x32xf32>, vector<8x32xf32>, vector<8x32xf32>, vector<8x32xf32>, vector<8x32xf32>, vector<8x32xf32>, vector<8x32xf32>, vector<8x32xf32>, vector<8x32xf32>, vector<8x32xf32>, vector<8x32xf32>, vector<8x32xf32>, vector<8x32xf32>, vector<8x32xf32>, vector<8x32xf32> -> vector<128x32xf32>
    %804 = math.tanh %803 : vector<128x32xf32>
    %c0_334 = arith.constant 0 : index
    %c0_335 = arith.constant 0 : index
    %805 = vector.load %arg26[%c0_334, %c0_335] : memref<32x128xf32, #tpu.memory_space<vmem>>, vector<32x128xf32>
    %cst_336 = arith.constant dense<0.000000e+00> : vector<128x128xf32>
    %806 = tpu.matmul %804, %805, %cst_336 {dimension_numbers = #tpu.dot_dimension_numbers<[1], [0], [0], [1], [0, 0, 1, 1], [], []>} : vector<128x32xf32>, vector<32x128xf32>, vector<128x128xf32> -> vector<128x128xf32>
    %c0_337 = arith.constant 0 : index
    %c0_338 = arith.constant 0 : index
    %807 = vector.load %arg25[%c0_337, %c0_338] : memref<1x128xf32, #tpu.memory_space<vmem>>, vector<1x128xf32>
    %808 = vector.broadcast %807 : vector<1x128xf32> to vector<128x128xf32>
    %809 = arith.addf %806, %808 : vector<128x128xf32>
    %c0_339 = arith.constant 0 : index
    %c0_340 = arith.constant 0 : index
    %810 = vector.load %arg35[%c0_339, %c0_340] : memref<128x128xf32, #tpu.memory_space<vmem>>, vector<128x128xf32>
    tpu.vector_store %arg35[%c0_339, %c0_340], %809 {strides = array<i32>} : memref<128x128xf32, #tpu.memory_space<vmem>>, vector<128x128xf32>,
    return
  }
}

</mosaic_0001>

<bundles_post_ra>
// kernel: transducer_forward.1
= control target key start
LH: loop header
LB: loop body
LE: loop exit
PB: predicated region body
PF: predicated region fallthrough
CT: control target
= control target key end

     0   :  { %v8139_v0 = vmov 0.0|0.0   ;;  %s8140_s3 = smov 24   ;;  %s8141_s7 = smov 23   ;;  %vm8142_vm0 = vmmov 0   ;;  %v8143_v1 = vmov 0.0   ;;  %vm161_vm1 = vcmask 130048   ;;  %s8983_s0 = inlined_call_operand.smem [shape: u32[36], index: -1, kind: input, shape index: {}] }
   0x1   :  { %7477 = vmatprep.subr.bf16.mxu1 %v8139_v0  ;;  %s6423_s6 = sld [smem:[%s8983_s0 + %s8140_s3]]   ;;  %6985 = vmatprep.mubr.msk.f32.mxu1 %vm8142_vm0, %v8143_v1  ;;  %s8144_s14 = smov 22   ;;  %vm346_vm2 = vcmask 254976   ;;  %vm243_vm3 = vcmask 261120   ;;  %vm1311_vm4 = vcmask 64512   ;;  %vm2036_vm6 = vcmask 523264  }
   0x2   :  { %s6422_s10 = sld [smem:[%s8983_s0 + %s8141_s7]]   ;;  %s8145_s18 = smov 32   ;;  %vm8363_vm5 = vmpackc.low %vm1311_vm4, %vm1311_vm4  ;;  %vm3408_vm7 = vcmask 74752   ;;  %vm3404_vm8 = vcmask 80896   ;;  %vm3439_vm9 = vcmask 1041408   ;;  %vm8171_vm10 = vmmov 1  }
   0x3   :  { %s1_s13 = sld [smem:[%s8983_s0]]   ;;  %s8146_s19 = smov 64   ;;  %vm8632_vm11 = vmpackc.low %vm3439_vm9, %vm8171_vm10  ;;  %vm3901_vm12 = vcmask 123904   ;;  %vm455_vm13 = vcmask 257026   ;;  %vm679_vm14 = vcmask 261126   ;;  %vm567_vm15 = vcmask 259076  }
   0x4   :  { %s6421_s17 = sld [smem:[%s8983_s0 + %s8144_s14]]   ;;  %s8147_s20 = smov 27  }
   0x5   :  { %s6426_s23 = sld [smem:[%s8983_s0 + %s8147_s20]]   ;;  %s8148_s24 = smov 1  }
   0x6   :  { %s6400_s27 = sld [smem:[%s8983_s0 + %s8148_s24]]   ;;  %s8149_s28 = smov 13  }
   0x7   :  { %v146_v2 = vld [vmem:[%s6423_s6] sm:$0xff]  ;;  %v147_v3 = vld [vmem:[%s6423_s6 + $0x8] sm:$0xff]  ;;  %s8328_s1 = sld [smem:[%s8983_s0 + %s8149_s28]]   ;;  %s8150_s2 = smov 28  }
   0x8   :  { %v148_v4 = vld [vmem:[%s6422_s10] sm:$0xff]  ;;  %v7473_v5 = vpack.c.bf16 %v147_v3, %v146_v2  ;;  %v149_v6 = vld [vmem:[%s6422_s10 + $0x8] sm:$0xff]  ;;  %v150_v9 = vld [vmem:[%s6422_s10 + $0x10] sm:$0xff]  ;;  %s6427_s5 = sld [smem:[%s8983_s0 + %s8150_s2]]   ;;  %s8151_s6 = smov 12  }
   0x9   :  { %v153_v7 = vld [vmem:[%s1_s13] sm:$0xff]  ;;  %v8201_v8 = vpack.c.bf16 %v149_v6, %v148_v4  ;;  %v151_v10 = vld [vmem:[%s6422_s10 + $0x18] sm:$0xff]  ;;  %v154_v11 = vld [vmem:[%s1_s13 + $0x8] sm:$0xff]  ;;  %s8351_s9 = sld [smem:[%s8983_s0 + %s8151_s6]]   ;;  %s8152_s10 = smov 112  }
   0xa   :  { %6974 = vmatprep.mubr.msk.f32.mxu0 %vm161_vm1, %v153_v7  ;;  %7474 = vmatprep.subr.bf16.mxu0 %v7473_v5  ;;  %v8205_v12 = vpack.c.bf16 %v151_v10, %v150_v9  ;;  %v6435_v13 = vld [vmem:[%s6421_s17] ss:$0 sm:$0xff]  ;;  %s8153_s11 = smov 3   ;;  %s8154_s15 = smov 104  }
   0xb   :  { %7479 = vmatpush3.bf16.msra.mxu1 %v8201_v8  ;;  %7476 = vmatpush3.bf16.msra.mxu0 %v7473_v5  ;;  %s6402_s14 = sld [smem:[%s8983_s0 + %s8153_s11]]   ;;  %s8155_s16 = smov 120  }
   0xc   :  { %7480 = vmatprep.subr.bf16.mxu1 %v8139_v0  ;;  %7483 = vmatprep.subr.bf16.mxu0 %v8139_v0  ;;  %s8156_s17 = smov 96   ;;  %s8157_s20 = smov 88  }
   0xd   :  { %s8158_s21 = smov 19   ;;  %s8159_s25 = smov 18  }
   0xe   :  { %6975 = vmatmul.mubr.msk.f32.vlgmr.msra.gmra.mrb[0].mxu0 %vm161_vm1, %v154_v11  ;;  %s8410_s24 = sld [smem:[%s8983_s0 + %s8158_s21]]   ;;  %s8160_s29 = smov 20  }
   0xf   :  { %7482 = vmatpush3.bf16.msra.mxu1 %v8205_v12  ;;  %7485 = vmatpush3.bf16.msra.mxu0 %v8201_v8  ;;  %s8423_s28 = sld [smem:[%s8983_s0 + %s8159_s25]]   ;;  %s8161_s4 = smov 21  }
  0x10   :  { %7486 = vmatprep.subr.bf16.mxu0 %v8139_v0  ;;  %6996 = vmatprep.mubr.msk.f32.mxu0 %vm8142_vm0, %v8143_v1  ;;  %s8435_s3 = sld [smem:[%s8983_s0 + %s8160_s29]]   ;;  %s8162_s8 = smov 15  }
  0x11   :  { %7489 = vmatprep.subr.bf16.mxu1 %v8139_v0  ;;  %s8442_s7 = sld [smem:[%s8983_s0 + %s8161_s4]]   ;;  %s8164_s25 = smov 10  }
  0x12   :  { %6986 = vmatmul.mubr.f32.vlgmr.msra.gmra.mrb[0].mxu1 %v8143_v1  ;;  %s8449_s13 = sld [smem:[%s8983_s0 + %s8162_s8]]   ;;  %s8165_s30 = smov 11  }
  0x13   :  { %7488 = vmatpush3.bf16.msra.mxu0 %v8205_v12  ;;  %7491 = vmatpush3.bf16.msra.mxu1 %v8201_v8  ;;  %s8469_s29 = sld [smem:[%s8983_s0 + %s8164_s25]]   ;;  %s8166_s6 = smov 17  }
  0x14   :  { %7492 = vmatprep.subr.bf16.mxu1 %v8139_v0  ;;  %7007 = vmatprep.mubr.msk.f32.mxu1 %vm8142_vm0, %v8143_v1  ;;  %s8489_s12 = sld [smem:[%s8983_s0 + %s8166_s6]]   ;;  %s8168_s26 = smov 6  }
  0x15   :  { %7495 = vmatprep.subr.bf16.mxu0 %v8139_v0  ;;  %s6405_s2 = sld [smem:[%s8983_s0 + %s8168_s26]]   ;;  %s8169_s4 = smov 2  }
  0x16   :  { %s6401_s11 = sld [smem:[%s8983_s0 + %s8169_s4]]   ;;  %s8178_s22 = smov 9  }
  0x17   :  { %7494 = vmatpush3.bf16.msra.mxu1 %v8205_v12  ;;  %s6431_s8 = sld [smem:[%s8983_s0 + %s8145_s18]]  }
  0x18   :  { %7501 = vmatprep.subr.bf16.mxu1 %v8139_v0 }
  0xe1   :  { %v6976_v14 = vpop.f32.mrb[0].mxu0 }
  0xe2   :  { %v8228_v15 = vadd.f32 %v6976_v14, %v6435_v13  ;;  %v234_v16 = vpop.f32.mrb[1].mxu0 }
  0xe3   :  { %v8230_v17 = vadd.f32 %v6435_v13, %v234_v16 }
  0xe5   :  { %v313_v18 = vpop.f32.mrb[0].mxu1 }
  0xe6   :  { %v317_v19 = vadd.f32 %v313_v18, %v8230_v17  ;;  %v6987_v20 = vpop.f32.mrb[1].mxu1 }
  0xe8   :  { %7931 = vtanh.f32 %v317_v19  ;;  %v6438_v22 = vmul.f32 -1.442695, %v317_v19 }
  0xea   :  { %7933 = vpow2.f32 %v6438_v22 }
  0xf2   :  { %v7932_v21 = vpop.eup %7931 }
  0xf3   :  { %327 = vrot.lane.b32.xlu0 %v7932_v21, %s8145_s18 }
  0xf4   :  { %v7934_v23 = vpop.eup %7933 }
  0xf5   :  { %v321_v24 = vadd.f32 1.0, %v7934_v23 }
  0xf7   :  { %7935 = vrcp.f32 %v321_v24 }
 0x101   :  { %v7936_v25 = vpop.eup %7935 }
 0x102   :  { %v325_v28 = vmul.f32 0.0, %v7936_v25 }
 0x165   :  { %v328_v26 = vpop.permute.xlu0 %327 }
 0x166   :  { %v330_v27 = vmul.f32 %v7936_v25, %v328_v26 }
 0x168   :  { %332 = vrot.lane.b32.xlu0 %v330_v27, %s8145_s18 }
 0x1da   :  { %v333_v29 = vpop.permute.xlu0 %332 }
 0x1db   :  { %v335_v30 = vadd.f32 %v333_v29, %v325_v28 }
 0x1dd   :  { %7937 = vtanh.f32 %v335_v30  ;;  %v432_v46 = vrot.slane %v335_v30, 6 }
 0x1e7   :  { %v7938_v31 = vpop.eup %7937 }
 0x1e8   :  { %338 = vrot.lane.b32.xlu1 %v7938_v31, %s8145_s18 }
 0x25a   :  { %v339_v32 = vpop.permute.xlu1 %338 }
 0x25b   :  { %v341_v33 = vmul.f32 %v7936_v25, %v339_v32 }
 0x25d   :  { %343 = vrot.lane.b32.xlu1 %v341_v33, %s8146_s19 }
 0x2cf   :  { %v344_v34 = vpop.permute.xlu1 %343 }
 0x2d0   :  { %347 = vst.msk [vmem:[#allocation2] sm:$0x3] %vm346_vm2, %v344_v34  ;;  %6997 = vmatmul.mubr.msk.f32.vlgmr.msra.gmra.mrb[2].mxu0 %vm243_vm3, %v344_v34 }
 0x2d1   :  { %7497 = vmatpush3.bf16.msra.mxu0 %v8201_v8  ;;  %7018 = vmatprep.mubr.msk.f32.mxu0 %vm8142_vm0, %v8143_v1 }
 0x2d2   :  { %7498 = vmatprep.subr.bf16.mxu0 %v8139_v0 }
 0x2d5   :  { %7500 = vmatpush3.bf16.msra.mxu0 %v8205_v12 }
 0x2d6   :  { %7507 = vmatprep.subr.bf16.mxu0 %v8139_v0 }
 0x3a3   :  { %v416_v35 = vpop.f32.mrb[2].mxu0 }
 0x3a4   :  { %v421_v36 = vrot.slane %v416_v35, 6  ;;  %v6998_v37 = vpop.f32.mrb[3].mxu0 }
 0x3a6   :  { %v423_v38 = vadd.f32 %v421_v36, %v8230_v17 }
 0x3a8   :  { %7939 = vtanh.f32 %v423_v38  ;;  %v6440_v40 = vmul.f32 -1.442695, %v423_v38 }
 0x3aa   :  { %7941 = vpow2.f32 %v6440_v40 }
 0x3b2   :  { %v7940_v39 = vpop.eup %7939 }
 0x3b3   :  { %436 = vrot.lane.b32.xlu0 %v7940_v39, %s8145_s18 }
 0x3b4   :  { %v7942_v41 = vpop.eup %7941 }
 0x3b5   :  { %v427_v42 = vadd.f32 1.0, %v7942_v41 }
 0x3b7   :  { %7943 = vrcp.f32 %v427_v42 }
 0x3c1   :  { %v7944_v43 = vpop.eup %7943 }
 0x3c2   :  { %v434_v47 = vmul.f32 %v7944_v43, %v432_v46 }
 0x425   :  { %v437_v44 = vpop.permute.xlu0 %436 }
 0x426   :  { %v439_v45 = vmul.f32 %v7944_v43, %v437_v44 }
 0x428   :  { %441 = vrot.lane.b32.xlu1 %v439_v45, %s8145_s18 }
 0x49a   :  { %v442_v48 = vpop.permute.xlu1 %441 }
 0x49b   :  { %v444_v49 = vadd.f32 %v442_v48, %v434_v47 }
 0x49d   :  { %7945 = vtanh.f32 %v444_v49  ;;  %v544_v4 = vrot.slane %v444_v49, 6 }
 0x4a7   :  { %v7946_v50 = vpop.eup %7945 }
 0x4a8   :  { %447 = vrot.lane.b32.xlu0 %v7946_v50, %s8145_s18 }
 0x51a   :  { %v448_v51 = vpop.permute.xlu0 %447 }
 0x51b   :  { %v8249_v52 = vmul.f32 %v7944_v43, %v448_v51 }
 0x51d   :  { %v457_v53 = vrot.slane %v8249_v52, 2 }
 0x51f   :  { %458 = vrot.lane.b32.xlu1 %v457_v53, %s8146_s19 }
 0x591   :  { %v459_v54 = vpop.permute.xlu1 %458 }
 0x592   :  { %7008 = vmatmul.mubr.msk.f32.vlgmr.msra.gmra.mrb[2].mxu1 %vm243_vm3, %v459_v54 }
 0x593   :  { %7503 = vmatpush3.bf16.msra.mxu1 %v8201_v8  ;;  %7029 = vmatprep.mubr.msk.f32.mxu1 %vm8142_vm0, %v8143_v1 }
 0x594   :  { %7504 = vmatprep.subr.bf16.mxu1 %v8139_v0 }
 0x597   :  { %7506 = vmatpush3.bf16.msra.mxu1 %v8205_v12 }
 0x598   :  { %7513 = vmatprep.subr.bf16.mxu1 %v8139_v0 }
 0x665   :  { %v528_v55 = vpop.f32.mrb[2].mxu1 }
 0x666   :  { %v533_v56 = vrot.slane %v528_v55, 4  ;;  %v7009_v57 = vpop.f32.mrb[3].mxu1 }
 0x668   :  { %v535_v58 = vadd.f32 %v533_v56, %v8230_v17 }
 0x66a   :  { %7947 = vtanh.f32 %v535_v58  ;;  %v6442_v60 = vmul.f32 -1.442695, %v535_v58 }
 0x66c   :  { %7949 = vpow2.f32 %v6442_v60 }
 0x674   :  { %v7948_v59 = vpop.eup %7947 }
 0x675   :  { %548 = vrot.lane.b32.xlu0 %v7948_v59, %s8145_s18 }
 0x676   :  { %v7950_v61 = vpop.eup %7949 }
 0x677   :  { %v539_v62 = vadd.f32 1.0, %v7950_v61 }
 0x679   :  { %7951 = vrcp.f32 %v539_v62 }
 0x683   :  { %v7952_v63 = vpop.eup %7951 }
 0x684   :  { %v546_v5 = vmul.f32 %v7952_v63, %v544_v4 }
 0x6e7   :  { %v549_v2 = vpop.permute.xlu0 %548 }
 0x6e8   :  { %v551_v3 = vmul.f32 %v7952_v63, %v549_v2 }
 0x6ea   :  { %553 = vrot.lane.b32.xlu1 %v551_v3, %s8145_s18 }
 0x75c   :  { %v554_v6 = vpop.permute.xlu1 %553 }
 0x75d   :  { %v556_v7 = vadd.f32 %v554_v6, %v546_v5 }
 0x75f   :  { %7953 = vtanh.f32 %v556_v7  ;;  %v656_v28 = vrot.slane %v556_v7, 6 }
 0x769   :  { %v7954_v9 = vpop.eup %7953 }
 0x76a   :  { %559 = vrot.lane.b32.xlu0 %v7954_v9, %s8145_s18 }
 0x7dc   :  { %v560_v10 = vpop.permute.xlu0 %559 }
 0x7dd   :  { %v8264_v11 = vmul.f32 %v7952_v63, %v560_v10 }
 0x7df   :  { %v569_v13 = vrot.slane %v8264_v11, 4 }
 0x7e1   :  { %570 = vrot.lane.b32.xlu1 %v569_v13, %s8146_s19 }
 0x853   :  { %v571_v14 = vpop.permute.xlu1 %570 }
 0x854   :  { %7019 = vmatmul.mubr.msk.f32.vlgmr.msra.gmra.mrb[4].mxu0 %vm243_vm3, %v571_v14 }
 0x855   :  { %7509 = vmatpush3.bf16.msra.mxu0 %v8201_v8  ;;  %7040 = vmatprep.mubr.msk.f32.mxu0 %vm8142_vm0, %v8143_v1 }
 0x856   :  { %7510 = vmatprep.subr.bf16.mxu0 %v8139_v0 }
 0x859   :  { %7512 = vmatpush3.bf16.msra.mxu0 %v8205_v12 }
 0x85a   :  { %7519 = vmatprep.subr.bf16.mxu0 %v8139_v0 }
 0x927   :  { %v640_v16 = vpop.f32.mrb[4].mxu0 }
 0x928   :  { %v645_v18 = vrot.slane %v640_v16, 2  ;;  %v7020_v19 = vpop.f32.mrb[5].mxu0 }
 0x92a   :  { %v647_v20 = vadd.f32 %v645_v18, %v8230_v17 }
 0x92c   :  { %7955 = vtanh.f32 %v647_v20  ;;  %v6444_v22 = vmul.f32 -1.442695, %v647_v20 }
 0x92e   :  { %7957 = vpow2.f32 %v6444_v22 }
 0x936   :  { %v7956_v21 = vpop.eup %7955 }
 0x937   :  { %660 = vrot.lane.b32.xlu0 %v7956_v21, %s8145_s18 }
 0x938   :  { %v7958_v23 = vpop.eup %7957 }
 0x939   :  { %v651_v24 = vadd.f32 1.0, %v7958_v23 }
 0x93b   :  { %7959 = vrcp.f32 %v651_v24 }
 0x945   :  { %v7960_v25 = vpop.eup %7959 }
 0x946   :  { %v658_v29 = vmul.f32 %v7960_v25, %v656_v28 }
 0x9a9   :  { %v661_v26 = vpop.permute.xlu0 %660 }
 0x9aa   :  { %v663_v27 = vmul.f32 %v7960_v25, %v661_v26  ;;  %v1124_v26 = vld [vmem:[%s6426_s23 + $0x8] sm:$0xff] }
 0x9ac   :  { %665 = vrot.lane.b32.xlu1 %v663_v27, %s8145_s18  ;;  %v1125_v27 = vld [vmem:[%s6426_s23 + $0x10] sm:$0xff] }
 0xa1e   :  { %v666_v30 = vpop.permute.xlu1 %665 }
 0xa1f   :  { %v668_v31 = vadd.f32 %v666_v30, %v658_v29  ;;  %v1126_v29 = vld [vmem:[%s6426_s23 + $0x18] sm:$0xff]  ;;  %v1121_v30 = vld [vmem:[%s6400_s27] sm:$0xff] }
 0xa21   :  { %7961 = vtanh.f32 %v668_v31  ;;  %v765_v46 = vrot.slane %v668_v31, 6  ;;  %v7529_v31 = vpack.c.bf16 %v1126_v29, %v1125_v27 }
 0xa2b   :  { %v7962_v17 = vpop.eup %7961 }
 0xa2c   :  { %671 = vrot.lane.b32.xlu0 %v7962_v17, %s8145_s18  ;;  %v1122_v17 = vld [vmem:[%s6400_s27 + $0x8] sm:$0xff] }
 0xa9e   :  { %v672_v32 = vpop.permute.xlu0 %671 }
 0xa9f   :  { %v8279_v33 = vmul.f32 %v7960_v25, %v672_v32  ;;  %v1123_v25 = vld [vmem:[%s6426_s23] sm:$0xff] }
 0xaa0   :  { %v7525_v28 = vpack.c.bf16 %v1124_v26, %v1123_v25 }
 0xaa1   :  { %v681_v34 = vrot.slane %v8279_v33, 6 }
 0xaa3   :  { %682 = vrot.lane.b32.xlu1 %v681_v34, %s8146_s19 }
 0xb15   :  { %v683_v35 = vpop.permute.xlu1 %682 }
 0xb16   :  { %7030 = vmatmul.mubr.msk.f32.vlgmr.msra.gmra.mrb[4].mxu1 %vm243_vm3, %v683_v35 }
 0xb17   :  { %7515 = vmatpush3.bf16.msra.mxu1 %v8201_v8  ;;  %7051 = vmatprep.mubr.msk.f32.mxu1 %vm8142_vm0, %v8143_v1 }
 0xb18   :  { %7516 = vmatprep.subr.bf16.mxu1 %v8139_v0 }
 0xb1b   :  { %7518 = vmatpush3.bf16.msra.mxu1 %v8205_v12 }
 0xb1c   :  { %7526 = vmatprep.subr.bf16.mxu1 %v7525_v28 }
 0xbe9   :  { %v752_v36 = vpop.f32.mrb[4].mxu1 }
 0xbea   :  { %v756_v37 = vadd.f32 %v752_v36, %v8228_v15  ;;  %v7031_v38 = vpop.f32.mrb[5].mxu1 }
 0xbec   :  { %7963 = vtanh.f32 %v756_v37  ;;  %v6446_v40 = vmul.f32 -1.442695, %v756_v37 }
 0xbee   :  { %7965 = vpow2.f32 %v6446_v40  ;;  %v1213_v40 = vld [vmem:[%s8328_s1 + $0x8] sm:$0xff] }
 0xbf6   :  { %v7964_v39 = vpop.eup %7963 }
 0xbf7   :  { %769 = vrot.lane.b32.xlu0 %v7964_v39, %s8145_s18  ;;  %v1212_v39 = vld [vmem:[%s8328_s1] sm:$0xff] }
 0xbf8   :  { %v7966_v41 = vpop.eup %7965 }
 0xbf9   :  { %v760_v42 = vadd.f32 1.0, %v7966_v41  ;;  %v7533_v41 = vpack.c.bf16 %v1213_v40, %v1212_v39 }
 0xbfb   :  { %7967 = vrcp.f32 %v760_v42 }
 0xc05   :  { %v7968_v43 = vpop.eup %7967 }
 0xc06   :  { %v767_v47 = vmul.f32 %v7968_v43, %v765_v46  ;;  %v1127_v46 = vld [vmem:[%s6427_s5] sm:$0xff] }
 0xc69   :  { %v770_v44 = vpop.permute.xlu0 %769 }
 0xc6a   :  { %v772_v45 = vmul.f32 %v7968_v43, %v770_v44 }
 0xc6c   :  { %774 = vrot.lane.b32.xlu1 %v772_v45, %s8145_s18 }
 0xcde   :  { %v775_v48 = vpop.permute.xlu1 %774 }
 0xcdf   :  { %v777_v49 = vadd.f32 %v775_v48, %v767_v47  ;;  %v1128_v48 = vld [vmem:[%s6427_s5 + $0x8] sm:$0xff]  ;;  %s8477_s5 = sld [smem:[%s8983_s0 + %s8165_s30]]  }
 0xce1   :  { %7969 = vtanh.f32 %v777_v49 }
 0xceb   :  { %v7970_v50 = vpop.eup %7969 }
 0xcec   :  { %780 = vrot.lane.b32.xlu0 %v7970_v50, %s8145_s18 }
 0xd5e   :  { %v781_v51 = vpop.permute.xlu0 %780 }
 0xd5f   :  { %v783_v53 = vmul.f32 %v7968_v43, %v781_v51 }
 0xd61   :  { %785 = vrot.lane.b32.xlu1 %v783_v53, %s8146_s19 }
 0xdd3   :  { %v786_v54 = vpop.permute.xlu1 %785 }
 0xdd4   :  { %788 = vst.msk [vmem:[#allocation2 + $0x8] sm:$0x3] %vm346_vm2, %v786_v54  ;;  %7041 = vmatmul.mubr.msk.f32.vlgmr.msra.gmra.mrb[6].mxu0 %vm243_vm3, %v786_v54  ;;  %v6455_v54 = vld [vmem:[%s8351_s9] ss:$0 sm:$0xff] }
 0xdd5   :  { %7521 = vmatpush3.bf16.msra.mxu0 %v8201_v8  ;;  %7062 = vmatprep.mubr.msk.f32.mxu0 %vm8142_vm0, %v8143_v1 }
 0xdd6   :  { %7522 = vmatprep.subr.bf16.mxu0 %v8139_v0  ;;  %v873_v0 = vrot.slane %v777_v49, 6 }
 0xdd9   :  { %7524 = vmatpush3.bf16.msra.mxu0 %v8205_v12 }
 0xdda   :  { %7534 = vmatprep.subr.bf16.mxu0 %v7533_v41 }
 0xea7   :  { %v857_v55 = vpop.f32.mrb[6].mxu0 }
 0xea8   :  { %v862_v56 = vrot.slane %v857_v55, 6  ;;  %v7042_v57 = vpop.f32.mrb[7].mxu0 }
 0xeaa   :  { %v864_v58 = vadd.f32 %v862_v56, %v8228_v15 }
 0xeac   :  { %7971 = vtanh.f32 %v864_v58  ;;  %v6448_v60 = vmul.f32 -1.442695, %v864_v58 }
 0xeae   :  { %7973 = vpow2.f32 %v6448_v60 }
 0xeb6   :  { %v7972_v59 = vpop.eup %7971 }
 0xeb7   :  { %877 = vrot.lane.b32.xlu0 %v7972_v59, %s8145_s18 }
 0xeb8   :  { %v7974_v61 = vpop.eup %7973 }
 0xeb9   :  { %v868_v8 = vadd.f32 1.0, %v7974_v61 }
 0xebb   :  { %7975 = vrcp.f32 %v868_v8 }
 0xec5   :  { %v7976_v62 = vpop.eup %7975 }
 0xec6   :  { %v875_v12 = vmul.f32 %v7976_v62, %v873_v0  ;;  %v8375_v0 = vld [vmem:[%s6402_s14 + $0x8] sm:$0xff] }
 0xf29   :  { %v878_v1 = vpop.permute.xlu0 %877 }
 0xf2a   :  { %v880_v63 = vmul.f32 %v7976_v62, %v878_v1 }
 0xf2c   :  { %882 = vrot.lane.b32.xlu1 %v880_v63, %s8145_s18 }
 0xf9e   :  { %v883_v2 = vpop.permute.xlu1 %882 }
 0xf9f   :  { %v885_v3 = vadd.f32 %v883_v2, %v875_v12 }
 0xfa1   :  { %7977 = vtanh.f32 %v885_v3  ;;  %v984_v32 = vrot.slane %v885_v3, 6  ;;  %v8377_v3 = vld [vmem:[%s6402_s14] sm:$0xff]  ;;  %s8163_s14 = smov 14  }
 0xfa2   :  { %s8454_s23 = sld [smem:[%s8983_s0 + %s8163_s14]]   ;;  %s8167_s14 = smov 16  }
 0xfa3   :  { %s8494_s25 = sld [smem:[%s8983_s0 + %s8167_s14]]   ;;  %s8170_s14 = smov 4  }
 0xfa4   :  { %s6403_s26 = sld [smem:[%s8983_s0 + %s8170_s14]]  }
 0xfab   :  { %v7978_v4 = vpop.eup %7977 }
 0xfac   :  { %888 = vrot.lane.b32.xlu0 %v7978_v4, %s8145_s18 }
0x101e   :  { %v889_v5 = vpop.permute.xlu0 %888 }
0x101f   :  { %v8305_v6 = vmul.f32 %v7976_v62, %v889_v5 }
0x1021   :  { %v897_v7 = vrot.slane %v8305_v6, 2 }
0x1023   :  { %898 = vrot.lane.b32.xlu1 %v897_v7, %s8146_s19 }
0x1095   :  { %v899_v9 = vpop.permute.xlu1 %898 }
0x1096   :  { %7052 = vmatmul.mubr.msk.f32.vlgmr.msra.gmra.mrb[6].mxu1 %vm243_vm3, %v899_v9 }
0x1097   :  { %7073 = vmatprep.mubr.msk.f32.mxu1 %vm243_vm3, %v1121_v30  ;;  %7528 = vmatpush3.bf16.msra.mxu1 %v7525_v28 }
0x1098   :  { %7530 = vmatprep.subr.bf16.mxu1 %v7529_v31 }
0x109b   :  { %7532 = vmatpush3.bf16.msra.mxu1 %v7529_v31 }
0x109e   :  { %7074 = vmatmul.mubr.msk.f32.vlgmr.msra.gmra.mrb[8].mxu1 %vm243_vm3, %v1122_v17 }
0x1169   :  { %v968_v10 = vpop.f32.mrb[6].mxu1 }
0x116a   :  { %v973_v13 = vrot.slane %v968_v10, 4  ;;  %v7053_v14 = vpop.f32.mrb[7].mxu1 }
0x116c   :  { %v975_v16 = vadd.f32 %v973_v13, %v8228_v15 }
0x116e   :  { %7979 = vtanh.f32 %v975_v16  ;;  %v6450_v19 = vmul.f32 -1.442695, %v975_v16 }
0x1170   :  { %7981 = vpow2.f32 %v6450_v19 }
0x1171   :  { %v7075_v38 = vpop.f32.mrb[8].mxu1 }
0x1172   :  { %v1201_v42 = vpop.f32.mrb[9].mxu1  ;;  %v8344_v50 = vadd.f32 %v7075_v38, %v1128_v48 }
0x1173   :  { %v8339_v47 = vadd.f32 %v1201_v42, %v1127_v46 }
0x1178   :  { %v7980_v18 = vpop.eup %7979 }
0x1179   :  { %988 = vrot.lane.b32.xlu0 %v7980_v18, %s8145_s18 }
0x117a   :  { %v7982_v20 = vpop.eup %7981 }
0x117b   :  { %v979_v21 = vadd.f32 1.0, %v7982_v20 }
0x117d   :  { %7983 = vrcp.f32 %v979_v21 }
0x1187   :  { %v7984_v22 = vpop.eup %7983 }
0x1188   :  { %v986_v34 = vmul.f32 %v7984_v22, %v984_v32 }
0x11eb   :  { %v989_v23 = vpop.permute.xlu0 %988 }
0x11ec   :  { %v991_v24 = vmul.f32 %v7984_v22, %v989_v23 }
0x11ee   :  { %993 = vrot.lane.b32.xlu1 %v991_v24, %s8145_s18 }
0x1260   :  { %v994_v35 = vpop.permute.xlu1 %993 }
0x1261   :  { %v8321_v36 = vadd.f32 %v994_v35, %v986_v34 }
0x1263   :  { %7985 = vtanh.f32 %v8321_v36 }
0x126d   :  { %v7986_v37 = vpop.eup %7985 }
0x126e   :  { %999 = vrot.lane.b32.xlu0 %v7986_v37, %s8145_s18 }
0x12e0   :  { %v1000_v43 = vpop.permute.xlu0 %999 }
0x12e1   :  { %v8332_v44 = vmul.f32 %v7984_v22, %v1000_v43 }
0x12e3   :  { %v1008_v45 = vrot.slane %v8332_v44, 4 }
0x12e5   :  { %1009 = vrot.lane.b32.xlu1 %v1008_v45, %s8146_s19 }
0x1357   :  { %v1010_v49 = vpop.permute.xlu1 %1009 }
0x1358   :  { %7063 = vmatmul.mubr.msk.f32.vlgmr.msra.gmra.mrb[8].mxu0 %vm243_vm3, %v1010_v49 }
0x1359   :  { %7536 = vmatpush3.bf16.msra.mxu0 %v7533_v41  ;;  %7080 = vmatprep.mubr.msk.f32.mxu0 %vm161_vm1, %v8339_v47 }
0x135c   :  { %7081 = vmatmul.mubr.msk.f32.vlgmr.msra.gmra.mrb[10].mxu0 %vm161_vm1, %v8344_v50 }
0x142b   :  { %v8353_v51 = vpop.f32.mrb[8].mxu0 }
0x142c   :  { %v7064_v53 = vpop.f32.mrb[9].mxu0 }
0x142f   :  { %v7082_v55 = vpop.f32.mrb[10].mxu0 }
0x1430   :  { %v1299_v56 = vadd.f32 %v7082_v55, %v6455_v54  ;;  %v1293_v57 = vpop.f32.mrb[11].mxu0 }
0x1431   :  { %v1294_v58 = vadd.f32 %v6455_v54, %v1293_v57 }
0x1433   :  { %7087 = vmatprep.mubr.msk.f32.mxu0 %vm1311_vm4, %v1294_v58  ;;  %v8357_v59 = vpack.i.bf16 %v1299_v56, %v1294_v58 }
0x1435   :  { %7837 = vrot.lane.b32.xlu0 %v8357_v59, %s8152_s10 }
0x14a7   :  { %v7838_v60 = vpop.permute.xlu0 %7837 }
0x14a8   :  { %v7840_v61 = vunpack.i.h.bf16 %v7838_v60  ;;  %v7839_v8 = vunpack.i.l.bf16 %v7838_v60 }
0x14aa   :  { %v7537_v1 = vpack.c.bf16 %v7840_v61, %v7839_v8 }
0x14ac   :  { %7539 = vmatprep.subr.msk.bf16.mxu0 %vm8363_vm5, %v7537_v1 }
0x14ad   :  { %7542 = vmatpush3.bf16.xpose.msk.msra.mxu0 %vm8363_vm5, %v7537_v1 }
0x14b4   :  { %7088 = vmatmul.mubr.msk.f32.vlgmr.msra.gmra.mrb[12].mxu0 %vm1311_vm4, %v1299_v56 }
0x1587   :  { %v7089_v63 = vpop.f32.mrb[12].mxu0 }
0x1588   :  { %v1396_v12 = vmul.f32 0.35355338, %v7089_v63  ;;  %v1386_v2 = vpop.f32.mrb[13].mxu0 }
0x1589   :  { %v1395_v4 = vmul.f32 0.35355338, %v1386_v2 }
0x158a   :  { %v1398_v5 = vadd.f32 %v1396_v12, %v8375_v0 }
0x158b   :  { %v1397_v7 = vadd.f32 %v1395_v4, %v8377_v3 }
0x158c   :  { %v1402_v9 = vsel %vm161_vm1, %v1398_v5, -inf }
0x158d   :  { %1403 = vmax.xlane.f32.xlu0 %v1402_v9  ;;  %v1399_v10 = vsel %vm161_vm1, %v1397_v7, -inf }
0x158e   :  { %1400 = vmax.xlane.f32.xlu1 %v1399_v10 }
0x161a   :  { %v1404_v13 = vpop.xlane.xlu0 %1403 }
0x161b   :  { %v1406_v14 = vsub.f32 %v1398_v5, %v1404_v13  ;;  %v1401_v16 = vpop.xlane.xlu1 %1400 }
0x161c   :  { %v1405_v18 = vsub.f32 %v1397_v7, %v1401_v16  ;;  %v1303_v16 = vld [vmem:[%s8410_s24 + $0x8] sm:$0xff] }
0x161d   :  { %v1409_v19 = vmul.f32 1.442695, %v1406_v14 }
0x161e   :  { %v1407_v20 = vmul.f32 1.442695, %v1405_v18 }
0x161f   :  { %7987 = vpow2.f32 %v1409_v19 }
0x1620   :  { %7989 = vpow2.f32 %v1407_v20 }
0x1629   :  { %v7988_v21 = vpop.eup %7987 }
0x162a   :  { %v7990_v22 = vpop.eup %7989  ;;  %v1414_v23 = vsel %vm161_vm1, %v7988_v21, 0.0 }
0x162b   :  { %1415 = vadd.xlane.f32.xlu1 %v1414_v23  ;;  %v1411_v24 = vsel %vm161_vm1, %v7990_v22, 0.0 }
0x162c   :  { %1412 = vadd.xlane.f32.xlu0 %v1411_v24  ;;  %v6474_v24 = vld [vmem:[%s8423_s28] ss:$0 sm:$0xff] }
0x163c   :  { %7847 = vrot.lane.b32.xlu1 %v8357_v59, %s8154_s15 }
0x1640   :  { %1508 = vrot.lane.b32.xlu1 %v1294_v58, %s8155_s16 }
0x1642   :  { %7842 = vrot.lane.b32.xlu0 %v8357_v59, %s8156_s17 }
0x1646   :  { %1510 = vrot.lane.b32.xlu0 %v1299_v56, %s8155_s16 }
0x16b8   :  { %v1416_v25 = vpop.xlane.xlu1 %1415 }
0x16b9   :  { %7991 = vrcp.f32 %v1416_v25  ;;  %v1413_v26 = vpop.xlane.xlu0 %1412 }
0x16ba   :  { %7993 = vrcp.f32 %v1413_v26 }
0x16bc   :  { %v7848_v27 = vpop.permute.xlu1 %7847 }
0x16bd   :  { %v7843_v28 = vpop.permute.xlu0 %7842  ;;  %v7850_v29 = vunpack.i.h.bf16 %v7848_v27  ;;  %v7849_v30 = vunpack.i.l.bf16 %v7848_v27 }
0x16be   :  { %v7845_v31 = vunpack.i.h.bf16 %v7843_v28  ;;  %v7844_v17 = vunpack.i.l.bf16 %v7843_v28 }
0x16bf   :  { %v7547_v34 = vpack.c.bf16 %v7850_v29, %v7849_v30 }
0x16c0   :  { %v7543_v32 = vpack.c.bf16 %v7845_v31, %v7844_v17  ;;  %v1509_v40 = vpop.permute.xlu1 %1508 }
0x16c1   :  { %v1511_v41 = vpop.permute.xlu0 %1510 }
0x16c2   :  { %7544 = vmatprep.subr.bf16.mxu1 %v7543_v32 }
0x16c3   :  { %v7992_v35 = vpop.eup %7991  ;;  %7546 = vmatpush3.bf16.msra.mxu1 %v7543_v32 }
0x16c4   :  { %v7994_v37 = vpop.eup %7993  ;;  %7549 = vmatprep.subr.msk.bf16.mxu1 %vm8363_vm5, %v7547_v34  ;;  %v1420_v39 = vmul.f32 %v7992_v35, %v7988_v21  ;;  %v1302_v21 = vld [vmem:[%s8410_s24] sm:$0xff] }
0x16c5   :  { %v1419_v38 = vmul.f32 %v7994_v37, %v7990_v22 }
0x16c7   :  { %7094 = vmatprep.mubr.msk.f32.mxu1 %vm161_vm1, %v1419_v38 }
0x16c8   :  { %7095 = vmatmul.mubr.msk.f32.vlgmr.msra.gmra.mrb[10].mxu1 %vm161_vm1, %v1420_v39 }
0x16c9   :  { %7101 = vmatprep.mubr.msk.f32.mxu1 %vm1311_vm4, %v1509_v40 }
0x16cc   :  { %7552 = vmatpush3.bf16.xpose.msk.msra.mxu1 %vm8363_vm5, %v7547_v34 }
0x16d3   :  { %7102 = vmatmul.mubr.msk.f32.vlgmr.msra.gmra.mrb[12].mxu1 %vm1311_vm4, %v1511_v41 }
0x179b   :  { %v7096_v42 = vpop.f32.mrb[10].mxu1 }
0x179c   :  { %v1499_v43 = vpop.f32.mrb[11].mxu1 }
0x17a6   :  { %v7103_v45 = vpop.f32.mrb[12].mxu1 }
0x17a7   :  { %v1600_v46 = vmul.f32 0.35355338, %v7103_v45  ;;  %v1590_v48 = vpop.f32.mrb[13].mxu1 }
0x17a8   :  { %v1599_v49 = vmul.f32 0.35355338, %v1590_v48  ;;  %v2022_v48 = vld [vmem:[%s8442_s7 + $0x8] sm:$0xff] }
0x17a9   :  { %v1602_v53 = vadd.f32 %v1600_v46, %v8375_v0  ;;  %v2021_v46 = vld [vmem:[%s8442_s7] sm:$0xff] }
0x17aa   :  { %v1601_v54 = vadd.f32 %v1599_v49, %v8377_v3  ;;  %v7561_v49 = vpack.c.bf16 %v2022_v48, %v2021_v46  ;;  %v6485_v48 = vld [vmem:[%s8328_s1 + $0x10] sm:$0xff] }
0x17ab   :  { %v1606_v55 = vsel %vm161_vm1, %v1602_v53, -inf }
0x17ac   :  { %1607 = vmax.xlane.f32.xlu0 %v1606_v55  ;;  %v1603_v56 = vsel %vm161_vm1, %v1601_v54, -inf }
0x17ad   :  { %1604 = vmax.xlane.f32.xlu1 %v1603_v56 }
0x1839   :  { %v1608_v57 = vpop.xlane.xlu0 %1607 }
0x183a   :  { %v1610_v58 = vsub.f32 %v1602_v53, %v1608_v57  ;;  %v1605_v60 = vpop.xlane.xlu1 %1604 }
0x183b   :  { %v1609_v61 = vsub.f32 %v1601_v54, %v1605_v60 }
0x183c   :  { %v1613_v8 = vmul.f32 1.442695, %v1610_v58 }
0x183d   :  { %v1611_v1 = vmul.f32 1.442695, %v1609_v61  ;;  %v6475_v61 = vld [vmem:[%s8449_s13] ss:$0 sm:$0xff] }
0x183e   :  { %7995 = vpow2.f32 %v1613_v8 }
0x183f   :  { %7997 = vpow2.f32 %v1611_v1  ;;  %v6476_v1 = vld [vmem:[%s8454_s23] ss:$0 sm:$0xff] }
0x1848   :  { %v7996_v63 = vpop.eup %7995 }
0x1849   :  { %v7998_v12 = vpop.eup %7997  ;;  %v1618_v2 = vsel %vm161_vm1, %v7996_v63, 0.0 }
0x184a   :  { %1619 = vadd.xlane.f32.xlu1 %v1618_v2  ;;  %v1615_v4 = vsel %vm161_vm1, %v7998_v12, 0.0 }
0x184b   :  { %1616 = vadd.xlane.f32.xlu0 %v1615_v4 }
0x1861   :  { %7852 = vrot.lane.b32.xlu0 %v8357_v59, %s8157_s20 }
0x18d7   :  { %v1620_v5 = vpop.xlane.xlu1 %1619 }
0x18d8   :  { %7999 = vrcp.f32 %v1620_v5  ;;  %v1617_v7 = vpop.xlane.xlu0 %1616  ;;  %v2023_v5 = vld [vmem:[%s8442_s7 + $0x10] sm:$0xff] }
0x18d9   :  { %8001 = vrcp.f32 %v1617_v7  ;;  %v2024_v7 = vld [vmem:[%s8442_s7 + $0x18] sm:$0xff] }
0x18dc   :  { %v7853_v9 = vpop.permute.xlu0 %7852 }
0x18dd   :  { %v7855_v10 = vunpack.i.h.bf16 %v7853_v9  ;;  %v7854_v13 = vunpack.i.l.bf16 %v7853_v9 }
0x18df   :  { %v7553_v14 = vpack.c.bf16 %v7855_v10, %v7854_v13  ;;  %v7565_v13 = vpack.c.bf16 %v2024_v7, %v2023_v5 }
0x18e1   :  { %7554 = vmatprep.subr.bf16.mxu0 %v7553_v14 }
0x18e2   :  { %v8000_v18 = vpop.eup %7999  ;;  %7556 = vmatpush3.bf16.msra.mxu0 %v7553_v14  ;;  %v2025_v14 = vld [vmem:[%s8442_s7 + $0x20] sm:$0xff] }
0x18e3   :  { %v8002_v59 = vpop.eup %8001  ;;  %7111 = vmatprep.subr.mxu0 %v1303_v16  ;;  %v1624_v20 = vmul.f32 %v8000_v18, %v7996_v63 }
0x18e4   :  { %v1623_v19 = vmul.f32 %v8002_v59, %v7998_v12  ;;  %v2027_v59 = vld [vmem:[%s8442_s7 + $0x30] sm:$0xff] }
0x18e6   :  { %7108 = vmatprep.mubr.msk.f32.mxu0 %vm161_vm1, %v1623_v19  ;;  %v2028_v19 = vld [vmem:[%s8442_s7 + $0x38] sm:$0xff] }
0x18e7   :  { %7109 = vmatmul.mubr.msk.f32.vlgmr.msra.gmra.mrb[14].mxu0 %vm161_vm1, %v1624_v20  ;;  %v7573_v20 = vpack.c.bf16 %v2028_v19, %v2027_v59 }
0x18e8   :  { %7112 = vmatpush3.msra.mxu0 %v1303_v16  ;;  %v2026_v16 = vld [vmem:[%s8442_s7 + $0x28] sm:$0xff] }
0x18e9   :  { %7116 = vmatprep.subr.mxu0 %v1302_v21  ;;  %v7569_v18 = vpack.c.bf16 %v2026_v16, %v2025_v14 }
0x19ba   :  { %v7110_v22 = vpop.f32.mrb[14].mxu0 }
0x19bb   :  { %v1703_v23 = vpop.f32.mrb[15].mxu0 }
0x19bc   :  { %7113 = vmatprep.mubr.msk.f32.mxu0 %vm1311_vm4, %v1703_v23 }
0x19bd   :  { %7114 = vmatmul.mubr.msk.f32.vlgmr.msra.gmra.mrb[16].mxu0 %vm1311_vm4, %v7110_v22 }
0x19be   :  { %7117 = vmatpush3.msra.mxu0 %v1302_v21  ;;  %7118 = vmatprep.mubr.msk.f32.mxu0 %vm1311_vm4, %v1499_v43  ;;  %v1930_v43 = vld [vmem:[%s8435_s3 + $0x8] sm:$0xff]  ;;  %v6477_v21 = vld [vmem:[%s8469_s29] ss:$0 sm:$0xff] }
0x19c5   :  { %7119 = vmatmul.mubr.msk.f32.vlgmr.msra.gmra.mrb[16].mxu0 %vm1311_vm4, %v7096_v42 }
0x1a98   :  { %v7120_v25 = vpop.f32.mrb[16].mxu0 }
0x1a99   :  { %v1865_v26 = vpop.f32.mrb[17].mxu0  ;;  %v1881_v27 = vadd.f32 %v7120_v25, %v6474_v24 }
0x1a9a   :  { %v1880_v28 = vadd.f32 %v6474_v24, %v1865_v26 }
0x1a9b   :  { %v1883_v31 = vadd.f32 %v1881_v27, %v8344_v50  ;;  %v1929_v50 = vld [vmem:[%s8435_s3] sm:$0xff] }
0x1a9c   :  { %v1882_v29 = vadd.f32 %v1880_v28, %v8339_v47  ;;  %v7557_v45 = vpack.c.bf16 %v1930_v43, %v1929_v50  ;;  %v6480_v28 = vld [vmem:[%s8477_s5] ss:$0 sm:$0xff] }
0x1a9d   :  { %v1889_v17 = vsel %vm161_vm1, %v1883_v31, 0.0 }
0x1a9e   :  { %v1886_v30 = vsel %vm161_vm1, %v1882_v29, 0.0  ;;  %7558 = vmatprep.subr.bf16.mxu1 %v7557_v45 }
0x1a9f   :  { %1887 = vadd.xlane.f32.xlu1 %v1886_v30  ;;  %7560 = vmatpush3.bf16.msra.mxu1 %v7557_v45 }
0x1aa0   :  { %7562 = vmatprep.subr.bf16.mxu1 %v7561_v49 }
0x1aa3   :  { %1890 = vadd.xlane.f32.xlu1 %v1889_v17 }
0x1b2c   :  { %v1888_v32 = vpop.xlane.xlu1 %1887 }
0x1b2d   :  { %v1893_v34 = vmul.f32 0.0625, %v1888_v32 }
0x1b2f   :  { %v1895_v35 = vsub.f32 %v1882_v29, %v1893_v34 }
0x1b30   :  { %v1891_v37 = vpop.xlane.xlu1 %1890 }
0x1b31   :  { %v1894_v38 = vmul.f32 0.0625, %v1891_v37  ;;  %v1897_v39 = vmul.f32 %v1895_v35, %v1895_v35 }
0x1b33   :  { %v1896_v40 = vsub.f32 %v1883_v31, %v1894_v38  ;;  %v1899_v41 = vsel %vm161_vm1, %v1897_v39, 0.0 }
0x1b34   :  { %1900 = vadd.xlane.f32.xlu1 %v1899_v41 }
0x1b35   :  { %v1898_v42 = vmul.f32 %v1896_v40, %v1896_v40 }
0x1b37   :  { %v1902_v47 = vsel %vm161_vm1, %v1898_v42, 0.0 }
0x1b38   :  { %1903 = vadd.xlane.f32.xlu1 %v1902_v47 }
0x1bc1   :  { %v1901_v53 = vpop.xlane.xlu1 %1900 }
0x1bc2   :  { %v1905_v54 = vmul.f32 0.0625, %v1901_v53 }
0x1bc4   :  { %v1907_v55 = vadd.f32 1e-05, %v1905_v54 }
0x1bc5   :  { %v1904_v56 = vpop.xlane.xlu1 %1903 }
0x1bc6   :  { %8003 = vrsqrt.f32 %v1907_v55  ;;  %v1906_v57 = vmul.f32 0.0625, %v1904_v56 }
0x1bc8   :  { %v1908_v58 = vadd.f32 1e-05, %v1906_v57 }
0x1bca   :  { %8005 = vrsqrt.f32 %v1908_v58 }
0x1bd0   :  { %v8004_v60 = vpop.eup %8003 }
0x1bd1   :  { %v1911_v8 = vmul.f32 %v8004_v60, %v1895_v35 }
0x1bd3   :  { %v1919_v63 = vmul.f32 %v6475_v61, %v1911_v8  ;;  %v6483_v8 = vld [vmem:[%s8489_s12] ss:$0 sm:$0xff] }
0x1bd4   :  { %v8006_v12 = vpop.eup %8005 }
0x1bd5   :  { %v1912_v2 = vmul.f32 %v8006_v12, %v1896_v40  ;;  %v1927_v4 = vadd.f32 %v6476_v1, %v1919_v63  ;;  %v6484_v63 = vld [vmem:[%s8494_s25] ss:$0 sm:$0xff] }
0x1bd7   :  { %v1920_v9 = vmul.f32 %v6475_v61, %v1912_v2  ;;  %7125 = vmatprep.mubr.msk.f32.mxu1 %vm161_vm1, %v1927_v4 }
0x1bd9   :  { %v1928_v10 = vadd.f32 %v6476_v1, %v1920_v9 }
0x1bdb   :  { %7126 = vmatmul.mubr.msk.f32.vlgmr.msra.gmra.mrb[14].mxu1 %vm161_vm1, %v1928_v10 }
0x1bdc   :  { %7564 = vmatpush3.bf16.msra.mxu1 %v7561_v49  ;;  %v6486_v49 = vld [vmem:[%s8328_s1 + $0x18] sm:$0xff] }
0x1bdd   :  { %7566 = vmatprep.subr.bf16.mxu1 %v7565_v13  ;;  %v7577_v53 = vpack.c.bf16 %v6486_v49, %v6485_v48 }
0x1bdf   :  { %7578 = vmatprep.subr.bf16.mxu0 %v7577_v53 }
0x1be0   :  { %7568 = vmatpush3.bf16.msra.mxu1 %v7565_v13  ;;  %7580 = vmatpush3.bf16.msra.mxu0 %v7577_v53 }
0x1be1   :  { %7570 = vmatprep.subr.bf16.mxu1 %v7569_v18 }
0x1be4   :  { %7572 = vmatpush3.bf16.msra.mxu1 %v7569_v18 }
0x1be5   :  { %7574 = vmatprep.subr.bf16.mxu1 %v7573_v20 }
0x1be8   :  { %7576 = vmatpush3.bf16.msra.mxu1 %v7573_v20 }
0x1cae   :  { %v7127_v22 = vpop.f32.mrb[14].mxu1 }
0x1caf   :  { %v2016_v23 = vadd.f32 %v7127_v22, %v6477_v21  ;;  %v2010_v24 = vpop.f32.mrb[15].mxu1 }
0x1cb0   :  { %v2011_v25 = vadd.f32 %v6477_v21, %v2010_v24 }
0x1cb1   :  { %v2020_v27 = vmax.f32 %v2016_v23, 0.0 }
0x1cb2   :  { %v2019_v26 = vmax.f32 %v2011_v25, 0.0 }
0x1cb4   :  { %7144 = vmatprep.mubr.msk.f32.mxu1 %vm2036_vm6, %v2019_v26 }
0x1cb5   :  { %7145 = vmatmul.mubr.msk.f32.vlgmr.msra.gmra.mrb[16].mxu1 %vm2036_vm6, %v2020_v27 }
0x1d88   :  { %v7146_v29 = vpop.f32.mrb[16].mxu1 }
0x1d89   :  { %v2109_v30 = vpop.f32.mrb[17].mxu1  ;;  %v2115_v31 = vadd.f32 %v7146_v29, %v6480_v28 }
0x1d8a   :  { %v2110_v17 = vadd.f32 %v6480_v28, %v2109_v30 }
0x1d8b   :  { %v2119_v35 = vadd.f32 %v2115_v31, %v1928_v10  ;;  %v6488_v10 = vld [vmem:[%s8351_s9 + $0x1] ss:$0 sm:$0xff] }
0x1d8c   :  { %v2118_v32 = vadd.f32 %v2110_v17, %v1927_v4 }
0x1d8d   :  { %v2125_v37 = vsel %vm161_vm1, %v2119_v35, 0.0 }
0x1d8e   :  { %v2122_v34 = vsel %vm161_vm1, %v2118_v32, 0.0 }
0x1d8f   :  { %2123 = vadd.xlane.f32.xlu1 %v2122_v34 }
0x1d93   :  { %2126 = vadd.xlane.f32.xlu1 %v2125_v37 }
0x1e1c   :  { %v2124_v38 = vpop.xlane.xlu1 %2123 }
0x1e1d   :  { %v2128_v39 = vmul.f32 0.0625, %v2124_v38 }
0x1e1f   :  { %v2130_v40 = vsub.f32 %v2118_v32, %v2128_v39 }
0x1e20   :  { %v2127_v41 = vpop.xlane.xlu1 %2126 }
0x1e21   :  { %v2129_v42 = vmul.f32 0.0625, %v2127_v41  ;;  %v2132_v47 = vmul.f32 %v2130_v40, %v2130_v40 }
0x1e23   :  { %v2131_v50 = vsub.f32 %v2119_v35, %v2129_v42  ;;  %v2134_v43 = vsel %vm161_vm1, %v2132_v47, 0.0 }
0x1e24   :  { %2135 = vadd.xlane.f32.xlu0 %v2134_v43 }
0x1e25   :  { %v2133_v45 = vmul.f32 %v2131_v50, %v2131_v50 }
0x1e27   :  { %v2137_v46 = vsel %vm161_vm1, %v2133_v45, 0.0 }
0x1e28   :  { %2138 = vadd.xlane.f32.xlu1 %v2137_v46 }
0x1eb1   :  { %v2136_v54 = vpop.xlane.xlu0 %2135 }
0x1eb2   :  { %v2140_v55 = vmul.f32 0.0625, %v2136_v54 }
0x1eb4   :  { %v2142_v56 = vadd.f32 1e-05, %v2140_v55 }
0x1eb5   :  { %v2139_v57 = vpop.xlane.xlu1 %2138 }
0x1eb6   :  { %8007 = vrsqrt.f32 %v2142_v56  ;;  %v2141_v58 = vmul.f32 0.0625, %v2139_v57 }
0x1eb8   :  { %v2143_v60 = vadd.f32 1e-05, %v2141_v58 }
0x1eba   :  { %8009 = vrsqrt.f32 %v2143_v60 }
0x1ec0   :  { %v8008_v61 = vpop.eup %8007 }
0x1ec1   :  { %v2146_v1 = vmul.f32 %v8008_v61, %v2130_v40 }
0x1ec3   :  { %v2154_v12 = vmul.f32 %v6483_v8, %v2146_v1 }
0x1ec4   :  { %v8010_v2 = vpop.eup %8009 }
0x1ec5   :  { %v2147_v4 = vmul.f32 %v8010_v2, %v2131_v50  ;;  %v8498_v5 = vadd.f32 %v6484_v63, %v2154_v12 }
0x1ec7   :  { %v2155_v7 = vmul.f32 %v6483_v8, %v2147_v4  ;;  %7151 = vmatprep.mubr.msk.f32.mxu0 %vm161_vm1, %v8498_v5 }
0x1ec9   :  { %v8502_v9 = vadd.f32 %v6484_v63, %v2155_v7 }
0x1ecb   :  { %7152 = vmatmul.mubr.msk.f32.vlgmr.msra.gmra.mrb[18].mxu0 %vm161_vm1, %v8502_v9 }
0x1f9e   :  { %v7153_v13 = vpop.f32.mrb[18].mxu0 }
0x1f9f   :  { %v2253_v14 = vadd.f32 %v7153_v13, %v6488_v10  ;;  %v2247_v16 = vpop.f32.mrb[19].mxu0 }
0x1fa0   :  { %v2248_v18 = vadd.f32 %v6488_v10, %v2247_v16 }
0x1fa1   :  { %2465 = vrot.lane.b32.xlu0 %v2253_v14, %s8155_s16 }
0x1fa2   :  { %7158 = vmatprep.mubr.msk.f32.mxu0 %vm1311_vm4, %v2248_v18  ;;  %v8509_v59 = vpack.i.bf16 %v2253_v14, %v2248_v18 }
0x1fa4   :  { %7857 = vrot.lane.b32.xlu1 %v8509_v59, %s8152_s10 }
0x1fa8   :  { %7862 = vrot.lane.b32.xlu1 %v8509_v59, %s8154_s15 }
0x1fac   :  { %2463 = vrot.lane.b32.xlu1 %v2248_v18, %s8155_s16 }
0x2013   :  { %v2466_v28 = vpop.permute.xlu0 %2465 }
0x2016   :  { %v7858_v19 = vpop.permute.xlu1 %7857 }
0x2017   :  { %v7860_v20 = vunpack.i.h.bf16 %v7858_v19  ;;  %v7859_v21 = vunpack.i.l.bf16 %v7858_v19 }
0x2019   :  { %v7581_v22 = vpack.c.bf16 %v7860_v20, %v7859_v21 }
0x201a   :  { %v7863_v23 = vpop.permute.xlu1 %7862 }
0x201b   :  { %v7865_v24 = vunpack.i.h.bf16 %v7863_v23  ;;  %v7864_v25 = vunpack.i.l.bf16 %v7863_v23  ;;  %7583 = vmatprep.subr.msk.bf16.mxu0 %vm8363_vm5, %v7581_v22 }
0x201c   :  { %7586 = vmatpush3.bf16.xpose.msk.msra.mxu0 %vm8363_vm5, %v7581_v22 }
0x201d   :  { %v7591_v26 = vpack.c.bf16 %v7865_v24, %v7864_v25 }
0x201e   :  { %v2464_v27 = vpop.permute.xlu1 %2463 }
0x201f   :  { %7593 = vmatprep.subr.msk.bf16.mxu1 %vm8363_vm5, %v7591_v26  ;;  %7172 = vmatprep.mubr.msk.f32.mxu1 %vm1311_vm4, %v2464_v27 }
0x2020   :  { %7596 = vmatpush3.bf16.xpose.msk.msra.mxu1 %vm8363_vm5, %v7591_v26 }
0x2023   :  { %7159 = vmatmul.mubr.msk.f32.vlgmr.msra.gmra.mrb[20].mxu0 %vm1311_vm4, %v2253_v14 }
0x2027   :  { %7173 = vmatmul.mubr.msk.f32.vlgmr.msra.gmra.mrb[18].mxu1 %vm1311_vm4, %v2466_v28 }
0x20f6   :  { %v7160_v29 = vpop.f32.mrb[20].mxu0 }
0x20f7   :  { %v2351_v30 = vmul.f32 0.35355338, %v7160_v29  ;;  %v2341_v31 = vpop.f32.mrb[21].mxu0 }
0x20f8   :  { %v2350_v17 = vmul.f32 0.35355338, %v2341_v31 }
0x20f9   :  { %v2353_v32 = vadd.f32 %v2351_v30, %v8375_v0 }
0x20fa   :  { %v7174_v34 = vpop.f32.mrb[18].mxu1  ;;  %v2352_v35 = vadd.f32 %v2350_v17, %v8377_v3  ;;  %v6492_v17 = vld [vmem:[%s8410_s24 + $0x18] sm:$0xff] }
0x20fb   :  { %v2545_v37 = vpop.f32.mrb[19].mxu1  ;;  %v2357_v38 = vsel %vm161_vm1, %v2353_v32, -inf  ;;  %v2555_v39 = vmul.f32 0.35355338, %v7174_v34 }
0x20fc   :  { %v2554_v40 = vmul.f32 0.35355338, %v2545_v37  ;;  %2358 = vmax.xlane.f32.xlu0 %v2357_v38  ;;  %v2354_v41 = vsel %vm161_vm1, %v2352_v35, -inf  ;;  %v3127_v37 = vld [vmem:[%s6405_s2] sm:$0xff]  ;;  %v3128_v38 = vld [vmem:[%s6405_s2 + $0x8] sm:$0xff] }
0x20fd   :  { %2355 = vmax.xlane.f32.xlu1 %v2354_v41  ;;  %v2557_v50 = vadd.f32 %v2555_v39, %v8375_v0  ;;  %v7621_v41 = vpack.c.bf16 %v3128_v38, %v3127_v37 }
0x20fe   :  { %v2556_v42 = vadd.f32 %v2554_v40, %v8377_v3 }
0x20ff   :  { %v2561_v43 = vsel %vm161_vm1, %v2557_v50, -inf }
0x2100   :  { %v2558_v47 = vsel %vm161_vm1, %v2556_v42, -inf }
0x2101   :  { %2559 = vmax.xlane.f32.xlu1 %v2558_v47  ;;  %v3130_v47 = vld [vmem:[%s6405_s2 + $0x18] sm:$0xff] }
0x2105   :  { %2562 = vmax.xlane.f32.xlu1 %v2561_v43  ;;  %v3125_v43 = vld [vmem:[%s6401_s11] sm:$0xff] }
0x2189   :  { %v2359_v45 = vpop.xlane.xlu0 %2358 }
0x218a   :  { %v2361_v46 = vsub.f32 %v2353_v32, %v2359_v45  ;;  %v2356_v48 = vpop.xlane.xlu1 %2355  ;;  %v6491_v32 = vld [vmem:[%s8410_s24 + $0x10] sm:$0xff]  ;;  %v3126_v45 = vld [vmem:[%s6401_s11 + $0x8] sm:$0x3]  ;;  %s8177_s11 = smov 8  }
0x218b   :  { %v2360_v55 = vsub.f32 %v2352_v35, %v2356_v48  ;;  %v6540_v48 = vld [vmem:[%s8328_s1 + $0x28] sm:$0xff]  ;;  %s6407_s21 = sld [smem:[%s8983_s0 + %s8177_s11]]  }
0x218c   :  { %v2364_v49 = vmul.f32 1.442695, %v2361_v46  ;;  %v6539_v46 = vld [vmem:[%s8328_s1 + $0x20] sm:$0xff] }
0x218d   :  { %v2362_v58 = vmul.f32 1.442695, %v2360_v55 }
0x218e   :  { %8011 = vpow2.f32 %v2364_v49  ;;  %v2560_v53 = vpop.xlane.xlu1 %2559  ;;  %v7629_v49 = vpack.c.bf16 %v6540_v48, %v6539_v46 }
0x218f   :  { %v2564_v54 = vsub.f32 %v2556_v42, %v2560_v53  ;;  %v3129_v42 = vld [vmem:[%s6405_s2 + $0x10] sm:$0xff]  ;;  %v6510_v53 = vld [vmem:[%s8423_s28 + $0x1] ss:$0 sm:$0xff]  ;;  %s8176_s2 = smov 5  }
0x2190   :  { %s6404_s6 = sld [smem:[%s8983_s0 + %s8176_s2]]  }
0x2191   :  { %v2566_v56 = vmul.f32 1.442695, %v2564_v54 }
0x2192   :  { %v2563_v57 = vpop.xlane.xlu1 %2562 }
0x2193   :  { %8013 = vpow2.f32 %v2566_v56  ;;  %v2565_v3 = vsub.f32 %v2557_v50, %v2563_v57  ;;  %v7625_v50 = vpack.c.bf16 %v3130_v47, %v3129_v42  ;;  %v8606_v42 = vld [vmem:[%s6403_s26] sm:$0xff] }
0x2195   :  { %v2568_v60 = vmul.f32 1.442695, %v2565_v3 }
0x2197   :  { %8015 = vpow2.f32 %v2568_v60 }
0x2198   :  { %v8012_v0 = vpop.eup %8011  ;;  %8017 = vpow2.f32 %v2362_v58 }
0x2199   :  { %v2369_v61 = vsel %vm161_vm1, %v8012_v0, 0.0 }
0x219a   :  { %2370 = vadd.xlane.f32.xlu1 %v2369_v61  ;;  %v6542_v61 = vld [vmem:[%s8351_s9 + $0x2] ss:$0 sm:$0xff] }
0x219d   :  { %v8014_v8 = vpop.eup %8013 }
0x219e   :  { %v2570_v1 = vsel %vm161_vm1, %v8014_v8, 0.0 }
0x219f   :  { %2571 = vadd.xlane.f32.xlu0 %v2570_v1 }
0x21a1   :  { %v8016_v63 = vpop.eup %8015 }
0x21a2   :  { %v2573_v12 = vsel %vm161_vm1, %v8016_v63, 0.0  ;;  %v8018_v2 = vpop.eup %8017 }
0x21a3   :  { %2574 = vadd.xlane.f32.xlu1 %v2573_v12  ;;  %v2366_v4 = vsel %vm161_vm1, %v8018_v2, 0.0 }
0x21a7   :  { %2367 = vadd.xlane.f32.xlu1 %v2366_v4 }
0x21b5   :  { %7867 = vrot.lane.b32.xlu0 %v8509_v59, %s8156_s17 }
0x21b8   :  { %7872 = vrot.lane.b32.xlu1 %v8509_v59, %s8157_s20 }
0x2227   :  { %v2371_v7 = vpop.xlane.xlu1 %2370 }
0x2228   :  { %8019 = vrcp.f32 %v2371_v7 }
0x222c   :  { %v2572_v10 = vpop.xlane.xlu0 %2571 }
0x222d   :  { %8021 = vrcp.f32 %v2572_v10 }
0x2230   :  { %v7868_v13 = vpop.permute.xlu0 %7867  ;;  %v2575_v14 = vpop.xlane.xlu1 %2574 }
0x2231   :  { %v7870_v16 = vunpack.i.h.bf16 %v7868_v13  ;;  %v7869_v18 = vunpack.i.l.bf16 %v7868_v13 }
0x2232   :  { %v8020_v59 = vpop.eup %8019 }
0x2233   :  { %v7587_v19 = vpack.c.bf16 %v7870_v16, %v7869_v18  ;;  %v2375_v28 = vmul.f32 %v8020_v59, %v8012_v0 }
0x2234   :  { %v2368_v20 = vpop.xlane.xlu1 %2367 }
0x2235   :  { %8023 = vrcp.f32 %v2368_v20  ;;  %7588 = vmatprep.subr.bf16.mxu0 %v7587_v19 }
0x2236   :  { %7590 = vmatpush3.bf16.msra.mxu0 %v7587_v19  ;;  %8025 = vrcp.f32 %v2575_v14 }
0x2237   :  { %v8022_v25 = vpop.eup %8021 }
0x2238   :  { %v7873_v21 = vpop.permute.xlu1 %7872  ;;  %v2578_v30 = vmul.f32 %v8022_v25, %v8014_v8  ;;  %v6515_v25 = vld [vmem:[%s8435_s3 + $0x10] sm:$0xff] }
0x2239   :  { %v7875_v22 = vunpack.i.h.bf16 %v7873_v21  ;;  %v7874_v23 = vunpack.i.l.bf16 %v7873_v21 }
0x223b   :  { %v7597_v24 = vpack.c.bf16 %v7875_v22, %v7874_v23 }
0x223d   :  { %7598 = vmatprep.subr.bf16.mxu0 %v7597_v24 }
0x223f   :  { %v8024_v26 = vpop.eup %8023 }
0x2240   :  { %v2374_v27 = vmul.f32 %v8024_v26, %v8018_v2  ;;  %v8026_v29 = vpop.eup %8025  ;;  %v6516_v26 = vld [vmem:[%s8435_s3 + $0x18] sm:$0xff] }
0x2241   :  { %v2579_v31 = vmul.f32 %v8026_v29, %v8016_v63  ;;  %v6522_v29 = vld [vmem:[%s8442_s7 + $0x48] sm:$0xff] }
0x2242   :  { %7165 = vmatprep.mubr.msk.f32.mxu0 %vm161_vm1, %v2374_v27  ;;  %v7601_v27 = vpack.c.bf16 %v6516_v26, %v6515_v25  ;;  %v1095_v25 = vrot.slane %v8321_v36, 6 }
0x2243   :  { %7166 = vmatmul.mubr.msk.f32.vlgmr.msra.gmra.mrb[22].mxu0 %vm161_vm1, %v2375_v28  ;;  %v6521_v28 = vld [vmem:[%s8442_s7 + $0x40] sm:$0xff] }
0x2244   :  { %7600 = vmatpush3.bf16.msra.mxu0 %v7597_v24  ;;  %7179 = vmatprep.mubr.msk.f32.mxu0 %vm161_vm1, %v2578_v30  ;;  %v7605_v30 = vpack.c.bf16 %v6522_v29, %v6521_v28 }
0x2245   :  { %7182 = vmatprep.subr.mxu0 %v6492_v17  ;;  %7602 = vmatprep.subr.bf16.mxu1 %v7601_v27 }
0x2246   :  { %7604 = vmatpush3.bf16.msra.mxu1 %v7601_v27 }
0x2247   :  { %7180 = vmatmul.mubr.msk.f32.vlgmr.msra.gmra.mrb[24].mxu0 %vm161_vm1, %v2579_v31  ;;  %7606 = vmatprep.subr.bf16.mxu1 %v7605_v30 }
0x2248   :  { %7183 = vmatpush3.msra.mxu0 %v6492_v17 }
0x2249   :  { %7187 = vmatprep.subr.mxu0 %v6491_v32 }
0x2316   :  { %v7167_v34 = vpop.f32.mrb[22].mxu0 }
0x2317   :  { %v2454_v35 = vpop.f32.mrb[23].mxu0 }
0x231a   :  { %v7181_v39 = vpop.f32.mrb[24].mxu0 }
0x231b   :  { %v2658_v40 = vpop.f32.mrb[25].mxu0 }
0x231c   :  { %7184 = vmatprep.mubr.msk.f32.mxu0 %vm1311_vm4, %v2658_v40 }
0x231d   :  { %7185 = vmatmul.mubr.msk.f32.vlgmr.msra.gmra.mrb[26].mxu0 %vm1311_vm4, %v7181_v39  ;;  %v8604_v39 = vld [vmem:[%s6403_s26 + $0x8] sm:$0x3] }
0x231e   :  { %7188 = vmatpush3.msra.mxu0 %v6491_v32  ;;  %7189 = vmatprep.mubr.msk.f32.mxu0 %vm1311_vm4, %v2454_v35 }
0x231f   :  { %7622 = vmatprep.subr.bf16.mxu0 %v7621_v41 }
0x2325   :  { %7190 = vmatmul.mubr.msk.f32.vlgmr.msra.gmra.mrb[26].mxu0 %vm1311_vm4, %v7167_v34 }
0x2326   :  { %7624 = vmatpush3.bf16.msra.mxu0 %v7621_v41  ;;  %7226 = vmatprep.mubr.msk.f32.mxu0 %vm243_vm3, %v3125_v43 }
0x2327   :  { %7626 = vmatprep.subr.bf16.mxu0 %v7625_v50 }
0x232a   :  { %7628 = vmatpush3.bf16.msra.mxu0 %v7625_v50 }
0x232b   :  { %7630 = vmatprep.subr.bf16.mxu0 %v7629_v49 }
0x232d   :  { %7227 = vmatmul.mubr.msk.f32.vlgmr.msra.gmra.mrb[28].mxu0 %vm243_vm3, %v3126_v45  ;;  %v6513_v45 = vld [vmem:[%s8449_s13 + $0x1] ss:$0 sm:$0xff] }
0x232e   :  { %7632 = vmatpush3.bf16.msra.mxu0 %v7629_v49 }
0x23f8   :  { %v7191_v54 = vpop.f32.mrb[26].mxu0 }
0x23f9   :  { %v2836_v55 = vadd.f32 %v7191_v54, %v6510_v53  ;;  %v2820_v56 = vpop.f32.mrb[27].mxu0 }
0x23fa   :  { %v2835_v57 = vadd.f32 %v6510_v53, %v2820_v56  ;;  %v6514_v53 = vld [vmem:[%s8454_s23 + $0x1] ss:$0 sm:$0xff] }
0x23fb   :  { %v2838_v3 = vadd.f32 %v2836_v55, %v8502_v9 }
0x23fc   :  { %v2837_v2 = vadd.f32 %v2835_v57, %v8498_v5 }
0x23fd   :  { %v2846_v58 = vsel %vm161_vm1, %v2838_v3, 0.0 }
0x23fe   :  { %2847 = vadd.xlane.f32.xlu0 %v2846_v58  ;;  %v2843_v4 = vsel %vm161_vm1, %v2837_v2, 0.0  ;;  %v6523_v58 = vld [vmem:[%s8442_s7 + $0x50] sm:$0xff] }
0x2400   :  { %v8566_v60 = vpop.f32.mrb[28].mxu0 }
0x2401   :  { %v8568_v0 = vpop.f32.mrb[29].mxu0 }
0x2402   :  { %7233 = vmatprep.mubr.msk.f32.mxu0 %vm161_vm1, %v8568_v0 }
0x2403   :  { %7234 = vmatmul.mubr.msk.f32.vlgmr.msra.gmra.mrb[30].mxu0 %vm161_vm1, %v8566_v60 }
0x248b   :  { %v2848_v16 = vpop.xlane.xlu0 %2847 }
0x248c   :  { %v2850_v5 = vmul.f32 0.0625, %v2848_v16 }
0x248e   :  { %v2852_v20 = vsub.f32 %v2838_v3, %v2850_v5 }
0x2490   :  { %v2854_v24 = vmul.f32 %v2852_v20, %v2852_v20 }
0x2492   :  { %v2858_v59 = vsel %vm161_vm1, %v2854_v24, 0.0 }
0x24d6   :  { %v7235_v8 = vpop.f32.mrb[30].mxu0 }
0x24d7   :  { %v8575_v1 = vadd.f32 %v7235_v8, %v6542_v61  ;;  %v3297_v63 = vpop.f32.mrb[31].mxu0 }
0x24d8   :  { %v8577_v12 = vadd.f32 %v6542_v61, %v3297_v63  ;;  %v6524_v61 = vld [vmem:[%s8442_s7 + $0x58] sm:$0xff] }
0x24da   :  { %7240 = vmatprep.mubr.msk.f32.mxu0 %vm1311_vm4, %v8577_v12  ;;  %v8583_v9 = vpack.i.bf16 %v8575_v1, %v8577_v12 }
0x24dc   :  { %7877 = vrot.lane.b32.xlu1 %v8583_v9, %s8152_s10 }
0x2500   :  { %2844 = vadd.xlane.f32.xlu1 %v2843_v4  ;;  %v6525_v4 = vld [vmem:[%s8442_s7 + $0x60] sm:$0xff] }
0x254e   :  { %v7878_v7 = vpop.permute.xlu1 %7877 }
0x254f   :  { %v7880_v10 = vunpack.i.h.bf16 %v7878_v7  ;;  %v7879_v13 = vunpack.i.l.bf16 %v7878_v7  ;;  %v6526_v7 = vld [vmem:[%s8442_s7 + $0x68] sm:$0xff] }
0x2551   :  { %v7633_v14 = vpack.c.bf16 %v7880_v10, %v7879_v13  ;;  %v7613_v10 = vpack.c.bf16 %v6526_v7, %v6525_v4  ;;  %v6527_v13 = vld [vmem:[%s8442_s7 + $0x70] sm:$0xff] }
0x2553   :  { %7635 = vmatprep.subr.msk.bf16.mxu0 %vm8363_vm5, %v7633_v14 }
0x2554   :  { %7638 = vmatpush3.bf16.xpose.msk.msra.mxu0 %vm8363_vm5, %v7633_v14  ;;  %v6528_v14 = vld [vmem:[%s8442_s7 + $0x78] sm:$0xff] }
0x2555   :  { %v7617_v16 = vpack.c.bf16 %v6528_v14, %v6527_v13 }
0x255b   :  { %7241 = vmatmul.mubr.msk.f32.vlgmr.msra.gmra.mrb[32].mxu0 %vm1311_vm4, %v8575_v1 }
0x258d   :  { %v2845_v18 = vpop.xlane.xlu1 %2844 }
0x258e   :  { %v2849_v19 = vmul.f32 0.0625, %v2845_v18 }
0x2590   :  { %v2851_v21 = vsub.f32 %v2837_v2, %v2849_v19  ;;  %v7609_v2 = vpack.c.bf16 %v6524_v61, %v6523_v58 }
0x2592   :  { %v2853_v22 = vmul.f32 %v2851_v21, %v2851_v21 }
0x2594   :  { %v2855_v23 = vsel %vm161_vm1, %v2853_v22, 0.0 }
0x2595   :  { %2856 = vadd.xlane.f32.xlu0 %v2855_v23 }
0x2599   :  { %2859 = vadd.xlane.f32.xlu0 %v2858_v59 }
0x2622   :  { %v2857_v31 = vpop.xlane.xlu0 %2856 }
0x2623   :  { %v2861_v17 = vmul.f32 0.0625, %v2857_v31 }
0x2625   :  { %v2863_v32 = vadd.f32 1e-05, %v2861_v17 }
0x2626   :  { %v2860_v34 = vpop.xlane.xlu0 %2859 }
0x2627   :  { %8027 = vrsqrt.f32 %v2863_v32  ;;  %v2862_v35 = vmul.f32 0.0625, %v2860_v34 }
0x2629   :  { %v2864_v37 = vadd.f32 1e-05, %v2862_v35 }
0x262b   :  { %8029 = vrsqrt.f32 %v2864_v37 }
0x262e   :  { %v7242_v38 = vpop.f32.mrb[32].mxu0 }
0x262f   :  { %v3401_v40 = vmul.f32 0.35355338, %v7242_v38  ;;  %v3391_v41 = vpop.f32.mrb[33].mxu0 }
0x2630   :  { %v3400_v47 = vmul.f32 0.35355338, %v3391_v41 }
0x2631   :  { %v8028_v50 = vpop.eup %8027  ;;  %v3403_v43 = vadd.f32 %v3401_v40, %v8604_v39 }
0x2632   :  { %v3402_v46 = vadd.f32 %v3400_v47, %v8606_v42  ;;  %v2867_v48 = vmul.f32 %v8028_v50, %v2851_v21 }
0x2633   :  { %v3409_v49 = vsel %vm3408_vm7, %v3403_v43, -inf }
0x2634   :  { %3410 = vmax.xlane.f32.xlu0 %v3409_v49  ;;  %v3405_v54 = vsel %vm3404_vm8, %v3402_v46, -inf  ;;  %v2875_v55 = vmul.f32 %v6513_v45, %v2867_v48 }
0x2635   :  { %v8030_v56 = vpop.eup %8029  ;;  %3406 = vmax.xlane.f32.xlu1 %v3405_v54 }
0x2636   :  { %v2868_v57 = vmul.f32 %v8030_v56, %v2852_v20  ;;  %v8614_v3 = vadd.f32 %v6514_v53, %v2875_v55 }
0x2638   :  { %v2876_v8 = vmul.f32 %v6513_v45, %v2868_v57  ;;  %7196 = vmatprep.mubr.msk.f32.mxu1 %vm161_vm1, %v8614_v3 }
0x263a   :  { %v8620_v63 = vadd.f32 %v6514_v53, %v2876_v8 }
0x263c   :  { %7197 = vmatmul.mubr.msk.f32.vlgmr.msra.gmra.mrb[20].mxu1 %vm161_vm1, %v8620_v63 }
0x263d   :  { %7608 = vmatpush3.bf16.msra.mxu1 %v7605_v30  ;;  %v6518_v30 = vld [vmem:[%s8469_s29 + $0x1] ss:$0 sm:$0xff] }
0x263e   :  { %7610 = vmatprep.subr.bf16.mxu1 %v7609_v2 }
0x2641   :  { %7612 = vmatpush3.bf16.msra.mxu1 %v7609_v2 }
0x2642   :  { %7614 = vmatprep.subr.bf16.mxu1 %v7613_v10 }
0x2645   :  { %7616 = vmatpush3.bf16.msra.mxu1 %v7613_v10 }
0x2646   :  { %7882 = vrot.lane.b32.xlu1 %v8583_v9, %s8156_s17  ;;  %7618 = vmatprep.subr.bf16.mxu1 %v7617_v16 }
0x2649   :  { %7620 = vmatpush3.bf16.msra.mxu1 %v7617_v16 }
0x264a   :  { %3517 = vrot.lane.b32.xlu1 %v8577_v12, %s8155_s16 }
0x26c1   :  { %v3411_v5 = vpop.xlane.xlu0 %3410 }
0x26c2   :  { %v3413_v18 = vsub.f32 %v3403_v43, %v3411_v5  ;;  %v3407_v19 = vpop.xlane.xlu1 %3406 }
0x26c3   :  { %v3412_v20 = vsub.f32 %v3402_v46, %v3407_v19 }
0x26c4   :  { %v3416_v21 = vmul.f32 1.442695, %v3413_v18 }
0x26c5   :  { %v3414_v22 = vmul.f32 1.442695, %v3412_v20 }
0x26c6   :  { %8031 = vpow2.f32 %v3416_v21  ;;  %v7883_v23 = vpop.permute.xlu1 %7882 }
0x26c7   :  { %8033 = vpow2.f32 %v3414_v22  ;;  %v7885_v24 = vunpack.i.h.bf16 %v7883_v23  ;;  %v7884_v59 = vunpack.i.l.bf16 %v7883_v23 }
0x26c9   :  { %v7639_v12 = vpack.c.bf16 %v7885_v24, %v7884_v59 }
0x26ca   :  { %v3518_v38 = vpop.permute.xlu1 %3517 }
0x26cb   :  { %7641 = vmatprep.subr.msk.bf16.mxu1 %vm8632_vm11, %v7639_v12 }
0x26d0   :  { %v8032_v26 = vpop.eup %8031 }
0x26d1   :  { %v8034_v27 = vpop.eup %8033  ;;  %v3421_v28 = vsel %vm3408_vm7, %v8032_v26, 0.0 }
0x26d2   :  { %3422 = vadd.xlane.f32.xlu0 %v3421_v28  ;;  %v3418_v29 = vsel %vm3404_vm8, %v8034_v27, 0.0 }
0x26d3   :  { %3419 = vadd.xlane.f32.xlu1 %v3418_v29 }
0x26e4   :  { %3519 = vrot.lane.b32.xlu1 %v8575_v1, %s8155_s16 }
0x26e8   :  { %7887 = vrot.lane.b32.xlu0 %v8583_v9, %s8154_s15 }
0x270f   :  { %v7198_v31 = vpop.f32.mrb[20].mxu1 }
0x2710   :  { %v2974_v17 = vadd.f32 %v7198_v31, %v6518_v30  ;;  %v2968_v32 = vpop.f32.mrb[21].mxu1 }
0x2711   :  { %v2969_v34 = vadd.f32 %v6518_v30, %v2968_v32 }
0x2712   :  { %v2978_v37 = vmax.f32 %v2974_v17, 0.0 }
0x2713   :  { %v2977_v35 = vmax.f32 %v2969_v34, 0.0  ;;  %v6545_v34 = vld [vmem:[%s8410_s24 + $0x20] sm:$0xff] }
0x2715   :  { %7215 = vmatprep.mubr.msk.f32.mxu1 %vm2036_vm6, %v2977_v35 }
0x2716   :  { %7216 = vmatmul.mubr.msk.f32.vlgmr.msra.gmra.mrb[22].mxu1 %vm2036_vm6, %v2978_v37 }
0x2717   :  { %7644 = vmatpush3.bf16.msk.msra.mxu1 %vm8632_vm11, %v7639_v12 }
0x275f   :  { %v3423_v40 = vpop.xlane.xlu0 %3422 }
0x2760   :  { %8035 = vrcp.f32 %v3423_v40  ;;  %v3420_v1 = vpop.xlane.xlu1 %3419 }
0x2761   :  { %8037 = vrcp.f32 %v3420_v1 }
0x2763   :  { %v7888_v41 = vpop.permute.xlu0 %7887 }
0x2764   :  { %v7890_v47 = vunpack.i.h.bf16 %v7888_v41  ;;  %v7889_v50 = vunpack.i.l.bf16 %v7888_v41  ;;  %v3520_v53 = vpop.permute.xlu1 %3519 }
0x2766   :  { %v7645_v43 = vpack.c.bf16 %v7890_v47, %v7889_v50 }
0x2768   :  { %7647 = vmatprep.subr.msk.bf16.mxu1 %vm8363_vm5, %v7645_v43 }
0x276a   :  { %v8036_v45 = vpop.eup %8035 }
0x276b   :  { %v8038_v46 = vpop.eup %8037  ;;  %v3427_v49 = vmul.f32 %v8036_v45, %v8032_v26 }
0x276c   :  { %v3426_v48 = vmul.f32 %v8038_v46, %v8034_v27  ;;  %v6546_v27 = vld [vmem:[%s8410_s24 + $0x28] sm:$0xff] }
0x276e   :  { %7247 = vmatprep.mubr.msk.f32.mxu1 %vm3404_vm8, %v3426_v48 }
0x276f   :  { %7248 = vmatmul.mubr.msk.f32.vlgmr.msra.gmra.mrb[24].mxu1 %vm3404_vm8, %v3427_v49 }
0x2770   :  { %7650 = vmatpush3.bf16.xpose.msk.msra.mxu1 %vm8363_vm5, %v7645_v43  ;;  %7254 = vmatprep.mubr.msk.f32.mxu1 %vm1311_vm4, %v3518_v38  ;;  %v6566_v38 = vld [vmem:[%s8423_s28 + $0x2] ss:$0 sm:$0xff] }
0x2777   :  { %7255 = vmatmul.mubr.msk.f32.vlgmr.msra.gmra.mrb[26].mxu1 %vm1311_vm4, %v3520_v53 }
0x27e9   :  { %v8657_v54 = vpop.f32.mrb[22].mxu1 }
0x27ea   :  { %v8659_v55 = vpop.f32.mrb[23].mxu1 }
0x2842   :  { %v7249_v56 = vpop.f32.mrb[24].mxu1 }
0x2843   :  { %v3508_v57 = vpop.f32.mrb[25].mxu1 }
0x284a   :  { %v7256_v58 = vpop.f32.mrb[26].mxu1 }
0x284b   :  { %v3609_v61 = vmul.f32 0.35355338, %v7256_v58  ;;  %v3599_v8 = vpop.f32.mrb[27].mxu1 }
0x284c   :  { %v3608_v2 = vmul.f32 0.35355338, %v3599_v8 }
0x284d   :  { %v3611_v4 = vadd.f32 %v3609_v61, %v8604_v39 }
0x284e   :  { %v3610_v7 = vadd.f32 %v3608_v2, %v8606_v42  ;;  %v6571_v2 = vld [vmem:[%s8435_s3 + $0x20] sm:$0xff] }
0x284f   :  { %v3615_v10 = vsel %vm3408_vm7, %v3611_v4, -inf }
0x2850   :  { %3616 = vmax.xlane.f32.xlu0 %v3615_v10  ;;  %v3612_v13 = vsel %vm3404_vm8, %v3610_v7, -inf  ;;  %v6577_v10 = vld [vmem:[%s8442_s7 + $0x80] sm:$0xff] }
0x2851   :  { %3613 = vmax.xlane.f32.xlu1 %v3612_v13  ;;  %v6578_v13 = vld [vmem:[%s8442_s7 + $0x88] sm:$0xff] }
0x2862   :  { %7892 = vrot.lane.b32.xlu1 %v8583_v9, %s8157_s20 }
0x28dd   :  { %v3617_v14 = vpop.xlane.xlu0 %3616 }
0x28de   :  { %v3619_v16 = vsub.f32 %v3611_v4, %v3617_v14  ;;  %v3614_v5 = vpop.xlane.xlu1 %3613  ;;  %v6572_v4 = vld [vmem:[%s8435_s3 + $0x28] sm:$0xff]  ;;  %v7661_v14 = vpack.c.bf16 %v6578_v13, %v6577_v10 }
0x28df   :  { %v3618_v18 = vsub.f32 %v3610_v7, %v3614_v5  ;;  %v7657_v7 = vpack.c.bf16 %v6572_v4, %v6571_v2 }
0x28e0   :  { %v3622_v19 = vmul.f32 1.442695, %v3619_v16 }
0x28e1   :  { %v3620_v20 = vmul.f32 1.442695, %v3618_v18  ;;  %7658 = vmatprep.subr.bf16.mxu1 %v7657_v7 }
0x28e2   :  { %v7893_v21 = vpop.permute.xlu1 %7892  ;;  %7660 = vmatpush3.bf16.msra.mxu1 %v7657_v7 }
0x28e3   :  { %8039 = vpow2.f32 %v3620_v20  ;;  %v7895_v22 = vunpack.i.h.bf16 %v7893_v21  ;;  %v7894_v23 = vunpack.i.l.bf16 %v7893_v21  ;;  %7662 = vmatprep.subr.bf16.mxu1 %v7661_v14 }
0x28e4   :  { %8041 = vpow2.f32 %v3622_v19 }
0x28e5   :  { %v7651_v24 = vpack.c.bf16 %v7895_v22, %v7894_v23  ;;  %v6569_v23 = vld [vmem:[%s8449_s13 + $0x2] ss:$0 sm:$0xff] }
0x28e7   :  { %7653 = vmatprep.subr.msk.bf16.mxu0 %vm8632_vm11, %v7651_v24 }
0x28e8   :  { %7656 = vmatpush3.bf16.msk.msra.mxu0 %vm8632_vm11, %v7651_v24 }
0x28e9   :  { %7264 = vmatprep.subr.mxu0 %v6546_v27 }
0x28ed   :  { %v8040_v9 = vpop.eup %8039 }
0x28ee   :  { %v3624_v59 = vsel %vm3404_vm8, %v8040_v9, 0.0  ;;  %v8042_v12 = vpop.eup %8041 }
0x28ef   :  { %3625 = vadd.xlane.f32.xlu0 %v3624_v59  ;;  %v3627_v26 = vsel %vm3408_vm7, %v8042_v12, 0.0 }
0x28f3   :  { %3628 = vadd.xlane.f32.xlu0 %v3627_v26 }
0x297c   :  { %v3626_v28 = vpop.xlane.xlu0 %3625 }
0x297d   :  { %8043 = vrcp.f32 %v3626_v28  ;;  %v6579_v28 = vld [vmem:[%s8442_s7 + $0x90] sm:$0xff] }
0x2980   :  { %v3629_v29 = vpop.xlane.xlu0 %3628 }
0x2981   :  { %8045 = vrcp.f32 %v3629_v29  ;;  %v6580_v29 = vld [vmem:[%s8442_s7 + $0x98] sm:$0xff] }
0x2987   :  { %v8044_v30 = vpop.eup %8043 }
0x2988   :  { %v3632_v31 = vmul.f32 %v8044_v30, %v8040_v9  ;;  %v6570_v9 = vld [vmem:[%s8454_s23 + $0x2] ss:$0 sm:$0xff] }
0x298a   :  { %7261 = vmatprep.mubr.msk.f32.mxu0 %vm3404_vm8, %v3632_v31 }
0x298b   :  { %v8046_v17 = vpop.eup %8045 }
0x298c   :  { %v3633_v32 = vmul.f32 %v8046_v17, %v8042_v12  ;;  %v7665_v17 = vpack.c.bf16 %v6580_v29, %v6579_v28  ;;  %v6592_v29 = vld [vmem:[%s8494_s25 + $0x2] ss:$0 sm:$0xff] }
0x298e   :  { %7262 = vmatmul.mubr.msk.f32.vlgmr.msra.gmra.mrb[34].mxu0 %vm3404_vm8, %v3633_v32  ;;  %v6581_v32 = vld [vmem:[%s8442_s7 + $0xa0] sm:$0xff] }
0x298f   :  { %7265 = vmatpush3.msra.mxu0 %v6546_v27 }
0x2990   :  { %7269 = vmatprep.subr.mxu0 %v6545_v34 }
0x2a61   :  { %v7263_v35 = vpop.f32.mrb[34].mxu0 }
0x2a62   :  { %v3713_v37 = vpop.f32.mrb[35].mxu0 }
0x2a63   :  { %7266 = vmatprep.mubr.msk.f32.mxu0 %vm1311_vm4, %v3713_v37  ;;  %v6583_v37 = vld [vmem:[%s8442_s7 + $0xb0] sm:$0xff] }
0x2a64   :  { %7267 = vmatmul.mubr.msk.f32.vlgmr.msra.gmra.mrb[36].mxu0 %vm1311_vm4, %v7263_v35 }
0x2a65   :  { %7270 = vmatpush3.msra.mxu0 %v6545_v34  ;;  %7271 = vmatprep.mubr.msk.f32.mxu0 %vm1311_vm4, %v3508_v57  ;;  %v6582_v34 = vld [vmem:[%s8442_s7 + $0xa8] sm:$0xff] }
0x2a66   :  { %v7669_v35 = vpack.c.bf16 %v6582_v34, %v6581_v32 }
0x2a6c   :  { %7272 = vmatmul.mubr.msk.f32.vlgmr.msra.gmra.mrb[36].mxu0 %vm1311_vm4, %v7249_v56 }
0x2b3f   :  { %v7273_v40 = vpop.f32.mrb[36].mxu0 }
0x2b40   :  { %v3891_v1 = vadd.f32 %v7273_v40, %v6566_v38  ;;  %v3875_v41 = vpop.f32.mrb[37].mxu0 }
0x2b41   :  { %v3890_v47 = vadd.f32 %v6566_v38, %v3875_v41  ;;  %v6584_v38 = vld [vmem:[%s8442_s7 + $0xb8] sm:$0xff] }
0x2b42   :  { %v3893_v50 = vadd.f32 %v8566_v60, %v3891_v1  ;;  %v7673_v40 = vpack.c.bf16 %v6584_v38, %v6583_v37  ;;  %v6574_v1 = vld [vmem:[%s8469_s29 + $0x2] ss:$0 sm:$0xff]  ;;  %v6596_v37 = vld [vmem:[%s8351_s9 + $0x3] ss:$0 sm:$0xff]  ;;  %s6408_s9 = sld [smem:[%s8983_s0 + %s8178_s22]]  }
0x2b43   :  { %v3892_v43 = vadd.f32 %v3890_v47, %v8568_v0 }
0x2b44   :  { %v3902_v46 = vsel %vm3901_vm12, %v3893_v50, 0.0 }
0x2b45   :  { %v3898_v45 = vsel %vm161_vm1, %v3892_v43, 0.0 }
0x2b46   :  { %3899 = vadd.xlane.f32.xlu0 %v3898_v45 }
0x2b4a   :  { %3903 = vadd.xlane.f32.xlu0 %v3902_v46 }
0x2bd3   :  { %v3900_v48 = vpop.xlane.xlu0 %3899 }
0x2bd4   :  { %v3905_v49 = vmul.f32 0.0625, %v3900_v48  ;;  %v6586_v48 = vld [vmem:[%s8477_s5 + $0x2] ss:$0 sm:$0xff] }
0x2bd6   :  { %v3907_v53 = vsub.f32 %v3892_v43, %v3905_v49 }
0x2bd7   :  { %v3904_v56 = vpop.xlane.xlu0 %3903 }
0x2bd8   :  { %v3906_v57 = vmul.f32 0.0625, %v3904_v56  ;;  %v3909_v58 = vmul.f32 %v3907_v53, %v3907_v53 }
0x2bda   :  { %v3908_v60 = vsub.f32 %v3893_v50, %v3906_v57  ;;  %v3911_v0 = vsel %vm161_vm1, %v3909_v58, 0.0 }
0x2bdb   :  { %3912 = vadd.xlane.f32.xlu0 %v3911_v0 }
0x2bdc   :  { %v3910_v61 = vmul.f32 %v3908_v60, %v3908_v60 }
0x2bde   :  { %v3914_v8 = vsel %vm3901_vm12, %v3910_v61, 0.0 }
0x2bdf   :  { %3915 = vadd.xlane.f32.xlu0 %v3914_v8 }
0x2c68   :  { %v3913_v16 = vpop.xlane.xlu0 %3912 }
0x2c69   :  { %v3917_v5 = vmul.f32 0.0625, %v3913_v16 }
0x2c6b   :  { %v3919_v18 = vadd.f32 1e-05, %v3917_v5 }
0x2c6c   :  { %v3916_v19 = vpop.xlane.xlu0 %3915 }
0x2c6d   :  { %8047 = vrsqrt.f32 %v3919_v18  ;;  %v3918_v20 = vmul.f32 0.0625, %v3916_v19  ;;  %v6593_v19 = vld [vmem:[%s8328_s1 + $0x30] sm:$0xff] }
0x2c6f   :  { %v3920_v21 = vadd.f32 1e-05, %v3918_v20  ;;  %v6594_v20 = vld [vmem:[%s8328_s1 + $0x38] sm:$0xff]  ;;  %s8172_s1 = smov 34  }
0x2c71   :  { %8049 = vrsqrt.f32 %v3920_v21  ;;  %v7677_v21 = vpack.c.bf16 %v6594_v20, %v6593_v19 }
0x2c73   :  { %7678 = vmatprep.subr.bf16.mxu0 %v7677_v21 }
0x2c74   :  { %7680 = vmatpush3.bf16.msra.mxu0 %v7677_v21 }
0x2c77   :  { %v8048_v22 = vpop.eup %8047 }
0x2c78   :  { %v3923_v24 = vmul.f32 %v8048_v22, %v3907_v53 }
0x2c7a   :  { %v3931_v59 = vmul.f32 %v6569_v23, %v3923_v24 }
0x2c7b   :  { %v8050_v12 = vpop.eup %8049 }
0x2c7c   :  { %v3924_v26 = vmul.f32 %v8050_v12, %v3908_v60  ;;  %v3939_v27 = vadd.f32 %v6570_v9, %v3931_v59 }
0x2c7e   :  { %v3932_v30 = vmul.f32 %v6569_v23, %v3924_v26  ;;  %7278 = vmatprep.mubr.msk.f32.mxu1 %vm161_vm1, %v3939_v27 }
0x2c80   :  { %v3940_v31 = vadd.f32 %v6570_v9, %v3932_v30 }
0x2c82   :  { %7279 = vmatmul.mubr.msk.f32.vlgmr.msra.gmra.mrb[28].mxu1 %vm161_vm1, %v3940_v31 }
0x2c83   :  { %7664 = vmatpush3.bf16.msra.mxu1 %v7661_v14 }
0x2c84   :  { %7666 = vmatprep.subr.bf16.mxu1 %v7665_v17 }
0x2c87   :  { %7668 = vmatpush3.bf16.msra.mxu1 %v7665_v17 }
0x2c88   :  { %7670 = vmatprep.subr.bf16.mxu1 %v7669_v35 }
0x2c8b   :  { %7672 = vmatpush3.bf16.msra.mxu1 %v7669_v35 }
0x2c8c   :  { %7674 = vmatprep.subr.bf16.mxu1 %v7673_v40 }
0x2c8f   :  { %7676 = vmatpush3.bf16.msra.mxu1 %v7673_v40 }
0x2d55   :  { %v7280_v41 = vpop.f32.mrb[28].mxu1 }
0x2d56   :  { %v4030_v47 = vadd.f32 %v7280_v41, %v6574_v1  ;;  %v4024_v50 = vpop.f32.mrb[29].mxu1 }
0x2d57   :  { %v4025_v43 = vadd.f32 %v6574_v1, %v4024_v50 }
0x2d58   :  { %v4034_v46 = vmax.f32 %v4030_v47, 0.0 }
0x2d59   :  { %v4033_v45 = vmax.f32 %v4025_v43, 0.0 }
0x2d5b   :  { %7297 = vmatprep.mubr.msk.f32.mxu1 %vm2036_vm6, %v4033_v45 }
0x2d5c   :  { %7298 = vmatmul.mubr.msk.f32.vlgmr.msra.gmra.mrb[30].mxu1 %vm2036_vm6, %v4034_v46 }
0x2e2f   :  { %v7299_v49 = vpop.f32.mrb[30].mxu1 }
0x2e30   :  { %v4130_v53 = vadd.f32 %v7299_v49, %v6586_v48  ;;  %v4124_v56 = vpop.f32.mrb[31].mxu1 }
0x2e31   :  { %v4125_v57 = vadd.f32 %v6586_v48, %v4124_v56 }
0x2e32   :  { %v4134_v58 = vadd.f32 %v4130_v53, %v3940_v31 }
0x2e33   :  { %v4133_v60 = vadd.f32 %v4125_v57, %v3939_v27  ;;  %v6591_v27 = vld [vmem:[%s8489_s12 + $0x2] ss:$0 sm:$0xff] }
0x2e34   :  { %v4142_v0 = vsel %vm3901_vm12, %v4134_v58, 0.0 }
0x2e35   :  { %4143 = vadd.xlane.f32.xlu0 %v4142_v0  ;;  %v4139_v61 = vsel %vm161_vm1, %v4133_v60, 0.0 }
0x2e36   :  { %4140 = vadd.xlane.f32.xlu1 %v4139_v61 }
0x2ec2   :  { %v4144_v8 = vpop.xlane.xlu0 %4143 }
0x2ec3   :  { %v4146_v2 = vmul.f32 0.0625, %v4144_v8  ;;  %v4141_v4 = vpop.xlane.xlu1 %4140 }
0x2ec4   :  { %v4145_v7 = vmul.f32 0.0625, %v4141_v4 }
0x2ec5   :  { %v4148_v10 = vsub.f32 %v4134_v58, %v4146_v2 }
0x2ec6   :  { %v4147_v13 = vsub.f32 %v4133_v60, %v4145_v7 }
0x2ec7   :  { %v4150_v5 = vmul.f32 %v4148_v10, %v4148_v10 }
0x2ec8   :  { %v4149_v14 = vmul.f32 %v4147_v13, %v4147_v13 }
0x2ec9   :  { %v4154_v18 = vsel %vm3901_vm12, %v4150_v5, 0.0 }
0x2eca   :  { %v4151_v16 = vsel %vm161_vm1, %v4149_v14, 0.0 }
0x2ecb   :  { %4152 = vadd.xlane.f32.xlu0 %v4151_v16 }
0x2ecf   :  { %4155 = vadd.xlane.f32.xlu0 %v4154_v18 }
0x2f58   :  { %v4153_v22 = vpop.xlane.xlu0 %4152 }
0x2f59   :  { %v4157_v23 = vmul.f32 0.0625, %v4153_v22 }
0x2f5b   :  { %v4159_v24 = vadd.f32 1e-05, %v4157_v23 }
0x2f5c   :  { %v4156_v9 = vpop.xlane.xlu0 %4155 }
0x2f5d   :  { %8051 = vrsqrt.f32 %v4159_v24  ;;  %v4158_v59 = vmul.f32 0.0625, %v4156_v9 }
0x2f5f   :  { %v4160_v12 = vadd.f32 1e-05, %v4158_v59 }
0x2f61   :  { %8053 = vrsqrt.f32 %v4160_v12 }
0x2f67   :  { %v8052_v26 = vpop.eup %8051 }
0x2f68   :  { %v4163_v28 = vmul.f32 %v8052_v26, %v4147_v13 }
0x2f6a   :  { %v4171_v30 = vmul.f32 %v6591_v27, %v4163_v28 }
0x2f6b   :  { %v8054_v31 = vpop.eup %8053 }
0x2f6c   :  { %v4164_v17 = vmul.f32 %v8054_v31, %v4148_v10  ;;  %v8714_v32 = vadd.f32 %v6592_v29, %v4171_v30 }
0x2f6e   :  { %v4172_v34 = vmul.f32 %v6591_v27, %v4164_v17  ;;  %7304 = vmatprep.mubr.msk.f32.mxu0 %vm161_vm1, %v8714_v32 }
0x2f70   :  { %v8718_v35 = vadd.f32 %v6592_v29, %v4172_v34 }
0x2f72   :  { %7305 = vmatmul.mubr.msk.f32.vlgmr.msra.gmra.mrb[38].mxu0 %vm161_vm1, %v8718_v35 }
0x3045   :  { %v7306_v38 = vpop.f32.mrb[38].mxu0 }
0x3046   :  { %v4270_v40 = vadd.f32 %v7306_v38, %v6596_v37  ;;  %v4264_v1 = vpop.f32.mrb[39].mxu0 }
0x3047   :  { %v4265_v41 = vadd.f32 %v6596_v37, %v4264_v1 }
0x3049   :  { %7311 = vmatprep.mubr.msk.f32.mxu0 %vm1311_vm4, %v4265_v41  ;;  %v8724_v47 = vpack.i.bf16 %v4270_v40, %v4265_v41 }
0x304b   :  { %7902 = vrot.lane.b32.xlu1 %v8724_v47, %s8154_s15  ;;  %7897 = vrot.lane.b32.xlu0 %v8724_v47, %s8152_s10 }
0x304f   :  { %4481 = vrot.lane.b32.xlu0 %v4265_v41, %s8155_s16 }
0x3053   :  { %4483 = vrot.lane.b32.xlu0 %v4270_v40, %s8155_s16 }
0x30bd   :  { %v7903_v50 = vpop.permute.xlu1 %7902  ;;  %v7898_v43 = vpop.permute.xlu0 %7897 }
0x30be   :  { %v7905_v45 = vunpack.i.h.bf16 %v7903_v50  ;;  %v7904_v46 = vunpack.i.l.bf16 %v7903_v50  ;;  %v7900_v48 = vunpack.i.h.bf16 %v7898_v43  ;;  %v7899_v49 = vunpack.i.l.bf16 %v7898_v43 }
0x30c0   :  { %v7693_v53 = vpack.c.bf16 %v7905_v45, %v7904_v46  ;;  %v7681_v56 = vpack.c.bf16 %v7900_v48, %v7899_v49 }
0x30c1   :  { %v4482_v57 = vpop.permute.xlu0 %4481 }
0x30c2   :  { %7683 = vmatprep.subr.msk.bf16.mxu0 %vm8363_vm5, %v7681_v56  ;;  %7695 = vmatprep.subr.msk.bf16.mxu1 %vm8363_vm5, %v7693_v53 }
0x30c3   :  { %7325 = vmatprep.mubr.msk.f32.mxu1 %vm1311_vm4, %v4482_v57  ;;  %7686 = vmatpush3.bf16.xpose.msk.msra.mxu0 %vm8363_vm5, %v7681_v56 }
0x30c4   :  { %7698 = vmatpush3.bf16.xpose.msk.msra.mxu1 %vm8363_vm5, %v7693_v53 }
0x30c5   :  { %v4484_v58 = vpop.permute.xlu0 %4483 }
0x30ca   :  { %7312 = vmatmul.mubr.msk.f32.vlgmr.msra.gmra.mrb[40].mxu0 %vm1311_vm4, %v4270_v40 }
0x30cb   :  { %7326 = vmatmul.mubr.msk.f32.vlgmr.msra.gmra.mrb[32].mxu1 %vm1311_vm4, %v4484_v58 }
0x319d   :  { %v7313_v60 = vpop.f32.mrb[40].mxu0 }
0x319e   :  { %v4368_v0 = vmul.f32 0.35355338, %v7313_v60  ;;  %v7327_v61 = vpop.f32.mrb[32].mxu1  ;;  %v4358_v8 = vpop.f32.mrb[41].mxu0 }
0x319f   :  { %v4367_v2 = vmul.f32 0.35355338, %v4358_v8  ;;  %v4563_v4 = vpop.f32.mrb[33].mxu1  ;;  %v4573_v16 = vmul.f32 0.35355338, %v7327_v61 }
0x31a0   :  { %v4572_v7 = vmul.f32 0.35355338, %v4563_v4  ;;  %v4370_v10 = vadd.f32 %v4368_v0, %v8604_v39 }
0x31a1   :  { %v4369_v13 = vadd.f32 %v4367_v2, %v8606_v42  ;;  %v4575_v20 = vadd.f32 %v4573_v16, %v8604_v39 }
0x31a2   :  { %v4374_v14 = vsel %vm3408_vm7, %v4370_v10, -inf  ;;  %v4574_v18 = vadd.f32 %v4572_v7, %v8606_v42 }
0x31a3   :  { %4375 = vmax.xlane.f32.xlu1 %v4374_v14  ;;  %v4371_v5 = vsel %vm3404_vm8, %v4369_v13, -inf  ;;  %v4579_v21 = vsel %vm3408_vm7, %v4575_v20, -inf  ;;  %v6599_v14 = vld [vmem:[%s8410_s24 + $0x30] sm:$0xff] }
0x31a4   :  { %4372 = vmax.xlane.f32.xlu0 %v4371_v5  ;;  %v4576_v19 = vsel %vm3404_vm8, %v4574_v18, -inf }
0x31a8   :  { %4577 = vmax.xlane.f32.xlu0 %v4576_v19 }
0x31ac   :  { %4580 = vmax.xlane.f32.xlu0 %v4579_v21 }
0x3230   :  { %v4376_v22 = vpop.xlane.xlu1 %4375 }
0x3231   :  { %v4378_v23 = vsub.f32 %v4370_v10, %v4376_v22  ;;  %v4373_v24 = vpop.xlane.xlu0 %4372 }
0x3232   :  { %v4377_v26 = vsub.f32 %v4369_v13, %v4373_v24  ;;  %v6600_v13 = vld [vmem:[%s8410_s24 + $0x38] sm:$0xff]  ;;  %s8173_s24 = smov 30  }
0x3233   :  { %v4381_v9 = vmul.f32 1.442695, %v4378_v23 }
0x3234   :  { %v4379_v29 = vmul.f32 1.442695, %v4377_v26 }
0x3235   :  { %8055 = vpow2.f32 %v4381_v9  ;;  %v4578_v59 = vpop.xlane.xlu0 %4577 }
0x3236   :  { %v4582_v12 = vsub.f32 %v4574_v18, %v4578_v59 }
0x3238   :  { %v4584_v27 = vmul.f32 1.442695, %v4582_v12 }
0x3239   :  { %v4581_v28 = vpop.xlane.xlu0 %4580 }
0x323a   :  { %8057 = vpow2.f32 %v4584_v27  ;;  %v4583_v42 = vsub.f32 %v4575_v20, %v4581_v28  ;;  %v6620_v20 = vld [vmem:[%s8423_s28 + $0x3] ss:$0 sm:$0xff]  ;;  %v6530_v27 = vld [vmem:[%s8477_s5 + $0x1] ss:$0 sm:$0xff]  ;;  %s8180_s28 = smov 26  }
0x323c   :  { %v4586_v30 = vmul.f32 1.442695, %v4583_v42 }
0x323e   :  { %8059 = vpow2.f32 %v4586_v30 }
0x323f   :  { %v8056_v39 = vpop.eup %8055  ;;  %8061 = vpow2.f32 %v4379_v29 }
0x3240   :  { %v4386_v31 = vsel %vm3408_vm7, %v8056_v39, 0.0 }
0x3241   :  { %4387 = vadd.xlane.f32.xlu0 %v4386_v31 }
0x3244   :  { %v8058_v17 = vpop.eup %8057 }
0x3245   :  { %v4588_v34 = vsel %vm3404_vm8, %v8058_v17, 0.0 }
0x3246   :  { %4589 = vadd.xlane.f32.xlu1 %v4588_v34 }
0x3248   :  { %v8060_v37 = vpop.eup %8059 }
0x3249   :  { %v4591_v38 = vsel %vm3408_vm7, %v8060_v37, 0.0  ;;  %v8062_v40 = vpop.eup %8061 }
0x324a   :  { %4592 = vadd.xlane.f32.xlu0 %v4591_v38  ;;  %v4383_v1 = vsel %vm3404_vm8, %v8062_v40, 0.0 }
0x324e   :  { %4384 = vadd.xlane.f32.xlu0 %v4383_v1 }
0x3257   :  { %7907 = vrot.lane.b32.xlu1 %v8724_v47, %s8156_s17 }
0x3264   :  { %7912 = vrot.lane.b32.xlu0 %v8724_v47, %s8157_s20  ;;  %s6433_s20 = sld [smem:[%s8983_s0 + %s8172_s1]]  }
0x32ce   :  { %v4388_v41 = vpop.xlane.xlu0 %4387 }
0x32cf   :  { %8063 = vrcp.f32 %v4388_v41  ;;  %v6626_v41 = vld [vmem:[%s8435_s3 + $0x38] sm:$0xff] }
0x32d3   :  { %v4590_v50 = vpop.xlane.xlu1 %4589 }
0x32d4   :  { %8065 = vrcp.f32 %v4590_v50 }
0x32d7   :  { %v7908_v43 = vpop.permute.xlu1 %7907  ;;  %v4593_v45 = vpop.xlane.xlu0 %4592 }
0x32d8   :  { %v7910_v46 = vunpack.i.h.bf16 %v7908_v43  ;;  %v7909_v48 = vunpack.i.l.bf16 %v7908_v43  ;;  %v6632_v43 = vld [vmem:[%s8442_s7 + $0xc8] sm:$0xff] }
0x32d9   :  { %v8064_v60 = vpop.eup %8063 }
0x32da   :  { %v7687_v49 = vpack.c.bf16 %v7910_v46, %v7909_v48  ;;  %v4392_v2 = vmul.f32 %v8064_v60, %v8056_v39  ;;  %v3074_v39 = vadd.f32 %v8657_v54, %v6530_v27 }
0x32db   :  { %v4385_v53 = vpop.xlane.xlu0 %4384 }
0x32dc   :  { %8067 = vrcp.f32 %v4385_v53  ;;  %7689 = vmatprep.subr.msk.bf16.mxu0 %vm8632_vm11, %v7687_v49 }
0x32dd   :  { %7692 = vmatpush3.bf16.msk.msra.mxu0 %vm8632_vm11, %v7687_v49  ;;  %8069 = vrcp.f32 %v4593_v45 }
0x32de   :  { %v8066_v0 = vpop.eup %8065 }
0x32df   :  { %v7913_v56 = vpop.permute.xlu0 %7912  ;;  %v4596_v7 = vmul.f32 %v8066_v0, %v8058_v17 }
0x32e0   :  { %v7915_v47 = vunpack.i.h.bf16 %v7913_v56  ;;  %v7914_v57 = vunpack.i.l.bf16 %v7913_v56 }
0x32e2   :  { %v7699_v58 = vpack.c.bf16 %v7915_v47, %v7914_v57 }
0x32e4   :  { %7701 = vmatprep.subr.msk.bf16.mxu0 %vm8632_vm11, %v7699_v58 }
0x32e6   :  { %v8068_v61 = vpop.eup %8067 }
0x32e7   :  { %v4391_v8 = vmul.f32 %v8068_v61, %v8062_v40  ;;  %v8070_v4 = vpop.eup %8069 }
0x32e8   :  { %v4597_v10 = vmul.f32 %v8070_v4, %v8060_v37  ;;  %v8786_v37 = vadd.f32 %v3074_v39, %v8620_v63  ;;  %v6625_v63 = vld [vmem:[%s8435_s3 + $0x30] sm:$0xff]  ;;  %v6640_v39 = vld [vmem:[%s8477_s5 + $0x3] ss:$0 sm:$0xff] }
0x32e9   :  { %7318 = vmatprep.mubr.msk.f32.mxu0 %vm3404_vm8, %v4391_v8  ;;  %v7705_v50 = vpack.c.bf16 %v6626_v41, %v6625_v63  ;;  %v6624_v8 = vld [vmem:[%s8454_s23 + $0x3] ss:$0 sm:$0xff]  ;;  %s8181_s23 = smov 7  }
0x32ea   :  { %7319 = vmatmul.mubr.msk.f32.vlgmr.msra.gmra.mrb[42].mxu0 %vm3404_vm8, %v4392_v2 }
0x32eb   :  { %7704 = vmatpush3.bf16.msk.msra.mxu0 %vm8632_vm11, %v7699_v58  ;;  %7332 = vmatprep.mubr.msk.f32.mxu0 %vm3404_vm8, %v4596_v7  ;;  %v6623_v58 = vld [vmem:[%s8449_s13 + $0x3] ss:$0 sm:$0xff]  ;;  %v6633_v7 = vld [vmem:[%s8442_s7 + $0xd0] sm:$0xff]  ;;  %s8174_s13 = smov 33  }
0x32ec   :  { %7335 = vmatprep.subr.mxu0 %v6600_v13  ;;  %7706 = vmatprep.subr.bf16.mxu1 %v7705_v50  ;;  %s6432_s5 = sld [smem:[%s8983_s0 + %s8174_s13]]  }
0x32ed   :  { %7708 = vmatpush3.bf16.msra.mxu1 %v7705_v50  ;;  %s6425_s13 = sld [smem:[%s8983_s0 + %s8180_s28]]  }
0x32ee   :  { %7333 = vmatmul.mubr.msk.f32.vlgmr.msra.gmra.mrb[44].mxu0 %vm3404_vm8, %v4597_v10  ;;  %v6634_v10 = vld [vmem:[%s8442_s7 + $0xd8] sm:$0xff] }
0x32ef   :  { %7336 = vmatpush3.msra.mxu0 %v6600_v13 }
0x32f0   :  { %7340 = vmatprep.subr.mxu0 %v6599_v14 }
0x33bd   :  { %v7320_v16 = vpop.f32.mrb[42].mxu0 }
0x33be   :  { %v4472_v5 = vpop.f32.mrb[43].mxu0 }
0x33c1   :  { %v7334_v18 = vpop.f32.mrb[44].mxu0 }
0x33c2   :  { %v4677_v19 = vpop.f32.mrb[45].mxu0 }
0x33c3   :  { %7337 = vmatprep.mubr.msk.f32.mxu0 %vm1311_vm4, %v4677_v19 }
0x33c4   :  { %7338 = vmatmul.mubr.msk.f32.vlgmr.msra.gmra.mrb[46].mxu0 %vm1311_vm4, %v7334_v18  ;;  %v6636_v18 = vld [vmem:[%s8442_s7 + $0xe8] sm:$0xff] }
0x33c5   :  { %7341 = vmatpush3.msra.mxu0 %v6599_v14  ;;  %7342 = vmatprep.mubr.msk.f32.mxu0 %vm1311_vm4, %v4472_v5  ;;  %v6635_v5 = vld [vmem:[%s8442_s7 + $0xe0] sm:$0xff] }
0x33c6   :  { %v7717_v19 = vpack.c.bf16 %v6636_v18, %v6635_v5 }
0x33cc   :  { %7343 = vmatmul.mubr.msk.f32.vlgmr.msra.gmra.mrb[46].mxu0 %vm1311_vm4, %v7320_v16  ;;  %v7713_v16 = vpack.c.bf16 %v6634_v10, %v6633_v7 }
0x349f   :  { %v7344_v21 = vpop.f32.mrb[46].mxu0 }
0x34a0   :  { %v4855_v22 = vadd.f32 %v7344_v21, %v6620_v20  ;;  %v4839_v23 = vpop.f32.mrb[47].mxu0  ;;  %v6638_v21 = vld [vmem:[%s8442_s7 + $0xf8] sm:$0xff] }
0x34a1   :  { %v4854_v24 = vadd.f32 %v6620_v20, %v4839_v23  ;;  %v6637_v20 = vld [vmem:[%s8442_s7 + $0xf0] sm:$0xff]  ;;  %v6628_v23 = vld [vmem:[%s8469_s29 + $0x3] ss:$0 sm:$0xff] }
0x34a2   :  { %v4857_v9 = vadd.f32 %v4855_v22, %v8718_v35  ;;  %v3069_v35 = vadd.f32 %v6530_v27, %v8659_v55  ;;  %v3086_v55 = vsel %vm161_vm1, %v8786_v37, 0.0  ;;  %v7721_v22 = vpack.c.bf16 %v6638_v21, %v6637_v20 }
0x34a3   :  { %v4856_v59 = vadd.f32 %v4854_v24, %v8714_v32 }
0x34a4   :  { %v4865_v12 = vsel %vm3901_vm12, %v4857_v9, 0.0  ;;  %v8790_v40 = vadd.f32 %v3069_v35, %v8614_v3  ;;  %v6631_v3 = vld [vmem:[%s8442_s7 + $0xc0] sm:$0xff]  ;;  %s6429_s7 = sld [smem:[%s8983_s0 + %s8173_s24]]  }
0x34a5   :  { %4866 = vadd.xlane.f32.xlu0 %v4865_v12  ;;  %v4862_v26 = vsel %vm161_vm1, %v4856_v59, 0.0  ;;  %v7709_v45 = vpack.c.bf16 %v6632_v43, %v6631_v3  ;;  %v5145_v43 = vld [vmem:[%s6433_s20 + $0x8] sm:$0xff] }
0x34a6   :  { %4863 = vadd.xlane.f32.xlu1 %v4862_v26  ;;  %v3083_v1 = vsel %vm161_vm1, %v8790_v40, 0.0 }
0x34a7   :  { %7710 = vmatprep.subr.bf16.mxu1 %v7709_v45 }
0x3532   :  { %v4867_v28 = vpop.xlane.xlu0 %4866 }
0x3533   :  { %v4869_v42 = vmul.f32 0.0625, %v4867_v28  ;;  %v4864_v29 = vpop.xlane.xlu1 %4863 }
0x3534   :  { %v4868_v30 = vmul.f32 0.0625, %v4864_v29 }
0x3535   :  { %v4871_v31 = vsub.f32 %v4857_v9, %v4869_v42 }
0x3536   :  { %v4870_v17 = vsub.f32 %v4856_v59, %v4868_v30 }
0x3537   :  { %v4873_v32 = vmul.f32 %v4871_v31, %v4871_v31 }
0x3538   :  { %v4872_v34 = vmul.f32 %v4870_v17, %v4870_v17 }
0x3539   :  { %v4877_v38 = vsel %vm3901_vm12, %v4873_v32, 0.0 }
0x353a   :  { %4878 = vadd.xlane.f32.xlu0 %v4877_v38  ;;  %v4874_v54 = vsel %vm161_vm1, %v4872_v34, 0.0 }
0x353b   :  { %4875 = vadd.xlane.f32.xlu1 %v4874_v54 }
0x353e   :  { %3087 = vadd.xlane.f32.xlu0 %v3086_v55 }
0x353f   :  { %3084 = vadd.xlane.f32.xlu1 %v3083_v1 }
0x35c7   :  { %v4879_v46 = vpop.xlane.xlu0 %4878 }
0x35c8   :  { %v4881_v48 = vmul.f32 0.0625, %v4879_v46  ;;  %v4876_v49 = vpop.xlane.xlu1 %4875 }
0x35c9   :  { %v4880_v53 = vmul.f32 0.0625, %v4876_v49 }
0x35ca   :  { %v4883_v56 = vadd.f32 1e-05, %v4881_v48 }
0x35cb   :  { %v4882_v47 = vadd.f32 1e-05, %v4880_v53  ;;  %v3088_v28 = vpop.xlane.xlu0 %3087 }
0x35cc   :  { %8071 = vrsqrt.f32 %v4883_v56  ;;  %v3085_v42 = vpop.xlane.xlu1 %3084  ;;  %v3090_v29 = vmul.f32 0.0625, %v3088_v28 }
0x35cd   :  { %8073 = vrsqrt.f32 %v4882_v47  ;;  %v3089_v30 = vmul.f32 0.0625, %v3085_v42 }
0x35ce   :  { %v3092_v35 = vsub.f32 %v8786_v37, %v3090_v29 }
0x35cf   :  { %v3091_v34 = vsub.f32 %v8790_v40, %v3089_v30  ;;  %v5144_v40 = vld [vmem:[%s6433_s20] sm:$0xff] }
0x35d0   :  { %v3094_v63 = vmul.f32 %v3092_v35, %v3092_v35 }
0x35d1   :  { %v3093_v50 = vmul.f32 %v3091_v34, %v3091_v34 }
0x35d2   :  { %v3098_v3 = vsel %vm161_vm1, %v3094_v63, 0.0 }
0x35d3   :  { %v3095_v37 = vsel %vm161_vm1, %v3093_v50, 0.0 }
0x35d6   :  { %v8072_v57 = vpop.eup %8071 }
0x35d7   :  { %v8074_v60 = vpop.eup %8073  ;;  %v4887_v0 = vmul.f32 %v8072_v57, %v4871_v31 }
0x35d8   :  { %v4886_v61 = vmul.f32 %v8074_v60, %v4870_v17 }
0x35d9   :  { %v4895_v2 = vmul.f32 %v6623_v58, %v4887_v0 }
0x35da   :  { %v4894_v4 = vmul.f32 %v6623_v58, %v4886_v61 }
0x35db   :  { %v4903_v14 = vadd.f32 %v6624_v8, %v4895_v2 }
0x35dc   :  { %v4902_v13 = vadd.f32 %v6624_v8, %v4894_v4 }
0x35de   :  { %7349 = vmatprep.mubr.msk.f32.mxu1 %vm161_vm1, %v4902_v13 }
0x35df   :  { %7350 = vmatmul.mubr.msk.f32.vlgmr.msra.gmra.mrb[34].mxu1 %vm161_vm1, %v4903_v14 }
0x35e0   :  { %7712 = vmatpush3.bf16.msra.mxu1 %v7709_v45  ;;  %v7725_v45 = vpack.c.bf16 %v5145_v43, %v5144_v40 }
0x35e1   :  { %7714 = vmatprep.subr.bf16.mxu1 %v7713_v16 }
0x35e2   :  { %7726 = vmatprep.subr.bf16.mxu0 %v7725_v45 }
0x35e3   :  { %7728 = vmatpush3.bf16.msra.mxu0 %v7725_v45 }
0x35e4   :  { %7716 = vmatpush3.bf16.msra.mxu1 %v7713_v16 }
0x35e5   :  { %7718 = vmatprep.subr.bf16.mxu1 %v7717_v19 }
0x35e8   :  { %7720 = vmatpush3.bf16.msra.mxu1 %v7717_v19  ;;  %v6536_v19 = vld [vmem:[%s8494_s25 + $0x1] ss:$0 sm:$0xff] }
0x35e9   :  { %7722 = vmatprep.subr.bf16.mxu1 %v7721_v22 }
0x35ec   :  { %7724 = vmatpush3.bf16.msra.mxu1 %v7721_v22 }
0x36b2   :  { %v7351_v24 = vpop.f32.mrb[34].mxu1 }
0x36b3   :  { %v4993_v9 = vadd.f32 %v7351_v24, %v6628_v23  ;;  %v4987_v59 = vpop.f32.mrb[35].mxu1  ;;  %v5234_v24 = vld [vmem:[%s6429_s7] sm:$0xff] }
0x36b4   :  { %v4988_v12 = vadd.f32 %v6628_v23, %v4987_v59 }
0x36b5   :  { %v4997_v27 = vmax.f32 %v4993_v9, 0.0  ;;  %v5235_v9 = vld [vmem:[%s6429_s7 + $0x8] sm:$0xff] }
0x36b6   :  { %v4996_v26 = vmax.f32 %v4988_v12, 0.0  ;;  %v7729_v59 = vpack.c.bf16 %v5235_v9, %v5234_v24 }
0x36b8   :  { %7368 = vmatprep.mubr.msk.f32.mxu1 %vm2036_vm6, %v4996_v26  ;;  %7730 = vmatprep.subr.bf16.mxu0 %v7729_v59 }
0x36b9   :  { %7369 = vmatmul.mubr.msk.f32.vlgmr.msra.gmra.mrb[36].mxu1 %vm2036_vm6, %v4997_v27 }
0x378c   :  { %v7370_v31 = vpop.f32.mrb[36].mxu1 }
0x378d   :  { %v5093_v17 = vadd.f32 %v7370_v31, %v6640_v39  ;;  %v5087_v32 = vpop.f32.mrb[37].mxu1 }
0x378e   :  { %v5088_v38 = vadd.f32 %v6640_v39, %v5087_v32  ;;  %v6645_v39 = vld [vmem:[%s8489_s12 + $0x3] ss:$0 sm:$0xff] }
0x378f   :  { %v5097_v54 = vadd.f32 %v5093_v17, %v4903_v14  ;;  %v6535_v14 = vld [vmem:[%s8489_s12 + $0x1] ss:$0 sm:$0xff]  ;;  %v6646_v32 = vld [vmem:[%s8494_s25 + $0x3] ss:$0 sm:$0xff]  ;;  %s8175_s12 = smov 29   ;;  %s8182_s25 = smov 25  }
0x3790   :  { %v5096_v55 = vadd.f32 %v5088_v38, %v4902_v13  ;;  %s6428_s30 = sld [smem:[%s8983_s0 + %s8175_s12]]  }
0x3791   :  { %v5105_v1 = vsel %vm3901_vm12, %v5097_v54, 0.0  ;;  %s6406_s12 = sld [smem:[%s8983_s0 + %s8181_s23]]  }
0x3792   :  { %5106 = vadd.xlane.f32.xlu0 %v5105_v1  ;;  %v5102_v41 = vsel %vm161_vm1, %v5096_v55, 0.0  ;;  %v6647_v1 = vld [vmem:[%s6432_s5] ss:$0 sm:$0xff]  ;;  %s6424_s2 = sld [smem:[%s8983_s0 + %s8182_s25]]  }
0x3793   :  { %5103 = vadd.xlane.f32.xlu1 %v5102_v41 }
0x3796   :  { %3099 = vadd.xlane.f32.xlu0 %v3098_v3 }
0x3797   :  { %3096 = vadd.xlane.f32.xlu1 %v3095_v37  ;;  %v6650_v37 = vld [vmem:[%s6428_s30] ss:$0 sm:$0xff] }
0x381f   :  { %v5107_v46 = vpop.xlane.xlu0 %5106 }
0x3820   :  { %v5109_v48 = vmul.f32 0.0625, %v5107_v46  ;;  %v5104_v49 = vpop.xlane.xlu1 %5103 }
0x3821   :  { %v5108_v53 = vmul.f32 0.0625, %v5104_v49 }
0x3822   :  { %v5111_v56 = vsub.f32 %v5097_v54, %v5109_v48 }
0x3823   :  { %v5110_v47 = vsub.f32 %v5096_v55, %v5108_v53  ;;  %v3100_v57 = vpop.xlane.xlu0 %3099 }
0x3824   :  { %v3102_v58 = vmul.f32 0.0625, %v3100_v57  ;;  %v3097_v60 = vpop.xlane.xlu1 %3096  ;;  %v5113_v0 = vmul.f32 %v5111_v56, %v5111_v56 }
0x3825   :  { %v3101_v61 = vmul.f32 0.0625, %v3097_v60  ;;  %v5112_v8 = vmul.f32 %v5110_v47, %v5110_v47 }
0x3826   :  { %v3104_v2 = vadd.f32 1e-05, %v3102_v58  ;;  %v5117_v4 = vsel %vm3901_vm12, %v5113_v0, 0.0  ;;  %v5328_v0 = vld [vmem:[%s6404_s6 + $0x8] sm:$0xff] }
0x3827   :  { %v3103_v7 = vadd.f32 1e-05, %v3101_v61  ;;  %5118 = vadd.xlane.f32.xlu0 %v5117_v4  ;;  %v5114_v10 = vsel %vm161_vm1, %v5112_v8, 0.0 }
0x3828   :  { %8075 = vrsqrt.f32 %v3104_v2  ;;  %5115 = vadd.xlane.f32.xlu1 %v5114_v10  ;;  %v5327_v2 = vld [vmem:[%s6404_s6] sm:$0xff] }
0x3829   :  { %8077 = vrsqrt.f32 %v3103_v7 }
0x3832   :  { %v8076_v13 = vpop.eup %8075 }
0x3833   :  { %v8078_v16 = vpop.eup %8077  ;;  %v3108_v5 = vmul.f32 %v8076_v13, %v3092_v35 }
0x3834   :  { %v3107_v18 = vmul.f32 %v8078_v16, %v3091_v34 }
0x3835   :  { %v3116_v20 = vmul.f32 %v6535_v14, %v3108_v5 }
0x3836   :  { %v3115_v21 = vmul.f32 %v6535_v14, %v3107_v18 }
0x3837   :  { %v3124_v23 = vadd.f32 %v6536_v19, %v3116_v20 }
0x3838   :  { %v3123_v22 = vadd.f32 %v6536_v19, %v3115_v21 }
0x383a   :  { %7375 = vmatprep.mubr.msk.f32.mxu0 %vm161_vm1, %v3123_v22 }
0x383b   :  { %7376 = vmatmul.mubr.msk.f32.vlgmr.msra.gmra.mrb[48].mxu0 %vm161_vm1, %v3124_v23 }
0x383c   :  { %7732 = vmatpush3.bf16.msra.mxu0 %v7729_v59 }
0x38b4   :  { %v5119_v12 = vpop.xlane.xlu0 %5118 }
0x38b5   :  { %v5121_v26 = vmul.f32 0.0625, %v5119_v12  ;;  %v5116_v27 = vpop.xlane.xlu1 %5115 }
0x38b6   :  { %v5120_v28 = vmul.f32 0.0625, %v5116_v27 }
0x38b7   :  { %v5123_v42 = vadd.f32 1e-05, %v5121_v26 }
0x38b8   :  { %v5122_v29 = vadd.f32 1e-05, %v5120_v28 }
0x38b9   :  { %8079 = vrsqrt.f32 %v5123_v42 }
0x38ba   :  { %8081 = vrsqrt.f32 %v5122_v29 }
0x38c3   :  { %v8080_v30 = vpop.eup %8079 }
0x38c4   :  { %v8082_v31 = vpop.eup %8081  ;;  %v5127_v35 = vmul.f32 %v8080_v30, %v5111_v56 }
0x38c5   :  { %v5126_v17 = vmul.f32 %v8082_v31, %v5110_v47 }
0x38c6   :  { %v5135_v34 = vmul.f32 %v6645_v39, %v5127_v35 }
0x38c7   :  { %v5134_v38 = vmul.f32 %v6645_v39, %v5126_v17 }
0x38c8   :  { %v5143_v55 = vadd.f32 %v6646_v32, %v5135_v34 }
0x38c9   :  { %v5142_v54 = vadd.f32 %v6646_v32, %v5134_v38 }
0x38cb   :  { %7382 = vmatprep.mubr.msk.f32.mxu0 %vm161_vm1, %v5142_v54 }
0x38cc   :  { %7383 = vmatmul.mubr.msk.f32.vlgmr.msra.gmra.mrb[50].mxu0 %vm161_vm1, %v5143_v55 }
0x390e   :  { %v7377_v63 = vpop.f32.mrb[48].mxu0 }
0x390f   :  { %v5231_v41 = vadd.f32 %v7377_v63, %v6647_v1  ;;  %v5225_v50 = vpop.f32.mrb[49].mxu0  ;;  %v1084_v63 = vrot.slane %v8353_v51, 2 }
0x3910   :  { %v5226_v3 = vadd.f32 %v6647_v1, %v5225_v50 }
0x3912   :  { %5530 = vrot.lane.b32.xlu0 %v5226_v3, %s8155_s16  ;;  %7389 = vmatprep.mubr.msk.f32.mxu0 %vm1311_vm4, %v5226_v3 }
0x3984   :  { %v5531_v53 = vpop.permute.xlu0 %5530 }
0x399f   :  { %v7384_v40 = vpop.f32.mrb[50].mxu0 }
0x39a0   :  { %v5321_v43 = vadd.f32 %v7384_v40, %v6650_v37  ;;  %v5315_v45 = vpop.f32.mrb[51].mxu0 }
0x39a1   :  { %v5316_v46 = vadd.f32 %v6650_v37, %v5315_v45 }
0x39a3   :  { %v8845_v48 = vpack.i.bf16 %v5321_v43, %v5316_v46  ;;  %v7733_v49 = vpack.c.bf16 %v5321_v43, %v5316_v46 }
0x39a5   :  { %7917 = vrot.lane.b32.xlu1 %v8845_v48, %s8155_s16  ;;  %7735 = vmatprep.subr.msk.bf16.mxu0 %vm8363_vm5, %v7733_v49 }
0x39a6   :  { %7738 = vmatpush3.bf16.xpose.msk.msra.mxu0 %vm8363_vm5, %v7733_v49 }
0x39a9   :  { %5532 = vrot.lane.b32.xlu1 %v5231_v41, %s8155_s16  ;;  %s8183_s16 = smov 35  }
0x39ad   :  { %7390 = vmatmul.mubr.msk.f32.vlgmr.msra.gmra.mrb[52].mxu0 %vm1311_vm4, %v5231_v41  ;;  %v1086_v41 = vadd.f32 %v1084_v63, %v8228_v15  ;;  %v6176_v63 = vld [vmem:[%s6425_s13] sm:$0xff] }
0x39ae   :  { %7403 = vmatprep.mubr.msk.f32.mxu0 %vm1311_vm4, %v5531_v53 }
0x39af   :  { %v6452_v43 = vmul.f32 -1.442695, %v1086_v41 }
0x3a17   :  { %v7918_v56 = vpop.permute.xlu1 %7917 }
0x3a18   :  { %v7920_v47 = vunpack.i.h.bf16 %v7918_v56  ;;  %v7919_v57 = vunpack.i.l.bf16 %v7918_v56 }
0x3a1a   :  { %v7745_v58 = vpack.c.bf16 %v7920_v47, %v7919_v57 }
0x3a1b   :  { %v5533_v60 = vpop.permute.xlu1 %5532 }
0x3a1c   :  { %7747 = vmatprep.subr.msk.bf16.mxu0 %vm8363_vm5, %v7745_v58 }
0x3a1d   :  { %7750 = vmatpush3.bf16.xpose.msk.msra.mxu0 %vm8363_vm5, %v7745_v58 }
0x3a24   :  { %7404 = vmatmul.mubr.msk.f32.vlgmr.msra.gmra.mrb[54].mxu0 %vm1311_vm4, %v5533_v60 }
0x3a80   :  { %v7391_v61 = vpop.f32.mrb[52].mxu0 }
0x3a81   :  { %v5417_v8 = vmul.f32 0.35355338, %v7391_v61  ;;  %v5407_v4 = vpop.f32.mrb[53].mxu0 }
0x3a82   :  { %v5416_v7 = vmul.f32 0.35355338, %v5407_v4 }
0x3a83   :  { %v5419_v10 = vadd.f32 %v5417_v8, %v5328_v0 }
0x3a84   :  { %v5418_v13 = vadd.f32 %v5416_v7, %v5327_v2 }
0x3a85   :  { %v5423_v14 = vsel %vm3404_vm8, %v5419_v10, -inf }
0x3a86   :  { %5424 = vmax.xlane.f32.xlu0 %v5423_v14  ;;  %v5420_v62 = vsel %vm3404_vm8, %v5418_v13, -inf }
0x3a87   :  { %5421 = vmax.xlane.f32.xlu1 %v5420_v62 }
0x3af7   :  { %v7405_v16 = vpop.f32.mrb[54].mxu0 }
0x3af8   :  { %v5622_v5 = vmul.f32 0.35355338, %v7405_v16  ;;  %v5612_v18 = vpop.f32.mrb[55].mxu0  ;;  %v5325_v16 = vld [vmem:[%s6431_s8 + $0x8] sm:$0xff] }
0x3af9   :  { %v5621_v19 = vmul.f32 0.35355338, %v5612_v18 }
0x3afa   :  { %v5624_v20 = vadd.f32 %v5622_v5, %v5328_v0 }
0x3afb   :  { %v5623_v21 = vadd.f32 %v5621_v19, %v5327_v2 }
0x3afc   :  { %v5628_v22 = vsel %vm3404_vm8, %v5624_v20, -inf }
0x3afd   :  { %5629 = vmax.xlane.f32.xlu1 %v5628_v22  ;;  %v5625_v23 = vsel %vm3404_vm8, %v5623_v21, -inf }
0x3afe   :  { %5626 = vmax.xlane.f32.xlu0 %v5625_v23 }
0x3b13   :  { %v5425_v24 = vpop.xlane.xlu0 %5424 }
0x3b14   :  { %v5427_v9 = vsub.f32 %v5419_v10, %v5425_v24  ;;  %v5422_v59 = vpop.xlane.xlu1 %5421 }
0x3b15   :  { %v5426_v12 = vsub.f32 %v5418_v13, %v5422_v59  ;;  %v5907_v59 = vld [vmem:[%s6407_s21 + $0x10] sm:$0xff] }
0x3b16   :  { %v5430_v26 = vmul.f32 1.442695, %v5427_v9 }
0x3b17   :  { %v5428_v27 = vmul.f32 1.442695, %v5426_v12  ;;  %v5908_v12 = vld [vmem:[%s6407_s21 + $0x18] sm:$0xff] }
0x3b18   :  { %8083 = vpow2.f32 %v5430_v26  ;;  %v7761_v26 = vpack.c.bf16 %v5908_v12, %v5907_v59 }
0x3b19   :  { %8085 = vpow2.f32 %v5428_v27 }
0x3b22   :  { %v8084_v28 = vpop.eup %8083 }
0x3b23   :  { %v8086_v42 = vpop.eup %8085  ;;  %v5435_v29 = vsel %vm3404_vm8, %v8084_v28, 0.0 }
0x3b24   :  { %5436 = vadd.xlane.f32.xlu1 %v5435_v29  ;;  %v5432_v30 = vsel %vm3404_vm8, %v8086_v42, 0.0 }
0x3b25   :  { %5433 = vadd.xlane.f32.xlu0 %v5432_v30 }
0x3b8a   :  { %v5630_v39 = vpop.xlane.xlu1 %5629 }
0x3b8b   :  { %v5632_v31 = vsub.f32 %v5624_v20, %v5630_v39  ;;  %v5627_v35 = vpop.xlane.xlu0 %5626  ;;  %v5909_v39 = vld [vmem:[%s6408_s9] sm:$0xff] }
0x3b8c   :  { %v5631_v17 = vsub.f32 %v5623_v21, %v5627_v35 }
0x3b8d   :  { %v5635_v32 = vmul.f32 1.442695, %v5632_v31  ;;  %v5910_v31 = vld [vmem:[%s6408_s9 + $0x8] sm:$0xff] }
0x3b8e   :  { %v5633_v34 = vmul.f32 1.442695, %v5631_v17  ;;  %v7765_v35 = vpack.c.bf16 %v5910_v31, %v5909_v39 }
0x3b8f   :  { %8087 = vpow2.f32 %v5635_v32 }
0x3b90   :  { %8089 = vpow2.f32 %v5633_v34 }
0x3b91   :  { %8091 = vtanh.f32 %v1086_v41  ;;  %v6177_v41 = vld [vmem:[%s6425_s13 + $0x8] sm:$0xff] }
0x3b99   :  { %v8088_v38 = vpop.eup %8087 }
0x3b9a   :  { %v8090_v54 = vpop.eup %8089  ;;  %v5640_v55 = vsel %vm3404_vm8, %v8088_v38, 0.0 }
0x3b9b   :  { %5641 = vadd.xlane.f32.xlu1 %v5640_v55  ;;  %v5637_v1 = vsel %vm3404_vm8, %v8090_v54, 0.0  ;;  %v8092_v50 = vpop.eup %8091 }
0x3b9c   :  { %5638 = vadd.xlane.f32.xlu0 %v5637_v1 }
0x3bac   :  { %7927 = vrot.lane.b32.xlu1 %v8845_v48, %s8154_s15 }
0x3bb0   :  { %1099 = vrot.lane.b32.xlu1 %v8092_v50, %s8145_s18  ;;  %v6178_v50 = vld [vmem:[%s6425_s13 + $0x10] sm:$0xff] }
0x3bb1   :  { %v5437_v45 = vpop.xlane.xlu1 %5436 }
0x3bb2   :  { %7922 = vrot.lane.b32.xlu0 %v8845_v48, %s8152_s10  ;;  %v5434_v3 = vpop.xlane.xlu0 %5433  ;;  %s8965_s10 = sld [smem:[%s8983_s0 + %s8183_s16]]  }
0x3bb3   :  { %8093 = vrcp.f32 %v5434_v3  ;;  %v7769_v3 = vpack.c.bf16 %v6177_v41, %v6176_v63 }
0x3bb4   :  { %8095 = vpow2.f32 %v6452_v43 }
0x3bbd   :  { %v8094_v37 = vpop.eup %8093 }
0x3bbe   :  { %v5440_v40 = vmul.f32 %v8094_v37, %v8086_v42  ;;  %v8096_v51 = vpop.eup %8095  ;;  %v6179_v37 = vld [vmem:[%s6425_s13 + $0x18] sm:$0xff] }
0x3bbf   :  { %v1090_v15 = vadd.f32 1.0, %v8096_v51 }
0x3bc0   :  { %7396 = vmatprep.mubr.msk.f32.mxu1 %vm3404_vm8, %v5440_v40  ;;  %v7773_v40 = vpack.c.bf16 %v6179_v37, %v6178_v50 }
0x3bc1   :  { %8097 = vrcp.f32 %v1090_v15  ;;  %v6080_v15 = vlaneseq }
0x3bc2   :  { %8099 = vrcp.f32 %v5437_v45 }
0x3bc3   :  { %v6081_v45 = vshrl.u32 %v6080_v15, 7 }
0x3bcb   :  { %v8880_v60 = vpop.eup %8097 }
0x3bcc   :  { %v8100_v8 = vpop.eup %8099  ;;  %v1097_v5 = vmul.f32 %v8880_v60, %v1095_v25 }
0x3bcd   :  { %v5441_v10 = vmul.f32 %v8100_v8, %v8084_v28 }
0x3c28   :  { %v5642_v46 = vpop.xlane.xlu1 %5641 }
0x3c29   :  { %v5639_v49 = vpop.xlane.xlu0 %5638 }
0x3c2a   :  { %8101 = vrcp.f32 %v5639_v49  ;;  %v6087_v49 = vsub.s32 2, %v6081_v45 }
0x3c2b   :  { %8103 = vrcp.f32 %v5642_v46  ;;  %v6082_v46 = vsub.s32 0, %v6081_v45 }
0x3c2c   :  { %v7928_v53 = vpop.permute.xlu1 %7927 }
0x3c2d   :  { %v7923_v56 = vpop.permute.xlu0 %7922  ;;  %v7930_v48 = vunpack.i.h.bf16 %v7928_v53  ;;  %v7929_v47 = vunpack.i.l.bf16 %v7928_v53  ;;  %v6092_v53 = vsub.s32 4, %v6081_v45 }
0x3c2e   :  { %v7925_v57 = vunpack.i.h.bf16 %v7923_v56  ;;  %v7924_v58 = vunpack.i.l.bf16 %v7923_v56  ;;  %v6097_v56 = vsub.s32 6, %v6081_v45 }
0x3c2f   :  { %v7751_v4 = vpack.c.bf16 %v7930_v48, %v7929_v47  ;;  %v6122_v48 = vsub.s32 1, %v6081_v45  ;;  %v6127_v47 = vsub.s32 3, %v6081_v45 }
0x3c30   :  { %v7739_v0 = vpack.c.bf16 %v7925_v57, %v7924_v58  ;;  %v1100_v61 = vpop.permute.xlu1 %1099  ;;  %v6132_v57 = vsub.s32 5, %v6081_v45  ;;  %v6137_v58 = vsub.s32 7, %v6081_v45 }
0x3c31   :  { %v1102_v2 = vmul.f32 %v8880_v60, %v1100_v61  ;;  %v6674_v61 = vld [vmem:[%s6406_s12] ss:$0 sm:$0xff] }
0x3c32   :  { %7741 = vmatprep.subr.msk.bf16.mxu1 %vm8632_vm11, %v7739_v0 }
0x3c33   :  { %7744 = vmatpush3.bf16.msk.msra.mxu1 %vm8632_vm11, %v7739_v0  ;;  %1104 = vrot.lane.b32.xlu0 %v1102_v2, %s8145_s18 }
0x3c34   :  { %v8102_v7 = vpop.eup %8101  ;;  %7753 = vmatprep.subr.msk.bf16.mxu1 %vm8632_vm11, %v7751_v4 }
0x3c35   :  { %v5645_v13 = vmul.f32 %v8102_v7, %v8090_v54  ;;  %v8104_v14 = vpop.eup %8103 }
0x3c36   :  { %7397 = vmatmul.mubr.msk.f32.vlgmr.msra.gmra.mrb[38].mxu1 %vm3404_vm8, %v5441_v10  ;;  %v5646_v62 = vmul.f32 %v8104_v14, %v8088_v38 }
0x3c37   :  { %7410 = vmatprep.mubr.msk.f32.mxu1 %vm3404_vm8, %v5645_v13  ;;  %452 = vrot.lane.b32.xlu0 %v8249_v52, %s8146_s19  ;;  %v5324_v52 = vld [vmem:[%s6431_s8] sm:$0xff] }
0x3c38   :  { %7756 = vmatpush3.bf16.msk.msra.mxu1 %vm8632_vm11, %v7751_v4 }
0x3c39   :  { %7413 = vmatprep.subr.mxu1 %v5325_v16 }
0x3c3b   :  { %7411 = vmatmul.mubr.msk.f32.vlgmr.msra.gmra.mrb[40].mxu1 %vm3404_vm8, %v5646_v62  ;;  %676 = vrot.lane.b32.xlu0 %v8279_v33, %s8146_s19 }
0x3c3c   :  { %7414 = vmatpush3.msra.mxu1 %v5325_v16 }
0x3c3d   :  { %7418 = vmatprep.subr.mxu1 %v5324_v52 }
0x3c3f   :  { %1004 = vrot.lane.b32.xlu0 %v8332_v44, %s8146_s19 }
0x3ca5   :  { %v1105_v18 = vpop.permute.xlu0 %1104 }
0x3ca6   :  { %v1107_v19 = vadd.f32 %v1105_v18, %v1097_v5 }
0x3ca8   :  { %8105 = vtanh.f32 %v1107_v19 }
0x3ca9   :  { %v453_v33 = vpop.permute.xlu0 %452 }
0x3caa   :  { %456 = vst.msk [vmem:[#allocation2] sm:$0xc] %vm455_vm13, %v453_v33 }
0x3cad   :  { %v677_v44 = vpop.permute.xlu0 %676 }
0x3cae   :  { %680 = vst.msk [vmem:[#allocation2] sm:$0xc0] %vm679_vm14, %v677_v44 }
0x3cb1   :  { %v1005_v20 = vpop.permute.xlu0 %1004 }
0x3cb2   :  { %v8106_v21 = vpop.eup %8105  ;;  %1007 = vst.msk [vmem:[#allocation2 + $0x8] sm:$0x30] %vm567_vm15, %v1005_v20 }
0x3cb3   :  { %1110 = vrot.lane.b32.xlu1 %v8106_v21, %s8145_s18 }
0x3cb7   :  { %564 = vrot.lane.b32.xlu1 %v8264_v11, %s8146_s19  ;;  %v5905_v11 = vld [vmem:[%s6407_s21] sm:$0xff] }
0x3cbb   :  { %893 = vrot.lane.b32.xlu1 %v8305_v6, %s8146_s19  ;;  %v5906_v6 = vld [vmem:[%s6407_s21 + $0x8] sm:$0xff] }
0x3cbc   :  { %v7757_v9 = vpack.c.bf16 %v5906_v6, %v5905_v11 }
0x3cbe   :  { %7758 = vmatprep.subr.bf16.mxu0 %v7757_v9 }
0x3cbf   :  { %7760 = vmatpush3.bf16.msra.mxu0 %v7757_v9 }
0x3cc0   :  { %7762 = vmatprep.subr.bf16.mxu0 %v7761_v26 }
0x3cc3   :  { %7764 = vmatpush3.bf16.msra.mxu0 %v7761_v26 }
0x3cc4   :  { %7770 = vmatprep.subr.bf16.mxu0 %v7769_v3 }
0x3d09   :  { %v7398_v36 = vpop.f32.mrb[38].mxu1 }
0x3d0a   :  { %v5521_v22 = vpop.f32.mrb[39].mxu1 }
0x3d0e   :  { %v7412_v23 = vpop.f32.mrb[40].mxu1 }
0x3d0f   :  { %v5726_v24 = vpop.f32.mrb[41].mxu1 }
0x3d10   :  { %7415 = vmatprep.mubr.msk.f32.mxu1 %vm1311_vm4, %v5726_v24 }
0x3d11   :  { %7416 = vmatmul.mubr.msk.f32.vlgmr.msra.gmra.mrb[42].mxu1 %vm1311_vm4, %v7412_v23 }
0x3d12   :  { %7419 = vmatpush3.msra.mxu1 %v5324_v52  ;;  %7420 = vmatprep.mubr.msk.f32.mxu1 %vm1311_vm4, %v5521_v22 }
0x3d13   :  { %7766 = vmatprep.subr.bf16.mxu1 %v7765_v35 }
0x3d19   :  { %7421 = vmatmul.mubr.msk.f32.vlgmr.msra.gmra.mrb[42].mxu1 %vm1311_vm4, %v7398_v36 }
0x3d1a   :  { %7768 = vmatpush3.bf16.msra.mxu1 %v7765_v35 }
0x3d1b   :  { %7777 = vmatprep.subr.bf16.mxu1 %v7769_v3 }
0x3d25   :  { %v1111_v27 = vpop.permute.xlu1 %1110 }
0x3d26   :  { %v1113_v28 = vmul.f32 %v8880_v60, %v1111_v27 }
0x3d28   :  { %1115 = vrot.lane.b32.xlu1 %v1113_v28, %s8146_s19  ;;  %s8179_s19 = smov 31  }
0x3d29   :  { %v565_v42 = vpop.permute.xlu1 %564  ;;  %s6430_s24 = sld [smem:[%s8983_s0 + %s8179_s19]]  }
0x3d2a   :  { %568 = vst.msk [vmem:[#allocation2] sm:$0x30] %vm567_vm15, %v565_v42 }
0x3d2d   :  { %v894_v29 = vpop.permute.xlu1 %893 }
0x3d2e   :  { %896 = vst.msk [vmem:[#allocation2 + $0x8] sm:$0xc] %vm455_vm13, %v894_v29 }
0x3d2f   :  { %v6671_v34 = vld [vmem:[%s6430_s24] ss:$0 sm:$0xff] }
0x3d31   :  { %v1119_v30 = vld [vmem:[#allocation2] sm:$0xff] }
0x3d32   :  { %7431 = vmatprep.mubr.msk.f32.mxu0 %vm243_vm3, %v1119_v30 }
0x3d9a   :  { %v1116_v17 = vpop.permute.xlu1 %1115 }
0x3d9b   :  { %1118 = vst.msk [vmem:[#allocation2 + $0x8] sm:$0xc0] %vm679_vm14, %v1116_v17 }
0x3da2   :  { %v1120_v32 = vld [vmem:[#allocation2 + $0x8] sm:$0xff] }
0x3da3   :  { %7432 = vmatmul.mubr.msk.f32.vlgmr.msra.gmra.mrb[56].mxu0 %vm243_vm3, %v1120_v32 }
0x3da4   :  { %7772 = vmatpush3.bf16.msra.mxu0 %v7769_v3 }
0x3da5   :  { %7774 = vmatprep.subr.bf16.mxu0 %v7773_v40 }
0x3da8   :  { %7776 = vmatpush3.bf16.msra.mxu0 %v7773_v40 }
0x3dec   :  { %v7422_v38 = vpop.f32.mrb[42].mxu1 }
0x3ded   :  { %v5888_v54 = vpop.f32.mrb[43].mxu1  ;;  %v5904_v1 = vadd.f32 %v7422_v38, %v6671_v34 }
0x3dee   :  { %v5903_v55 = vadd.f32 %v6671_v34, %v5888_v54 }
0x3df0   :  { %7438 = vmatprep.mubr.msk.f32.mxu1 %vm161_vm1, %v5903_v55 }
0x3df1   :  { %7439 = vmatmul.mubr.msk.f32.vlgmr.msra.gmra.mrb[44].mxu1 %vm161_vm1, %v5904_v1 }
0x3df2   :  { %7779 = vmatpush3.bf16.msra.mxu1 %v7769_v3 }
0x3df3   :  { %7778 = vmatprep.subr.bf16.mxu1 %v7773_v40 }
0x3df6   :  { %7780 = vmatpush3.bf16.msra.mxu1 %v7773_v40 }
0x3e76   :  { %v7433_v43 = vpop.f32.mrb[56].mxu0 }
0x3e77   :  { %v5984_v51 = vpop.f32.mrb[57].mxu0  ;;  %v6103_v60 = vrot.slane %v7433_v43, %v6082_v46  ;;  %v6108_v0 = vrot.slane %v7433_v43, %v6087_v49  ;;  %v6113_v8 = vrot.slane %v7433_v43, %v6092_v53  ;;  %v6118_v2 = vrot.slane %v7433_v43, %v6097_v56 }
0x3e78   :  { %v6143_v4 = vrot.slane %v7433_v43, %v6122_v48  ;;  %v6148_v7 = vrot.slane %v7433_v43, %v6127_v47  ;;  %v6153_v10 = vrot.slane %v7433_v43, %v6132_v57  ;;  %v6158_v13 = vrot.slane %v7433_v43, %v6137_v58 }
0x3e79   :  { %v6083_v14 = vrot.slane %v5984_v51, %v6082_v46  ;;  %v6123_v62 = vrot.slane %v5984_v51, %v6122_v48  ;;  %v6128_v52 = vrot.slane %v5984_v51, %v6127_v47  ;;  %v6133_v25 = vrot.slane %v5984_v51, %v6132_v57 }
0x3e7a   :  { %v6138_v5 = vrot.slane %v5984_v51, %v6137_v58  ;;  %v6088_v33 = vrot.slane %v5984_v51, %v6087_v49  ;;  %v6093_v44 = vrot.slane %v5984_v51, %v6092_v53  ;;  %v6098_v20 = vrot.slane %v5984_v51, %v6097_v56  ;;  %v6677_v51 = vld [vmem:[%s6424_s2] ss:$0 sm:$0xff] }
0x3ec4   :  { %v7440_v16 = vpop.f32.mrb[44].mxu1 }
0x3ec5   :  { %v6077_v18 = vadd.f32 %v7440_v16, %v6674_v61  ;;  %v6071_v19 = vpop.f32.mrb[45].mxu1 }
0x3ec6   :  { %v6072_v21 = vadd.f32 %v6674_v61, %v6071_v19 }
0x3ec7   :  { %v6124_v36 = vadd.f32 %v6123_v62, %v6077_v18  ;;  %v6129_v22 = vadd.f32 %v6128_v52, %v6077_v18  ;;  %v6134_v23 = vadd.f32 %v6133_v25, %v6077_v18  ;;  %v6139_v24 = vadd.f32 %v6138_v5, %v6077_v18 }
0x3ec8   :  { %v6144_v11 = vadd.f32 %v6143_v4, %v6077_v18  ;;  %v6149_v6 = vadd.f32 %v6148_v7, %v6077_v18  ;;  %v6154_v9 = vadd.f32 %v6153_v10, %v6077_v18  ;;  %v6159_v59 = vadd.f32 %v6158_v13, %v6077_v18 }
0x3ec9   :  { %8107 = vtanh.f32 %v6124_v36  ;;  %v6084_v12 = vadd.f32 %v6083_v14, %v6072_v21  ;;  %v6089_v26 = vadd.f32 %v6088_v33, %v6072_v21  ;;  %v6094_v27 = vadd.f32 %v6093_v44, %v6072_v21 }
0x3eca   :  { %8109 = vtanh.f32 %v6129_v22  ;;  %v6099_v28 = vadd.f32 %v6098_v20, %v6072_v21  ;;  %v6104_v42 = vadd.f32 %v6103_v60, %v6072_v21  ;;  %v6109_v29 = vadd.f32 %v6108_v0, %v6072_v21 }
0x3ecb   :  { %8111 = vtanh.f32 %v6134_v23  ;;  %v6114_v30 = vadd.f32 %v6113_v8, %v6072_v21  ;;  %v6119_v39 = vadd.f32 %v6118_v2, %v6072_v21 }
0x3ecc   :  { %8113 = vtanh.f32 %v6139_v24 }
0x3ecd   :  { %8115 = vtanh.f32 %v6144_v11 }
0x3ece   :  { %8117 = vtanh.f32 %v6149_v6 }
0x3ecf   :  { %8119 = vtanh.f32 %v6154_v9 }
0x3ed0   :  { %8121 = vtanh.f32 %v6084_v12 }
0x3ed1   :  { %8123 = vtanh.f32 %v6089_v26 }
0x3ed2   :  { %8125 = vtanh.f32 %v6094_v27 }
0x3ed3   :  { %v8108_v31 = vpop.eup %8107  ;;  %8127 = vtanh.f32 %v6159_v59 }
0x3ed4   :  { %v8110_v35 = vpop.eup %8109  ;;  %7461 = vmatprep.mubr.msk.f32.mxu1 %vm243_vm3, %v8108_v31  ;;  %8129 = vtanh.f32 %v6099_v28 }
0x3ed5   :  { %v8112_v17 = vpop.eup %8111  ;;  %7462 = vmatmul.mubr.msk.f32.vlgmr.msra.gmra.mrb[46].mxu1 %vm243_vm3, %v8110_v35  ;;  %8131 = vtanh.f32 %v6104_v42 }
0x3ed6   :  { %7464 = vmatprep.mubr.msk.f32.mxu1 %vm243_vm3, %v8112_v17  ;;  %v8114_v32 = vpop.eup %8113  ;;  %8133 = vtanh.f32 %v6109_v29 }
0x3ed7   :  { %v8116_v34 = vpop.eup %8115  ;;  %8135 = vtanh.f32 %v6114_v30 }
0x3ed8   :  { %v8118_v38 = vpop.eup %8117  ;;  %8137 = vtanh.f32 %v6119_v39 }
0x3ed9   :  { %7465 = vmatmul.mubr.msk.f32.gmra.mrb[48].mxu1 %vm243_vm3, %v8114_v32  ;;  %v8120_v54 = vpop.eup %8119 }
0x3eda   :  { %7467 = vmatprep.mubr.msk.f32.mxu1 %vm243_vm3, %v8116_v34  ;;  %v8122_v55 = vpop.eup %8121 }
0x3edb   :  { %v8124_v1 = vpop.eup %8123  ;;  %7449 = vmatprep.mubr.msk.f32.mxu0 %vm243_vm3, %v8122_v55 }
0x3edc   :  { %v8126_v63 = vpop.eup %8125  ;;  %7450 = vmatmul.mubr.msk.f32.vlgmr.msra.gmra.mrb[58].mxu0 %vm243_vm3, %v8124_v1 }
0x3edd   :  { %7468 = vmatmul.mubr.msk.f32.gmra.mrb[50].mxu1 %vm243_vm3, %v8118_v38  ;;  %7452 = vmatprep.mubr.msk.f32.mxu0 %vm243_vm3, %v8126_v63  ;;  %v8128_v41 = vpop.eup %8127 }
0x3ede   :  { %7470 = vmatprep.mubr.msk.f32.mxu1 %vm243_vm3, %v8120_v54  ;;  %v8130_v50 = vpop.eup %8129 }
0x3edf   :  { %v8132_v3 = vpop.eup %8131 }
0x3ee0   :  { %7453 = vmatmul.mubr.msk.f32.gmra.mrb[60].mxu0 %vm243_vm3, %v8130_v50  ;;  %v8134_v37 = vpop.eup %8133 }
0x3ee1   :  { %7471 = vmatmul.mubr.msk.f32.gmra.mrb[52].mxu1 %vm243_vm3, %v8128_v41  ;;  %7455 = vmatprep.mubr.msk.f32.mxu0 %vm243_vm3, %v8132_v3  ;;  %v8136_v40 = vpop.eup %8135 }
0x3ee2   :  { %v8138_v43 = vpop.eup %8137 }
0x3ee4   :  { %7456 = vmatmul.mubr.msk.f32.gmra.mrb[62].mxu0 %vm243_vm3, %v8134_v37 }
0x3ee5   :  { %7458 = vmatprep.mubr.msk.f32.mxu0 %vm243_vm3, %v8136_v40 }
0x3ee8   :  { %7459 = vmatmul.mubr.msk.f32.gmra.mrb[64].mxu0 %vm243_vm3, %v8138_v43 }
0x3fa8   :  { %v7463_v15 = vpop.f32.mrb[46].mxu1 }
0x3fa9   :  { %v6347_v45 = vadd.f32 %v7463_v15, %v6677_v51  ;;  %v6341_v46 = vpop.f32.mrb[47].mxu1 }
0x3faa   :  { %v6342_v49 = vadd.f32 %v6677_v51, %v6341_v46 }
0x3fab   :  { %6389 = vst [vmem:[%s8965_s10 + $0x48] sm:$0xff] %v6347_v45 }
0x3fac   :  { %6388 = vst [vmem:[%s8965_s10 + $0x40] sm:$0xff] %v6342_v49  ;;  %v7466_v53 = vpop.f32.mrb[48].mxu1 }
0x3fad   :  { %v6357_v56 = vadd.f32 %v7466_v53, %v6677_v51  ;;  %v6351_v48 = vpop.f32.mrb[49].mxu1 }
0x3fae   :  { %v6352_v47 = vadd.f32 %v6677_v51, %v6351_v48 }
0x3faf   :  { %6391 = vst [vmem:[%s8965_s10 + $0x58] sm:$0xff] %v6357_v56  ;;  %v7451_v57 = vpop.f32.mrb[58].mxu0 }
0x3fb0   :  { %6390 = vst [vmem:[%s8965_s10 + $0x50] sm:$0xff] %v6352_v47  ;;  %v7469_v58 = vpop.f32.mrb[50].mxu1  ;;  %v6307_v60 = vadd.f32 %v7451_v57, %v6677_v51  ;;  %v6301_v0 = vpop.f32.mrb[59].mxu0 }
0x3fb1   :  { %v6367_v61 = vadd.f32 %v7469_v58, %v6677_v51  ;;  %v6361_v8 = vpop.f32.mrb[51].mxu1  ;;  %v6302_v2 = vadd.f32 %v6677_v51, %v6301_v0 }
0x3fb2   :  { %v6362_v4 = vadd.f32 %v6677_v51, %v6361_v8  ;;  %6381 = vst [vmem:[%s8965_s10 + $0x8] sm:$0xff] %v6307_v60 }
0x3fb3   :  { %6393 = vst [vmem:[%s8965_s10 + $0x68] sm:$0xff] %v6367_v61  ;;  %6380 = vst [vmem:[%s8965_s10] sm:$0xff] %v6302_v2  ;;  %v7454_v7 = vpop.f32.mrb[60].mxu0 }
0x3fb4   :  { %6392 = vst [vmem:[%s8965_s10 + $0x60] sm:$0xff] %v6362_v4  ;;  %v7472_v10 = vpop.f32.mrb[52].mxu1  ;;  %v6317_v13 = vadd.f32 %v7454_v7, %v6677_v51  ;;  %v6311_v14 = vpop.f32.mrb[61].mxu0 }
0x3fb5   :  { %v6377_v62 = vadd.f32 %v7472_v10, %v6677_v51  ;;  %v6371_v16 = vpop.f32.mrb[53].mxu1  ;;  %v6312_v52 = vadd.f32 %v6677_v51, %v6311_v14 }
0x3fb6   :  { %v6372_v25 = vadd.f32 %v6677_v51, %v6371_v16  ;;  %6383 = vst [vmem:[%s8965_s10 + $0x18] sm:$0xff] %v6317_v13 }
0x3fb7   :  { %6395 = vst [vmem:[%s8965_s10 + $0x78] sm:$0xff] %v6377_v62  ;;  %6382 = vst [vmem:[%s8965_s10 + $0x10] sm:$0xff] %v6312_v52  ;;  %v7457_v5 = vpop.f32.mrb[62].mxu0 }
0x3fb8   :  { %6394 = vst [vmem:[%s8965_s10 + $0x70] sm:$0xff] %v6372_v25  ;;  %v6327_v18 = vadd.f32 %v7457_v5, %v6677_v51  ;;  %v6321_v19 = vpop.f32.mrb[63].mxu0 }
0x3fb9   :  { %v6322_v33 = vadd.f32 %v6677_v51, %v6321_v19 }
0x3fba   :  { %6385 = vst [vmem:[%s8965_s10 + $0x28] sm:$0xff] %v6327_v18 }
0x3fbb   :  { %6384 = vst [vmem:[%s8965_s10 + $0x20] sm:$0xff] %v6322_v33  ;;  %v7460_v44 = vpop.f32.mrb[64].mxu0 }
0x3fbc   :  { %v6337_v20 = vadd.f32 %v7460_v44, %v6677_v51  ;;  %v6331_v21 = vpop.f32.mrb[65].mxu0 }
0x3fbd   :  { %v6332_v36 = vadd.f32 %v6677_v51, %v6331_v21 }
0x3fbe   :  { %6387 = vst [vmem:[%s8965_s10 + $0x38] sm:$0xff] %v6337_v20 }
0x3fbf   :  { %6386 = vst [vmem:[%s8965_s10 + $0x30] sm:$0xff] %v6332_v36 }

</bundles_post_ra>
